<compile_context>
chip_gen: v7x
topology: tpu7x:2x2x1
jax: 0.10.0
libtpu: 0.0.40
codegen_flags: <defaults>
</compile_context>

<pallas_src>
import math
import numpy as np

import jax
import jax.numpy as jnp
from jax import lax
from jax.experimental import pallas as pl
from jax.experimental.pallas import tpu as pltpu


CH = 8  # selective-scan chunk length (multiple of 8 sublanes -> aligned chunked stores)


# ------------------------------------------------------------------
# numerics helpers (identical in kernels and reference path)
# ------------------------------------------------------------------
def _softplus(x):
    return jnp.maximum(x, 0.0) + jnp.log(1.0 + jnp.exp(-jnp.abs(x)))


def _sigmoid(x):
    return 1.0 / (1.0 + jnp.exp(-x))


def _fixed(shape):
    """Full-array BlockSpec for a grid=(1,) pallas_call."""
    nz = (0,) * len(shape)
    return pl.BlockSpec(shape, lambda i: nz)


# ------------------------------------------------------------------
# Kernel 1 (front): in_proj + depthwise conv2d (+bias) + SiLU, fused
# ------------------------------------------------------------------
def make_front_kernel(kconv, Hc, Wc):
    def _front_kernel(fpad_ref, fint_ref, wx_ref, wz_ref, cw_ref, cb_ref,
                      xc_ref, z_ref, xp_s):
        Hp = fpad_ref.shape[0]
        # gate branch: z = f @ Wz   (bf16 in, f32 acc, stored bf16)
        z_ref[...] = jnp.dot(fint_ref[...].astype(jnp.bfloat16), wz_ref[...],
                             preferred_element_type=jnp.float32).astype(z_ref.dtype)
        # in_proj (x half) applied row-by-row to the zero-padded raw input; in_proj has no bias so
        # in_proj(0) == 0 and the halo stays zero -> no padded-activation HBM pass is needed.
        wx = wx_ref[...]
        for h in range(Hp):
            xp_s[h] = jnp.dot(fpad_ref[h].astype(jnp.bfloat16), wx,
                              preferred_element_type=jnp.float32)
        # depthwise conv (+bias) + SiLU, channels-last (channels on the lane axis)
        acc = cb_ref[...] + jnp.zeros((Hc, Wc, wx.shape[1]), jnp.float32)
        for di in range(kconv):
            for dj in range(kconv):
                t = di * kconv + dj
                acc = acc + xp_s[di:di + Hc, dj:dj + Wc, :] * cw_ref[t:t + 1, :]
        xc_ref[...] = acc * _sigmoid(acc)
    return _front_kernel


def pallas_front(f_pad, f_int, wx, wz, cw, cb, kconv, Hc, Wc):
    Hp, Wp, _ = f_pad.shape
    HW = f_int.shape[0]
    d_inner = wx.shape[1]
    return pl.pallas_call(
        make_front_kernel(kconv, Hc, Wc),
        out_shape=(jax.ShapeDtypeStruct((Hc, Wc, d_inner), jnp.float32),
                   jax.ShapeDtypeStruct((HW, d_inner), jnp.bfloat16)),
        grid=(1,),
        in_specs=[_fixed(f_pad.shape), _fixed(f_int.shape), _fixed(wx.shape),
                  _fixed(wz.shape), _fixed(cw.shape), _fixed(cb.shape)],
        out_specs=(_fixed((Hc, Wc, d_inner)), _fixed((HW, d_inner))),
        scratch_shapes=[pltpu.VMEM((Hp, Wp, d_inner), jnp.float32)],
        # TODO(synk): for production image sizes, row-tile (grid over Hc with halo rows) and set a
        # generation-aware vmem_limit_bytes (v5e 16MiB / v7x 64MiB) so blocks double-buffer.
    )(f_pad, f_int, wx, wz, cw, cb)


def front_ref(f_pad, f_int, wx, wz, cw, cb, kconv, Hc, Wc):
    d_inner = wx.shape[1]
    z = jnp.dot(f_int.astype(jnp.bfloat16), wz, preferred_element_type=jnp.float32)
    xp = jnp.dot(f_pad.astype(jnp.bfloat16), wx, preferred_element_type=jnp.float32)
    acc = cb + jnp.zeros((Hc, Wc, d_inner), jnp.float32)
    for di in range(kconv):
        for dj in range(kconv):
            t = di * kconv + dj
            acc = acc + xp[di:di + Hc, dj:dj + Wc, :] * cw[t:t + 1, :]
    return acc * _sigmoid(acc), z.astype(jnp.bfloat16)


# ------------------------------------------------------------------
# Kernel 2 (scan): fused x_proj + dt_proj + selective scan (Mamba SSM)
#   lane-dense layout: s/dt/y [Lp, D], state h [N, D]; grid over the K=4 directions
# ------------------------------------------------------------------
def _scan_kernel(s_ref, xwdt_ref, xwb_ref, xwc_ref, dw_ref, A_ref, D_ref, bias_ref,
                 y_ref, dl_sc, b_sc, c_sc):
    Lp, Dt = s_ref.shape
    N = A_ref.shape[0]

    s_bf = s_ref[...]                                                               # bf16 [Lp, Dt]
    # ---- fused x_proj / dt_proj (whole VMEM-resident sequence; MXU bf16-in / f32-acc) ----
    dt_low = jnp.dot(s_bf, xwdt_ref[...], preferred_element_type=jnp.float32)       # [Lp, R]
    b_sc[...] = jnp.dot(s_bf, xwb_ref[...], preferred_element_type=jnp.float32)     # [Lp, N]
    c_sc[...] = jnp.dot(s_bf, xwc_ref[...], preferred_element_type=jnp.float32)     # [Lp, N]
    dts = jnp.dot(dt_low.astype(jnp.bfloat16), dw_ref[...],
                  preferred_element_type=jnp.float32)                               # [Lp, Dt]
    dl_sc[...] = _softplus(dts + bias_ref[...])          # delta, vectorized off the recurrence

    A = A_ref[...]                                       # [N, Dt]
    Dp = D_ref[...]                                      # [1, Dt]
    n_chunks = Lp // CH

    def chunk_body(ci, h):
        start = pl.multiple_of(ci * CH, CH)
        x_c = s_ref[pl.ds(start, CH), :].astype(jnp.float32)   # [CH, Dt]
        d_c = dl_sc[pl.ds(start, CH), :]                       # [CH, Dt]
        b_c = b_sc[pl.ds(start, CH), :]                        # [CH, N]
        c_c = c_sc[pl.ds(start, CH), :]                        # [CH, N]

        # hoisted off the serial chain: one vectorized EUP burst + vectorized broadcasts per chunk
        dA_c = jnp.exp(d_c[:, None, :] * A[None, :, :])        # [CH, N, Dt]
        dBx_c = (d_c * x_c)[:, None, :] * b_c[:, :, None]      # [CH, N, Dt]
        cb_c = jnp.broadcast_to(c_c[:, :, None], (CH, N, Dt))  # [CH, N, Dt]

        ys = []
        for j in range(CH):   # serial chain per step: VPU mul-add + VPU mul + one sublane reduce
            h = dA_c[j] * h + dBx_c[j]
            ys.append(jnp.sum(h * cb_c[j], axis=0, keepdims=True))
        y_c = jnp.concatenate(ys, axis=0) + Dp * x_c            # [CH, Dt]
        y_ref[pl.ds(start, CH), :] = y_c                        # one aligned store per chunk
        return h

    lax.fori_loop(0, n_chunks, chunk_body, jnp.zeros((N, Dt), jnp.float32))


def pallas_scan(s, xw_dt, xw_b, xw_c, dw, A_t, Ds, bias):
    K, Lp, Dt = s.shape
    N = A_t.shape[1]
    R = dw.shape[1]

    def b3(d1, d2):
        return pl.BlockSpec((None, d1, d2), lambda k: (k, 0, 0))

    return pl.pallas_call(
        _scan_kernel,
        out_shape=jax.ShapeDtypeStruct((K, Lp, Dt), jnp.float32),
        grid=(K,),
        in_specs=[b3(Lp, Dt), b3(Dt, R), b3(Dt, N), b3(Dt, N), b3(R, Dt),
                  b3(N, Dt), b3(1, Dt), b3(1, Dt)],
        out_specs=b3(Lp, Dt),
        scratch_shapes=[pltpu.VMEM((Lp, Dt), jnp.float32),   # delta
                        pltpu.VMEM((Lp, N), jnp.float32),    # B
                        pltpu.VMEM((Lp, N), jnp.float32)],   # C
        compiler_params=pltpu.CompilerParams(dimension_semantics=("parallel",)),
        # TODO(synk): at production L (3-12k) add an inner "arbitrary" L grid axis with the state
        # carried in VMEM scratch (L-tiling) and a generation-aware vmem_limit_bytes.
        # TODO(synk): at Dt < 128 (toy config Dt=12) packing the K directions onto the lane axis
        # would raise VPU/EUP lane utilization ~4x; skipped here because the required non-aligned
        # 12-wide lane concats for the B/C broadcasts are a lowering risk.
    )(s, xw_dt, xw_b, xw_c, dw, A_t, Ds, bias)


def scan_ref(s, xw_dt, xw_b, xw_c, dw, A_t, Ds, bias):
    N = A_t.shape[1]

    def one(s_k, wdt, wb, wc, wdw, A, Dp, bb):
        dt_low = jnp.dot(s_k, wdt, preferred_element_type=jnp.float32)
        Bm = jnp.dot(s_k, wb, preferred_element_type=jnp.float32)
        Cm = jnp.dot(s_k, wc, preferred_element_type=jnp.float32)
        dts = jnp.dot(dt_low.astype(jnp.bfloat16), wdw, preferred_element_type=jnp.float32)
        delta = _softplus(dts + bb)
        x = s_k.astype(jnp.float32)

        def step(h, inp):
            d_l, x_l, B_l, C_l = inp
            dA = jnp.exp(d_l[None, :] * A)
            h = dA * h + (d_l * x_l)[None, :] * B_l[:, None]
            y = jnp.sum(h * C_l[:, None], axis=0) + Dp[0] * x_l
            return h, y

        h0 = jnp.zeros((N, x.shape[1]), jnp.float32)
        _, ys = lax.scan(step, h0, (delta, x, Bm, Cm))
        return ys

    return jax.vmap(one)(s, xw_dt, xw_b, xw_c, dw, A_t, Ds, bias)


# ------------------------------------------------------------------
# Kernel 3 (tail): fused 4-direction merge (permutation matmuls) +
#                  pre_scale_proj + LayerNorm + SiLU(z) gate + out_proj
# ------------------------------------------------------------------
def make_tail_kernel(HW):
    def _tail_kernel(y_ref, z_ref, pf_ref, pt_ref, ptf_ref, psw_ref, g_ref, bta_ref,
                     opw_ref, o_ref):
        a = y_ref[0, :HW, :]
        b = y_ref[1, :HW, :].astype(jnp.bfloat16)
        c = y_ref[2, :HW, :].astype(jnp.bfloat16)
        d = y_ref[3, :HW, :].astype(jnp.bfloat16)
        # merge: [::-1] and the row/col transpose expressed as 0/1 permutation matmuls -> no extra
        # XLA passes over [HW, Dt] before the tail.
        y_sum = (a
                 + jnp.dot(pf_ref[...], c, preferred_element_type=jnp.float32)
                 + jnp.dot(pt_ref[...], b, preferred_element_type=jnp.float32)
                 + jnp.dot(ptf_ref[...], d, preferred_element_type=jnp.float32))
        # pre_scale_proj -> LayerNorm -> SiLU(z) gate -> out_proj
        y = jnp.dot(y_sum.astype(jnp.bfloat16), psw_ref[...],
                    preferred_element_type=jnp.float32)
        mu = jnp.mean(y, axis=-1, keepdims=True)
        var = jnp.mean((y - mu) * (y - mu), axis=-1, keepdims=True)
        yn = (y - mu) * lax.rsqrt(var + 1e-5) * g_ref[...] + bta_ref[...]
        z = z_ref[...].astype(jnp.float32)
        gated = yn * (z * _sigmoid(z))
        o_ref[...] = jnp.dot(gated.astype(jnp.bfloat16), opw_ref[...],
                             preferred_element_type=jnp.float32)
    return _tail_kernel


def pallas_tail(out_y, z, p_flip, p_tr, p_trf, psw, gamma, beta, opw):
    HW = p_flip.shape[0]
    d_feature = opw.shape[1]
    return pl.pallas_call(
        make_tail_kernel(HW),
        out_shape=jax.ShapeDtypeStruct((HW, d_feature), jnp.float32),
    )(out_y, z, p_flip, p_tr, p_trf, psw, gamma, beta, opw)


def tail_ref(out_y, z, p_flip, p_tr, p_trf, psw, gamma, beta, opw):
    HW = p_flip.shape[0]
    a = out_y[0, :HW, :]
    b = out_y[1, :HW, :].astype(jnp.bfloat16)
    c = out_y[2, :HW, :].astype(jnp.bfloat16)
    d = out_y[3, :HW, :].astype(jnp.bfloat16)
    y_sum = (a
             + jnp.dot(p_flip, c, preferred_element_type=jnp.float32)
             + jnp.dot(p_tr, b, preferred_element_type=jnp.float32)
             + jnp.dot(p_trf, d, preferred_element_type=jnp.float32))
    y = jnp.dot(y_sum.astype(jnp.bfloat16), psw, preferred_element_type=jnp.float32)
    mu = jnp.mean(y, axis=-1, keepdims=True)
    var = jnp.mean((y - mu) * (y - mu), axis=-1, keepdims=True)
    yn = (y - mu) * lax.rsqrt(var + 1e-5) * gamma + beta
    z32 = z.astype(jnp.float32)
    gated = yn * (z32 * _sigmoid(z32))
    return jnp.dot(gated.astype(jnp.bfloat16), opw, preferred_element_type=jnp.float32)


# ------------------------------------------------------------------
# deterministic parameter initialization (shapes from VanillaVss.__init__);
# weights stored pre-transposed ([in, out]) and pre-split, bf16 for the MXU feeds
# ------------------------------------------------------------------
def init_params(key, cfg):
    d_feature = cfg["d_feature"]
    d_label = cfg["d_label"]
    d_state = cfg["d_state"]
    d_conv = cfg["d_conv"]
    expand = cfg["expand"]
    dt_rank = cfg["dt_rank"]
    d_inner = expand * d_feature
    Dt = d_inner + d_label
    K = 4
    ks = jax.random.split(key, 8)

    def unif(k, shape, scale):
        return jax.random.uniform(k, shape, jnp.float32, -scale, scale)

    p = {}
    in_w = unif(ks[0], (d_feature, 2 * d_inner), 1.0 / math.sqrt(d_feature)).astype(jnp.bfloat16)
    p["in_wx"] = in_w[:, :d_inner]
    p["in_wz"] = in_w[:, d_inner:]
    p["conv_w"] = unif(ks[1], (d_conv * d_conv, d_inner), 1.0 / math.sqrt(d_conv * d_conv))
    p["conv_b"] = unif(ks[2], (1, d_inner), 1.0 / math.sqrt(d_conv * d_conv))
    xw = unif(ks[3], (K, Dt, dt_rank + 2 * d_state), 1.0 / math.sqrt(Dt)).astype(jnp.bfloat16)
    p["x_wdt"] = xw[:, :, :dt_rank]                             # [K, Dt, R]
    p["x_wb"] = xw[:, :, dt_rank:dt_rank + d_state]             # [K, Dt, N]
    p["x_wc"] = xw[:, :, dt_rank + d_state:]                    # [K, Dt, N]
    p["dt_wT"] = unif(ks[4], (K, dt_rank, Dt), dt_rank ** -0.5).astype(jnp.bfloat16)

    dt_min, dt_max, dt_floor = 1e-3, 0.1, 1e-4
    u = jax.random.uniform(ks[5], (K, Dt), jnp.float32)
    dt = jnp.exp(u * (math.log(dt_max) - math.log(dt_min)) + math.log(dt_min))
    dt = jnp.maximum(dt, dt_floor)
    p["dt_projs_b"] = dt + jnp.log(-jnp.expm1(-dt))             # inv-softplus

    A = jnp.tile(jnp.arange(1, d_state + 1, dtype=jnp.float32)[None, :], (K * Dt, 1))
    p["A_logs"] = jnp.log(A)                                    # [4*Dt, N]
    p["Ds"] = jnp.ones((K * Dt,), jnp.float32)
    p["pre_wT"] = unif(ks[6], (Dt, d_inner), 1.0 / math.sqrt(Dt)).astype(jnp.bfloat16)
    p["ln_gamma"] = jnp.ones((d_inner,), jnp.float32)
    p["ln_beta"] = jnp.zeros((d_inner,), jnp.float32)
    p["out_wT"] = unif(ks[7], (d_inner, d_feature), 1.0 / math.sqrt(d_inner)).astype(jnp.bfloat16)
    return p


# ------------------------------------------------------------------
# full forward pass (single image + single label sequence)
# ------------------------------------------------------------------
def vanilla_vss_forward(params, feature, label, cfg, use_pallas=True):
    d_feature = cfg["d_feature"]
    d_label = cfg["d_label"]
    d_state = cfg["d_state"]
    d_conv = cfg["d_conv"]
    expand = cfg["expand"]
    d_inner = expand * d_feature
    Dt = d_inner + d_label
    K, N = 4, d_state
    p = (d_conv - 1) // 2

    C, H, W = feature.shape
    HW = H * W
    Llab = label.shape[0]

    front = pallas_front if use_pallas else front_ref
    scan = pallas_scan if use_pallas else scan_ref
    tail = pallas_tail if use_pallas else tail_ref

    # ---- kernel 1: fused in_proj + depthwise conv + SiLU ----
    f_hwc = feature.astype(jnp.float32).transpose(1, 2, 0)               # [H, W, C]
    f_int = f_hwc.reshape(HW, C)
    f_pad = jnp.pad(f_hwc, ((p, p), (p, p), (0, 0)))                      # [Hp, Wp, C] (4-ch raw input)
    x_conv, z = front(f_pad, f_int, params["in_wx"], params["in_wz"],
                      params["conv_w"], params["conv_b"], d_conv, H, W)   # [H,W,d_inner] f32, [HW,d_inner] bf16

    # ---- image_to_sequence_ss2d + inject_sequence_labels (tiny XLA glue) ----
    a_seq = x_conv.reshape(HW, d_inner)                                   # row-major
    b_seq = x_conv.transpose(1, 0, 2).reshape(HW, d_inner)                # column-major
    c_seq = a_seq[::-1]
    d_seq = b_seq[::-1]
    lab_pad = jnp.concatenate([jnp.zeros((Llab, d_inner), jnp.float32),
                               label.astype(jnp.float32)], axis=1)        # [Llab, Dt]
    L = HW + Llab
    Lp = ((L + CH - 1) // CH) * CH

    def inject(seq):
        s_k = jnp.concatenate(
            [jnp.concatenate([seq, jnp.zeros((HW, d_label), jnp.float32)], axis=1), lab_pad],
            axis=0)                                                       # [L, Dt]
        if Lp != L:
            # padded steps sit at the END: they only decay the state and are discarded. Do not
            # reorder / front-pad.
            s_k = jnp.pad(s_k, ((0, Lp - L), (0, 0)))
        return s_k

    s = jnp.stack([inject(a_seq), inject(b_seq), inject(c_seq),
                   inject(d_seq)]).astype(jnp.bfloat16)                    # [K, Lp, Dt] bf16

    As_t = -jnp.exp(params["A_logs"].astype(jnp.float32)).reshape(K, Dt, N).transpose(0, 2, 1)
    Ds = params["Ds"].reshape(K, 1, Dt)
    dtb = params["dt_projs_b"].reshape(K, 1, Dt)

    # ---- kernel 2: fused x_proj + dt_proj + selective scan ----
    out_y = scan(s, params["x_wdt"], params["x_wb"], params["x_wc"],
                 params["dt_wT"], As_t, Ds, dtb)                           # [K, Lp, Dt] f32

    # ---- kernel 3: fused merge + pre_scale_proj + LayerNorm + SiLU gate + out_proj ----
    idx = np.arange(HW)
    flip_np = np.eye(HW, dtype=np.float32)[::-1].copy()
    tr_np = np.eye(HW, dtype=np.float32)[(idx % W) * H + (idx // W)]
    p_flip = jnp.asarray(flip_np, dtype=jnp.bfloat16)
    p_tr = jnp.asarray(tr_np, dtype=jnp.bfloat16)
    p_trf = jnp.asarray(tr_np @ flip_np, dtype=jnp.bfloat16)
    out = tail(out_y, z, p_flip, p_tr, p_trf, params["pre_wT"],
               params["ln_gamma"].reshape(1, d_inner),
               params["ln_beta"].reshape(1, d_inner),
               params["out_wT"])                                           # [HW, d_feature] f32
    # dropout == 0.0 -> identity
    return out.reshape(H, W, d_feature).transpose(2, 0, 1)                 # [d_feature, H, W]


# ------------------------------------------------------------------
if __name__ == "__main__":
    cfg = dict(d_feature=4, d_label=4, d_state=16, d_conv=3, expand=2, dt_rank=4)
    H = W = 8
    L_label = 8

    key = jax.random.PRNGKey(0)
    kp, kf, kl = jax.random.split(key, 3)
    params = init_params(kp, cfg)
    feature = jax.random.normal(kf, (cfg["d_feature"], H, W), jnp.float32)   # one [C, H, W] image
    label = 0.5 * jax.random.normal(kl, (L_label, cfg["d_label"]), jnp.float32)

    fwd_pallas = jax.jit(lambda p_, f_, l_: vanilla_vss_forward(p_, f_, l_, cfg, use_pallas=True))
    fwd_ref = jax.jit(lambda p_, f_, l_: vanilla_vss_forward(p_, f_, l_, cfg, use_pallas=False))

    out = jax.block_until_ready(fwd_pallas(params, feature, label))
    ref = jax.block_until_ready(fwd_ref(params, feature, label))

    assert out.shape == (cfg["d_feature"], H, W)
    assert out.dtype == jnp.float32
    np.testing.assert_allclose(np.asarray(out), np.asarray(ref), rtol=2e-2, atol=2e-2)
    print("KERNEL_OK")
</pallas_src>

<mosaic_0001>
module attributes {stable_mosaic.version = 11 : i64} {
  func.func @_front_kernel(%arg0: i32, %arg1: memref<10x10x4xf32, #tpu.memory_space<vmem>>, %arg2: memref<64x4xf32, #tpu.memory_space<vmem>>, %arg3: memref<4x8xbf16, #tpu.memory_space<vmem>>, %arg4: memref<4x8xbf16, #tpu.memory_space<vmem>>, %arg5: memref<9x8xf32, #tpu.memory_space<vmem>>, %arg6: memref<1x8xf32, #tpu.memory_space<vmem>>, %arg7: memref<8x8x8xf32, #tpu.memory_space<vmem>>, %arg8: memref<64x8xbf16, #tpu.memory_space<vmem>>, %arg9: memref<10x10x8xf32, #tpu.memory_space<vmem>>) attributes {dimension_semantics = [#tpu.dimension_semantics<arbitrary>], iteration_bounds = array<i64: 1>, scalar_prefetch = 0 : i64, scratch_operands = 1 : i64, tpu.core_type = #tpu.core_type<tc>, window_params = [{pipeline_mode = #tpu.pipeline_mode<synchronous>, transform_indices = @transform_0, window_bounds = array<i64: 10, 10, 4>}, {pipeline_mode = #tpu.pipeline_mode<synchronous>, transform_indices = @transform_1, window_bounds = array<i64: 64, 4>}, {pipeline_mode = #tpu.pipeline_mode<synchronous>, transform_indices = @transform_2, window_bounds = array<i64: 4, 8>}, {pipeline_mode = #tpu.pipeline_mode<synchronous>, transform_indices = @transform_3, window_bounds = array<i64: 4, 8>}, {pipeline_mode = #tpu.pipeline_mode<synchronous>, transform_indices = @transform_4, window_bounds = array<i64: 9, 8>}, {pipeline_mode = #tpu.pipeline_mode<synchronous>, transform_indices = @transform_5, window_bounds = array<i64: 1, 8>}, {pipeline_mode = #tpu.pipeline_mode<synchronous>, transform_indices = @transform_6, window_bounds = array<i64: 8, 8, 8>}, {pipeline_mode = #tpu.pipeline_mode<synchronous>, transform_indices = @transform_7, window_bounds = array<i64: 64, 8>}]} {
    %c0 = arith.constant 0 : index
    %c0_0 = arith.constant 0 : index
    %0 = vector.load %arg2[%c0, %c0_0] : memref<64x4xf32, #tpu.memory_space<vmem>>, vector<64x4xf32>
    %1 = arith.truncf %0 : vector<64x4xf32> to vector<64x4xbf16>
    %c0_1 = arith.constant 0 : index
    %c0_2 = arith.constant 0 : index
    %2 = vector.load %arg4[%c0_1, %c0_2] : memref<4x8xbf16, #tpu.memory_space<vmem>>, vector<4x8xbf16>
    %cst = arith.constant dense<0.000000e+00> : vector<64x8xf32>
    %3 = tpu.matmul %1, %2, %cst {dimension_numbers = #tpu.dot_dimension_numbers<[1], [0], [0], [1], [0, 0, 1, 1], [], []>} : vector<64x4xbf16>, vector<4x8xbf16>, vector<64x8xf32> -> vector<64x8xf32>
    %4 = arith.truncf %3 : vector<64x8xf32> to vector<64x8xbf16>
    %c0_3 = arith.constant 0 : index
    %c0_4 = arith.constant 0 : index
    %5 = vector.load %arg8[%c0_3, %c0_4] : memref<64x8xbf16, #tpu.memory_space<vmem>>, vector<64x8xbf16>
    tpu.vector_store %arg8[%c0_3, %c0_4], %4 {strides = array<i32>} : memref<64x8xbf16, #tpu.memory_space<vmem>>, vector<64x8xbf16>,
    %c0_5 = arith.constant 0 : index
    %c0_6 = arith.constant 0 : index
    %6 = vector.load %arg3[%c0_5, %c0_6] : memref<4x8xbf16, #tpu.memory_space<vmem>>, vector<4x8xbf16>
    %c0_7 = arith.constant 0 : index
    %c0_8 = arith.constant 0 : index
    %c0_9 = arith.constant 0 : index
    %7 = vector.load %arg1[%c0_7, %c0_8, %c0_9] : memref<10x10x4xf32, #tpu.memory_space<vmem>>, vector<1x10x4xf32>
    %8 = vector.shape_cast %7 : vector<1x10x4xf32> to vector<10x4xf32>
    %9 = arith.truncf %8 : vector<10x4xf32> to vector<10x4xbf16>
    %cst_10 = arith.constant dense<0.000000e+00> : vector<10x8xf32>
    %10 = tpu.matmul %9, %6, %cst_10 {dimension_numbers = #tpu.dot_dimension_numbers<[1], [0], [0], [1], [0, 0, 1, 1], [], []>} : vector<10x4xbf16>, vector<4x8xbf16>, vector<10x8xf32> -> vector<10x8xf32>
    %c0_11 = arith.constant 0 : index
    %c0_12 = arith.constant 0 : index
    %c0_13 = arith.constant 0 : index
    %11 = vector.load %arg9[%c0_11, %c0_12, %c0_13] : memref<10x10x8xf32, #tpu.memory_space<vmem>>, vector<1x10x8xf32>
    %12 = vector.shape_cast %11 : vector<1x10x8xf32> to vector<10x8xf32>
    %13 = vector.shape_cast %10 : vector<10x8xf32> to vector<1x10x8xf32>
    tpu.vector_store %arg9[%c0_11, %c0_12, %c0_13], %13 {strides = array<i32>} : memref<10x10x8xf32, #tpu.memory_space<vmem>>, vector<1x10x8xf32>,
    %c1 = arith.constant 1 : index
    %c0_14 = arith.constant 0 : index
    %c0_15 = arith.constant 0 : index
    %14 = vector.load %arg1[%c1, %c0_14, %c0_15] : memref<10x10x4xf32, #tpu.memory_space<vmem>>, vector<1x10x4xf32>
    %15 = vector.shape_cast %14 : vector<1x10x4xf32> to vector<10x4xf32>
    %16 = arith.truncf %15 : vector<10x4xf32> to vector<10x4xbf16>
    %cst_16 = arith.constant dense<0.000000e+00> : vector<10x8xf32>
    %17 = tpu.matmul %16, %6, %cst_16 {dimension_numbers = #tpu.dot_dimension_numbers<[1], [0], [0], [1], [0, 0, 1, 1], [], []>} : vector<10x4xbf16>, vector<4x8xbf16>, vector<10x8xf32> -> vector<10x8xf32>
    %c1_17 = arith.constant 1 : index
    %c0_18 = arith.constant 0 : index
    %c0_19 = arith.constant 0 : index
    %18 = vector.load %arg9[%c1_17, %c0_18, %c0_19] : memref<10x10x8xf32, #tpu.memory_space<vmem>>, vector<1x10x8xf32>
    %19 = vector.shape_cast %18 : vector<1x10x8xf32> to vector<10x8xf32>
    %20 = vector.shape_cast %17 : vector<10x8xf32> to vector<1x10x8xf32>
    tpu.vector_store %arg9[%c1_17, %c0_18, %c0_19], %20 {strides = array<i32>} : memref<10x10x8xf32, #tpu.memory_space<vmem>>, vector<1x10x8xf32>,
    %c2 = arith.constant 2 : index
    %c0_20 = arith.constant 0 : index
    %c0_21 = arith.constant 0 : index
    %21 = vector.load %arg1[%c2, %c0_20, %c0_21] : memref<10x10x4xf32, #tpu.memory_space<vmem>>, vector<1x10x4xf32>
    %22 = vector.shape_cast %21 : vector<1x10x4xf32> to vector<10x4xf32>
    %23 = arith.truncf %22 : vector<10x4xf32> to vector<10x4xbf16>
    %cst_22 = arith.constant dense<0.000000e+00> : vector<10x8xf32>
    %24 = tpu.matmul %23, %6, %cst_22 {dimension_numbers = #tpu.dot_dimension_numbers<[1], [0], [0], [1], [0, 0, 1, 1], [], []>} : vector<10x4xbf16>, vector<4x8xbf16>, vector<10x8xf32> -> vector<10x8xf32>
    %c2_23 = arith.constant 2 : index
    %c0_24 = arith.constant 0 : index
    %c0_25 = arith.constant 0 : index
    %25 = vector.load %arg9[%c2_23, %c0_24, %c0_25] : memref<10x10x8xf32, #tpu.memory_space<vmem>>, vector<1x10x8xf32>
    %26 = vector.shape_cast %25 : vector<1x10x8xf32> to vector<10x8xf32>
    %27 = vector.shape_cast %24 : vector<10x8xf32> to vector<1x10x8xf32>
    tpu.vector_store %arg9[%c2_23, %c0_24, %c0_25], %27 {strides = array<i32>} : memref<10x10x8xf32, #tpu.memory_space<vmem>>, vector<1x10x8xf32>,
    %c3 = arith.constant 3 : index
    %c0_26 = arith.constant 0 : index
    %c0_27 = arith.constant 0 : index
    %28 = vector.load %arg1[%c3, %c0_26, %c0_27] : memref<10x10x4xf32, #tpu.memory_space<vmem>>, vector<1x10x4xf32>
    %29 = vector.shape_cast %28 : vector<1x10x4xf32> to vector<10x4xf32>
    %30 = arith.truncf %29 : vector<10x4xf32> to vector<10x4xbf16>
    %cst_28 = arith.constant dense<0.000000e+00> : vector<10x8xf32>
    %31 = tpu.matmul %30, %6, %cst_28 {dimension_numbers = #tpu.dot_dimension_numbers<[1], [0], [0], [1], [0, 0, 1, 1], [], []>} : vector<10x4xbf16>, vector<4x8xbf16>, vector<10x8xf32> -> vector<10x8xf32>
    %c3_29 = arith.constant 3 : index
    %c0_30 = arith.constant 0 : index
    %c0_31 = arith.constant 0 : index
    %32 = vector.load %arg9[%c3_29, %c0_30, %c0_31] : memref<10x10x8xf32, #tpu.memory_space<vmem>>, vector<1x10x8xf32>
    %33 = vector.shape_cast %32 : vector<1x10x8xf32> to vector<10x8xf32>
    %34 = vector.shape_cast %31 : vector<10x8xf32> to vector<1x10x8xf32>
    tpu.vector_store %arg9[%c3_29, %c0_30, %c0_31], %34 {strides = array<i32>} : memref<10x10x8xf32, #tpu.memory_space<vmem>>, vector<1x10x8xf32>,
    %c4 = arith.constant 4 : index
    %c0_32 = arith.constant 0 : index
    %c0_33 = arith.constant 0 : index
    %35 = vector.load %arg1[%c4, %c0_32, %c0_33] : memref<10x10x4xf32, #tpu.memory_space<vmem>>, vector<1x10x4xf32>
    %36 = vector.shape_cast %35 : vector<1x10x4xf32> to vector<10x4xf32>
    %37 = arith.truncf %36 : vector<10x4xf32> to vector<10x4xbf16>
    %cst_34 = arith.constant dense<0.000000e+00> : vector<10x8xf32>
    %38 = tpu.matmul %37, %6, %cst_34 {dimension_numbers = #tpu.dot_dimension_numbers<[1], [0], [0], [1], [0, 0, 1, 1], [], []>} : vector<10x4xbf16>, vector<4x8xbf16>, vector<10x8xf32> -> vector<10x8xf32>
    %c4_35 = arith.constant 4 : index
    %c0_36 = arith.constant 0 : index
    %c0_37 = arith.constant 0 : index
    %39 = vector.load %arg9[%c4_35, %c0_36, %c0_37] : memref<10x10x8xf32, #tpu.memory_space<vmem>>, vector<1x10x8xf32>
    %40 = vector.shape_cast %39 : vector<1x10x8xf32> to vector<10x8xf32>
    %41 = vector.shape_cast %38 : vector<10x8xf32> to vector<1x10x8xf32>
    tpu.vector_store %arg9[%c4_35, %c0_36, %c0_37], %41 {strides = array<i32>} : memref<10x10x8xf32, #tpu.memory_space<vmem>>, vector<1x10x8xf32>,
    %c5 = arith.constant 5 : index
    %c0_38 = arith.constant 0 : index
    %c0_39 = arith.constant 0 : index
    %42 = vector.load %arg1[%c5, %c0_38, %c0_39] : memref<10x10x4xf32, #tpu.memory_space<vmem>>, vector<1x10x4xf32>
    %43 = vector.shape_cast %42 : vector<1x10x4xf32> to vector<10x4xf32>
    %44 = arith.truncf %43 : vector<10x4xf32> to vector<10x4xbf16>
    %cst_40 = arith.constant dense<0.000000e+00> : vector<10x8xf32>
    %45 = tpu.matmul %44, %6, %cst_40 {dimension_numbers = #tpu.dot_dimension_numbers<[1], [0], [0], [1], [0, 0, 1, 1], [], []>} : vector<10x4xbf16>, vector<4x8xbf16>, vector<10x8xf32> -> vector<10x8xf32>
    %c5_41 = arith.constant 5 : index
    %c0_42 = arith.constant 0 : index
    %c0_43 = arith.constant 0 : index
    %46 = vector.load %arg9[%c5_41, %c0_42, %c0_43] : memref<10x10x8xf32, #tpu.memory_space<vmem>>, vector<1x10x8xf32>
    %47 = vector.shape_cast %46 : vector<1x10x8xf32> to vector<10x8xf32>
    %48 = vector.shape_cast %45 : vector<10x8xf32> to vector<1x10x8xf32>
    tpu.vector_store %arg9[%c5_41, %c0_42, %c0_43], %48 {strides = array<i32>} : memref<10x10x8xf32, #tpu.memory_space<vmem>>, vector<1x10x8xf32>,
    %c6 = arith.constant 6 : index
    %c0_44 = arith.constant 0 : index
    %c0_45 = arith.constant 0 : index
    %49 = vector.load %arg1[%c6, %c0_44, %c0_45] : memref<10x10x4xf32, #tpu.memory_space<vmem>>, vector<1x10x4xf32>
    %50 = vector.shape_cast %49 : vector<1x10x4xf32> to vector<10x4xf32>
    %51 = arith.truncf %50 : vector<10x4xf32> to vector<10x4xbf16>
    %cst_46 = arith.constant dense<0.000000e+00> : vector<10x8xf32>
    %52 = tpu.matmul %51, %6, %cst_46 {dimension_numbers = #tpu.dot_dimension_numbers<[1], [0], [0], [1], [0, 0, 1, 1], [], []>} : vector<10x4xbf16>, vector<4x8xbf16>, vector<10x8xf32> -> vector<10x8xf32>
    %c6_47 = arith.constant 6 : index
    %c0_48 = arith.constant 0 : index
    %c0_49 = arith.constant 0 : index
    %53 = vector.load %arg9[%c6_47, %c0_48, %c0_49] : memref<10x10x8xf32, #tpu.memory_space<vmem>>, vector<1x10x8xf32>
    %54 = vector.shape_cast %53 : vector<1x10x8xf32> to vector<10x8xf32>
    %55 = vector.shape_cast %52 : vector<10x8xf32> to vector<1x10x8xf32>
    tpu.vector_store %arg9[%c6_47, %c0_48, %c0_49], %55 {strides = array<i32>} : memref<10x10x8xf32, #tpu.memory_space<vmem>>, vector<1x10x8xf32>,
    %c7 = arith.constant 7 : index
    %c0_50 = arith.constant 0 : index
    %c0_51 = arith.constant 0 : index
    %56 = vector.load %arg1[%c7, %c0_50, %c0_51] : memref<10x10x4xf32, #tpu.memory_space<vmem>>, vector<1x10x4xf32>
    %57 = vector.shape_cast %56 : vector<1x10x4xf32> to vector<10x4xf32>
    %58 = arith.truncf %57 : vector<10x4xf32> to vector<10x4xbf16>
    %cst_52 = arith.constant dense<0.000000e+00> : vector<10x8xf32>
    %59 = tpu.matmul %58, %6, %cst_52 {dimension_numbers = #tpu.dot_dimension_numbers<[1], [0], [0], [1], [0, 0, 1, 1], [], []>} : vector<10x4xbf16>, vector<4x8xbf16>, vector<10x8xf32> -> vector<10x8xf32>
    %c7_53 = arith.constant 7 : index
    %c0_54 = arith.constant 0 : index
    %c0_55 = arith.constant 0 : index
    %60 = vector.load %arg9[%c7_53, %c0_54, %c0_55] : memref<10x10x8xf32, #tpu.memory_space<vmem>>, vector<1x10x8xf32>
    %61 = vector.shape_cast %60 : vector<1x10x8xf32> to vector<10x8xf32>
    %62 = vector.shape_cast %59 : vector<10x8xf32> to vector<1x10x8xf32>
    tpu.vector_store %arg9[%c7_53, %c0_54, %c0_55], %62 {strides = array<i32>} : memref<10x10x8xf32, #tpu.memory_space<vmem>>, vector<1x10x8xf32>,
    %c8 = arith.constant 8 : index
    %c0_56 = arith.constant 0 : index
    %c0_57 = arith.constant 0 : index
    %63 = vector.load %arg1[%c8, %c0_56, %c0_57] : memref<10x10x4xf32, #tpu.memory_space<vmem>>, vector<1x10x4xf32>
    %64 = vector.shape_cast %63 : vector<1x10x4xf32> to vector<10x4xf32>
    %65 = arith.truncf %64 : vector<10x4xf32> to vector<10x4xbf16>
    %cst_58 = arith.constant dense<0.000000e+00> : vector<10x8xf32>
    %66 = tpu.matmul %65, %6, %cst_58 {dimension_numbers = #tpu.dot_dimension_numbers<[1], [0], [0], [1], [0, 0, 1, 1], [], []>} : vector<10x4xbf16>, vector<4x8xbf16>, vector<10x8xf32> -> vector<10x8xf32>
    %c8_59 = arith.constant 8 : index
    %c0_60 = arith.constant 0 : index
    %c0_61 = arith.constant 0 : index
    %67 = vector.load %arg9[%c8_59, %c0_60, %c0_61] : memref<10x10x8xf32, #tpu.memory_space<vmem>>, vector<1x10x8xf32>
    %68 = vector.shape_cast %67 : vector<1x10x8xf32> to vector<10x8xf32>
    %69 = vector.shape_cast %66 : vector<10x8xf32> to vector<1x10x8xf32>
    tpu.vector_store %arg9[%c8_59, %c0_60, %c0_61], %69 {strides = array<i32>} : memref<10x10x8xf32, #tpu.memory_space<vmem>>, vector<1x10x8xf32>,
    %c9 = arith.constant 9 : index
    %c0_62 = arith.constant 0 : index
    %c0_63 = arith.constant 0 : index
    %70 = vector.load %arg1[%c9, %c0_62, %c0_63] : memref<10x10x4xf32, #tpu.memory_space<vmem>>, vector<1x10x4xf32>
    %71 = vector.shape_cast %70 : vector<1x10x4xf32> to vector<10x4xf32>
    %72 = arith.truncf %71 : vector<10x4xf32> to vector<10x4xbf16>
    %cst_64 = arith.constant dense<0.000000e+00> : vector<10x8xf32>
    %73 = tpu.matmul %72, %6, %cst_64 {dimension_numbers = #tpu.dot_dimension_numbers<[1], [0], [0], [1], [0, 0, 1, 1], [], []>} : vector<10x4xbf16>, vector<4x8xbf16>, vector<10x8xf32> -> vector<10x8xf32>
    %c9_65 = arith.constant 9 : index
    %c0_66 = arith.constant 0 : index
    %c0_67 = arith.constant 0 : index
    %74 = vector.load %arg9[%c9_65, %c0_66, %c0_67] : memref<10x10x8xf32, #tpu.memory_space<vmem>>, vector<1x10x8xf32>
    %75 = vector.shape_cast %74 : vector<1x10x8xf32> to vector<10x8xf32>
    %76 = vector.shape_cast %73 : vector<10x8xf32> to vector<1x10x8xf32>
    tpu.vector_store %arg9[%c9_65, %c0_66, %c0_67], %76 {strides = array<i32>} : memref<10x10x8xf32, #tpu.memory_space<vmem>>, vector<1x10x8xf32>,
    %c0_68 = arith.constant 0 : index
    %c0_69 = arith.constant 0 : index
    %77 = vector.load %arg6[%c0_68, %c0_69] : memref<1x8xf32, #tpu.memory_space<vmem>>, vector<1x8xf32>
    %cst_70 = arith.constant 0.000000e+00 : f32
    %78 = vector.broadcast %cst_70 : f32 to vector<8x8x8xf32>
    %79 = vector.shape_cast %77 : vector<1x8xf32> to vector<1x1x8xf32>
    %80 = vector.broadcast %79 : vector<1x1x8xf32> to vector<8x8x8xf32>
    %81 = arith.addf %80, %78 : vector<8x8x8xf32>
    %c0_71 = arith.constant 0 : index
    %c0_72 = arith.constant 0 : index
    %c0_73 = arith.constant 0 : index
    %82 = vector.load %arg9[%c0_71, %c0_72, %c0_73] : memref<10x10x8xf32, #tpu.memory_space<vmem>>, vector<8x8x8xf32>
    %c0_74 = arith.constant 0 : index
    %c0_75 = arith.constant 0 : index
    %83 = vector.load %arg5[%c0_74, %c0_75] : memref<9x8xf32, #tpu.memory_space<vmem>>, vector<1x8xf32>
    %84 = vector.shape_cast %83 : vector<1x8xf32> to vector<1x1x8xf32>
    %85 = vector.broadcast %84 : vector<1x1x8xf32> to vector<8x8x8xf32>
    %86 = arith.mulf %82, %85 : vector<8x8x8xf32>
    %87 = arith.addf %81, %86 : vector<8x8x8xf32>
    %c0_76 = arith.constant 0 : index
    %c1_77 = arith.constant 1 : index
    %c0_78 = arith.constant 0 : index
    %88 = vector.load %arg9[%c0_76, %c1_77, %c0_78] : memref<10x10x8xf32, #tpu.memory_space<vmem>>, vector<8x8x8xf32>
    %c1_79 = arith.constant 1 : index
    %c0_80 = arith.constant 0 : index
    %89 = vector.load %arg5[%c1_79, %c0_80] : memref<9x8xf32, #tpu.memory_space<vmem>>, vector<1x8xf32>
    %90 = vector.shape_cast %89 : vector<1x8xf32> to vector<1x1x8xf32>
    %91 = vector.broadcast %90 : vector<1x1x8xf32> to vector<8x8x8xf32>
    %92 = arith.mulf %88, %91 : vector<8x8x8xf32>
    %93 = arith.addf %87, %92 : vector<8x8x8xf32>
    %c0_81 = arith.constant 0 : index
    %c2_82 = arith.constant 2 : index
    %c0_83 = arith.constant 0 : index
    %94 = vector.load %arg9[%c0_81, %c2_82, %c0_83] : memref<10x10x8xf32, #tpu.memory_space<vmem>>, vector<8x8x8xf32>
    %c2_84 = arith.constant 2 : index
    %c0_85 = arith.constant 0 : index
    %95 = vector.load %arg5[%c2_84, %c0_85] : memref<9x8xf32, #tpu.memory_space<vmem>>, vector<1x8xf32>
    %96 = vector.shape_cast %95 : vector<1x8xf32> to vector<1x1x8xf32>
    %97 = vector.broadcast %96 : vector<1x1x8xf32> to vector<8x8x8xf32>
    %98 = arith.mulf %94, %97 : vector<8x8x8xf32>
    %99 = arith.addf %93, %98 : vector<8x8x8xf32>
    %c1_86 = arith.constant 1 : index
    %c0_87 = arith.constant 0 : index
    %c0_88 = arith.constant 0 : index
    %100 = vector.load %arg9[%c1_86, %c0_87, %c0_88] : memref<10x10x8xf32, #tpu.memory_space<vmem>>, vector<8x8x8xf32>
    %c3_89 = arith.constant 3 : index
    %c0_90 = arith.constant 0 : index
    %101 = vector.load %arg5[%c3_89, %c0_90] : memref<9x8xf32, #tpu.memory_space<vmem>>, vector<1x8xf32>
    %102 = vector.shape_cast %101 : vector<1x8xf32> to vector<1x1x8xf32>
    %103 = vector.broadcast %102 : vector<1x1x8xf32> to vector<8x8x8xf32>
    %104 = arith.mulf %100, %103 : vector<8x8x8xf32>
    %105 = arith.addf %99, %104 : vector<8x8x8xf32>
    %c1_91 = arith.constant 1 : index
    %c1_92 = arith.constant 1 : index
    %c0_93 = arith.constant 0 : index
    %106 = vector.load %arg9[%c1_91, %c1_92, %c0_93] : memref<10x10x8xf32, #tpu.memory_space<vmem>>, vector<8x8x8xf32>
    %c4_94 = arith.constant 4 : index
    %c0_95 = arith.constant 0 : index
    %107 = vector.load %arg5[%c4_94, %c0_95] : memref<9x8xf32, #tpu.memory_space<vmem>>, vector<1x8xf32>
    %108 = vector.shape_cast %107 : vector<1x8xf32> to vector<1x1x8xf32>
    %109 = vector.broadcast %108 : vector<1x1x8xf32> to vector<8x8x8xf32>
    %110 = arith.mulf %106, %109 : vector<8x8x8xf32>
    %111 = arith.addf %105, %110 : vector<8x8x8xf32>
    %c1_96 = arith.constant 1 : index
    %c2_97 = arith.constant 2 : index
    %c0_98 = arith.constant 0 : index
    %112 = vector.load %arg9[%c1_96, %c2_97, %c0_98] : memref<10x10x8xf32, #tpu.memory_space<vmem>>, vector<8x8x8xf32>
    %c5_99 = arith.constant 5 : index
    %c0_100 = arith.constant 0 : index
    %113 = vector.load %arg5[%c5_99, %c0_100] : memref<9x8xf32, #tpu.memory_space<vmem>>, vector<1x8xf32>
    %114 = vector.shape_cast %113 : vector<1x8xf32> to vector<1x1x8xf32>
    %115 = vector.broadcast %114 : vector<1x1x8xf32> to vector<8x8x8xf32>
    %116 = arith.mulf %112, %115 : vector<8x8x8xf32>
    %117 = arith.addf %111, %116 : vector<8x8x8xf32>
    %c2_101 = arith.constant 2 : index
    %c0_102 = arith.constant 0 : index
    %c0_103 = arith.constant 0 : index
    %118 = vector.load %arg9[%c2_101, %c0_102, %c0_103] : memref<10x10x8xf32, #tpu.memory_space<vmem>>, vector<8x8x8xf32>
    %c6_104 = arith.constant 6 : index
    %c0_105 = arith.constant 0 : index
    %119 = vector.load %arg5[%c6_104, %c0_105] : memref<9x8xf32, #tpu.memory_space<vmem>>, vector<1x8xf32>
    %120 = vector.shape_cast %119 : vector<1x8xf32> to vector<1x1x8xf32>
    %121 = vector.broadcast %120 : vector<1x1x8xf32> to vector<8x8x8xf32>
    %122 = arith.mulf %118, %121 : vector<8x8x8xf32>
    %123 = arith.addf %117, %122 : vector<8x8x8xf32>
    %c2_106 = arith.constant 2 : index
    %c1_107 = arith.constant 1 : index
    %c0_108 = arith.constant 0 : index
    %124 = vector.load %arg9[%c2_106, %c1_107, %c0_108] : memref<10x10x8xf32, #tpu.memory_space<vmem>>, vector<8x8x8xf32>
    %c7_109 = arith.constant 7 : index
    %c0_110 = arith.constant 0 : index
    %125 = vector.load %arg5[%c7_109, %c0_110] : memref<9x8xf32, #tpu.memory_space<vmem>>, vector<1x8xf32>
    %126 = vector.shape_cast %125 : vector<1x8xf32> to vector<1x1x8xf32>
    %127 = vector.broadcast %126 : vector<1x1x8xf32> to vector<8x8x8xf32>
    %128 = arith.mulf %124, %127 : vector<8x8x8xf32>
    %129 = arith.addf %123, %128 : vector<8x8x8xf32>
    %c2_111 = arith.constant 2 : index
    %c2_112 = arith.constant 2 : index
    %c0_113 = arith.constant 0 : index
    %130 = vector.load %arg9[%c2_111, %c2_112, %c0_113] : memref<10x10x8xf32, #tpu.memory_space<vmem>>, vector<8x8x8xf32>
    %c8_114 = arith.constant 8 : index
    %c0_115 = arith.constant 0 : index
    %131 = vector.load %arg5[%c8_114, %c0_115] : memref<9x8xf32, #tpu.memory_space<vmem>>, vector<1x8xf32>
    %132 = vector.shape_cast %131 : vector<1x8xf32> to vector<1x1x8xf32>
    %133 = vector.broadcast %132 : vector<1x1x8xf32> to vector<8x8x8xf32>
    %134 = arith.mulf %130, %133 : vector<8x8x8xf32>
    %135 = arith.addf %129, %134 : vector<8x8x8xf32>
    %cst_116 = arith.constant 0.000000e+00 : f32
    %136 = vector.broadcast %cst_116 : f32 to vector<8x8x8xf32>
    %137 = arith.subf %136, %135 : vector<8x8x8xf32>
    %138 = math.exp %137 : vector<8x8x8xf32>
    %cst_117 = arith.constant 1.000000e+00 : f32
    %139 = vector.broadcast %cst_117 : f32 to vector<8x8x8xf32>
    %140 = arith.addf %139, %138 : vector<8x8x8xf32>
    %cst_118 = arith.constant 1.000000e+00 : f32
    %141 = vector.broadcast %cst_118 : f32 to vector<8x8x8xf32>
    %142 = arith.divf %141, %140 : vector<8x8x8xf32>
    %143 = arith.mulf %135, %142 : vector<8x8x8xf32>
    %c0_119 = arith.constant 0 : index
    %c0_120 = arith.constant 0 : index
    %c0_121 = arith.constant 0 : index
    %144 = vector.load %arg7[%c0_119, %c0_120, %c0_121] : memref<8x8x8xf32, #tpu.memory_space<vmem>>, vector<8x8x8xf32>
    tpu.vector_store %arg7[%c0_119, %c0_120, %c0_121], %143 {strides = array<i32>} : memref<8x8x8xf32, #tpu.memory_space<vmem>>, vector<8x8x8xf32>,
    return
  }
  func.func @transform_0(%arg0: i32) -> (i32, i32, i32) {
    %c0_i32 = arith.constant 0 : i32
    %c0_i32_0 = arith.constant 0 : i32
    %c0_i32_1 = arith.constant 0 : i32
    %c0_i32_2 = arith.constant 0 : i32
    return %c0_i32, %c0_i32_0, %c0_i32_1 : i32, i32, i32
  }
  func.func @transform_1(%arg0: i32) -> (i32, i32) {
    %c0_i32 = arith.constant 0 : i32
    %c0_i32_0 = arith.constant 0 : i32
    %c0_i32_1 = arith.constant 0 : i32
    return %c0_i32, %c0_i32_0 : i32, i32
  }
  func.func @transform_2(%arg0: i32) -> (i32, i32) {
    %c0_i32 = arith.constant 0 : i32
    %c0_i32_0 = arith.constant 0 : i32
    %c0_i32_1 = arith.constant 0 : i32
    return %c0_i32, %c0_i32_0 : i32, i32
  }
  func.func @transform_3(%arg0: i32) -> (i32, i32) {
    %c0_i32 = arith.constant 0 : i32
    %c0_i32_0 = arith.constant 0 : i32
    %c0_i32_1 = arith.constant 0 : i32
    return %c0_i32, %c0_i32_0 : i32, i32
  }
  func.func @transform_4(%arg0: i32) -> (i32, i32) {
    %c0_i32 = arith.constant 0 : i32
    %c0_i32_0 = arith.constant 0 : i32
    %c0_i32_1 = arith.constant 0 : i32
    return %c0_i32, %c0_i32_0 : i32, i32
  }
  func.func @transform_5(%arg0: i32) -> (i32, i32) {
    %c0_i32 = arith.constant 0 : i32
    %c0_i32_0 = arith.constant 0 : i32
    %c0_i32_1 = arith.constant 0 : i32
    return %c0_i32, %c0_i32_0 : i32, i32
  }
  func.func @transform_6(%arg0: i32) -> (i32, i32, i32) {
    %c0_i32 = arith.constant 0 : i32
    %c0_i32_0 = arith.constant 0 : i32
    %c0_i32_1 = arith.constant 0 : i32
    %c0_i32_2 = arith.constant 0 : i32
    return %c0_i32, %c0_i32_0, %c0_i32_1 : i32, i32, i32
  }
  func.func @transform_7(%arg0: i32) -> (i32, i32) {
    %c0_i32 = arith.constant 0 : i32
    %c0_i32_0 = arith.constant 0 : i32
    %c0_i32_1 = arith.constant 0 : i32
    return %c0_i32, %c0_i32_0 : i32, i32
  }
}

module attributes {stable_mosaic.version = 11 : i64} {
  func.func @_scan_kernel(%arg0: i32, %arg1: memref<1x72x12xbf16, #tpu.memory_space<vmem>>, %arg2: memref<1x12x4xbf16, #tpu.memory_space<vmem>>, %arg3: memref<1x12x16xbf16, #tpu.memory_space<vmem>>, %arg4: memref<1x12x16xbf16, #tpu.memory_space<vmem>>, %arg5: memref<1x4x12xbf16, #tpu.memory_space<vmem>>, %arg6: memref<1x16x12xf32, #tpu.memory_space<vmem>>, %arg7: memref<1x1x12xf32, #tpu.memory_space<vmem>>, %arg8: memref<1x1x12xf32, #tpu.memory_space<vmem>>, %arg9: memref<1x72x12xf32, #tpu.memory_space<vmem>>, %arg10: memref<72x12xf32, #tpu.memory_space<vmem>>, %arg11: memref<72x16xf32, #tpu.memory_space<vmem>>, %arg12: memref<72x16xf32, #tpu.memory_space<vmem>>) attributes {dimension_semantics = [#tpu.dimension_semantics<parallel>], iteration_bounds = array<i64: 4>, scalar_prefetch = 0 : i64, scratch_operands = 3 : i64, tpu.core_type = #tpu.core_type<tc>, window_params = [{transform_indices = @transform_0, window_bounds = array<i64: 1, 72, 12>}, {transform_indices = @transform_1, window_bounds = array<i64: 1, 12, 4>}, {transform_indices = @transform_2, window_bounds = array<i64: 1, 12, 16>}, {transform_indices = @transform_3, window_bounds = array<i64: 1, 12, 16>}, {transform_indices = @transform_4, window_bounds = array<i64: 1, 4, 12>}, {transform_indices = @transform_5, window_bounds = array<i64: 1, 16, 12>}, {transform_indices = @transform_6, window_bounds = array<i64: 1, 1, 12>}, {transform_indices = @transform_7, window_bounds = array<i64: 1, 1, 12>}, {transform_indices = @transform_8, window_bounds = array<i64: 1, 72, 12>}]} {
    %c0 = arith.constant 0 : index
    %c0_0 = arith.constant 0 : index
    %c0_1 = arith.constant 0 : index
    %0 = vector.load %arg1[%c0, %c0_0, %c0_1] : memref<1x72x12xbf16, #tpu.memory_space<vmem>>, vector<1x72x12xbf16>
    %1 = vector.shape_cast %0 : vector<1x72x12xbf16> to vector<72x12xbf16>
    %c0_2 = arith.constant 0 : index
    %c0_3 = arith.constant 0 : index
    %c0_4 = arith.constant 0 : index
    %2 = vector.load %arg2[%c0_2, %c0_3, %c0_4] : memref<1x12x4xbf16, #tpu.memory_space<vmem>>, vector<1x12x4xbf16>
    %3 = vector.shape_cast %2 : vector<1x12x4xbf16> to vector<12x4xbf16>
    %cst = arith.constant dense<0.000000e+00> : vector<72x4xf32>
    %4 = tpu.matmul %1, %3, %cst {dimension_numbers = #tpu.dot_dimension_numbers<[1], [0], [0], [1], [0, 0, 1, 1], [], []>} : vector<72x12xbf16>, vector<12x4xbf16>, vector<72x4xf32> -> vector<72x4xf32>
    %c0_5 = arith.constant 0 : index
    %c0_6 = arith.constant 0 : index
    %c0_7 = arith.constant 0 : index
    %5 = vector.load %arg3[%c0_5, %c0_6, %c0_7] : memref<1x12x16xbf16, #tpu.memory_space<vmem>>, vector<1x12x16xbf16>
    %6 = vector.shape_cast %5 : vector<1x12x16xbf16> to vector<12x16xbf16>
    %cst_8 = arith.constant dense<0.000000e+00> : vector<72x16xf32>
    %7 = tpu.matmul %1, %6, %cst_8 {dimension_numbers = #tpu.dot_dimension_numbers<[1], [0], [0], [1], [0, 0, 1, 1], [], []>} : vector<72x12xbf16>, vector<12x16xbf16>, vector<72x16xf32> -> vector<72x16xf32>
    %c0_9 = arith.constant 0 : index
    %c0_10 = arith.constant 0 : index
    %8 = vector.load %arg11[%c0_9, %c0_10] : memref<72x16xf32, #tpu.memory_space<vmem>>, vector<72x16xf32>
    tpu.vector_store %arg11[%c0_9, %c0_10], %7 {strides = array<i32>} : memref<72x16xf32, #tpu.memory_space<vmem>>, vector<72x16xf32>,
    %c0_11 = arith.constant 0 : index
    %c0_12 = arith.constant 0 : index
    %c0_13 = arith.constant 0 : index
    %9 = vector.load %arg4[%c0_11, %c0_12, %c0_13] : memref<1x12x16xbf16, #tpu.memory_space<vmem>>, vector<1x12x16xbf16>
    %10 = vector.shape_cast %9 : vector<1x12x16xbf16> to vector<12x16xbf16>
    %cst_14 = arith.constant dense<0.000000e+00> : vector<72x16xf32>
    %11 = tpu.matmul %1, %10, %cst_14 {dimension_numbers = #tpu.dot_dimension_numbers<[1], [0], [0], [1], [0, 0, 1, 1], [], []>} : vector<72x12xbf16>, vector<12x16xbf16>, vector<72x16xf32> -> vector<72x16xf32>
    %c0_15 = arith.constant 0 : index
    %c0_16 = arith.constant 0 : index
    %12 = vector.load %arg12[%c0_15, %c0_16] : memref<72x16xf32, #tpu.memory_space<vmem>>, vector<72x16xf32>
    tpu.vector_store %arg12[%c0_15, %c0_16], %11 {strides = array<i32>} : memref<72x16xf32, #tpu.memory_space<vmem>>, vector<72x16xf32>,
    %13 = arith.truncf %4 : vector<72x4xf32> to vector<72x4xbf16>
    %c0_17 = arith.constant 0 : index
    %c0_18 = arith.constant 0 : index
    %c0_19 = arith.constant 0 : index
    %14 = vector.load %arg5[%c0_17, %c0_18, %c0_19] : memref<1x4x12xbf16, #tpu.memory_space<vmem>>, vector<1x4x12xbf16>
    %15 = vector.shape_cast %14 : vector<1x4x12xbf16> to vector<4x12xbf16>
    %cst_20 = arith.constant dense<0.000000e+00> : vector<72x12xf32>
    %16 = tpu.matmul %13, %15, %cst_20 {dimension_numbers = #tpu.dot_dimension_numbers<[1], [0], [0], [1], [0, 0, 1, 1], [], []>} : vector<72x4xbf16>, vector<4x12xbf16>, vector<72x12xf32> -> vector<72x12xf32>
    %c0_21 = arith.constant 0 : index
    %c0_22 = arith.constant 0 : index
    %c0_23 = arith.constant 0 : index
    %17 = vector.load %arg8[%c0_21, %c0_22, %c0_23] : memref<1x1x12xf32, #tpu.memory_space<vmem>>, vector<1x1x12xf32>
    %18 = vector.shape_cast %17 : vector<1x1x12xf32> to vector<1x12xf32>
    %19 = vector.broadcast %18 : vector<1x12xf32> to vector<72x12xf32>
    %20 = arith.addf %16, %19 : vector<72x12xf32>
    %cst_24 = arith.constant 0.000000e+00 : f32
    %21 = vector.broadcast %cst_24 : f32 to vector<72x12xf32>
    %22 = arith.maximumf %20, %21 : vector<72x12xf32>
    %23 = math.absf %20 : vector<72x12xf32>
    %cst_25 = arith.constant 0.000000e+00 : f32
    %24 = vector.broadcast %cst_25 : f32 to vector<72x12xf32>
    %25 = arith.subf %24, %23 : vector<72x12xf32>
    %26 = math.exp %25 : vector<72x12xf32>
    %cst_26 = arith.constant 1.000000e+00 : f32
    %27 = vector.broadcast %cst_26 : f32 to vector<72x12xf32>
    %28 = arith.addf %27, %26 : vector<72x12xf32>
    %29 = math.log %28 : vector<72x12xf32>
    %30 = arith.addf %22, %29 : vector<72x12xf32>
    %c0_27 = arith.constant 0 : index
    %c0_28 = arith.constant 0 : index
    %31 = vector.load %arg10[%c0_27, %c0_28] : memref<72x12xf32, #tpu.memory_space<vmem>>, vector<72x12xf32>
    tpu.vector_store %arg10[%c0_27, %c0_28], %30 {strides = array<i32>} : memref<72x12xf32, #tpu.memory_space<vmem>>, vector<72x12xf32>,
    %c0_29 = arith.constant 0 : index
    %c0_30 = arith.constant 0 : index
    %c0_31 = arith.constant 0 : index
    %32 = vector.load %arg6[%c0_29, %c0_30, %c0_31] : memref<1x16x12xf32, #tpu.memory_space<vmem>>, vector<1x16x12xf32>
    %33 = vector.shape_cast %32 : vector<1x16x12xf32> to vector<16x12xf32>
    %c0_32 = arith.constant 0 : index
    %c0_33 = arith.constant 0 : index
    %c0_34 = arith.constant 0 : index
    %34 = vector.load %arg7[%c0_32, %c0_33, %c0_34] : memref<1x1x12xf32, #tpu.memory_space<vmem>>, vector<1x1x12xf32>
    %35 = vector.shape_cast %34 : vector<1x1x12xf32> to vector<1x12xf32>
    %cst_35 = arith.constant 0.000000e+00 : f32
    %36 = vector.broadcast %cst_35 : f32 to vector<16x12xf32>
    %c0_i32 = arith.constant 0 : i32
    %c9_i32 = arith.constant 9 : i32
    %37 = arith.addi %c0_i32, %c9_i32 : i32
    %c1_i32 = arith.constant 1 : i32
    %38 = scf.for %arg13 = %c0_i32 to %37 step %c1_i32 iter_args(%arg14 = %36) -> (vector<16x12xf32>)  : i32 {
      %c8_i32 = arith.constant 8 : i32
      %39 = arith.muli %arg13, %c8_i32 : i32
      %40 = tpu.assume_multiple %39, 8 : i32
      %c0_37 = arith.constant 0 : index
      %41 = arith.index_cast %40 : i32 to index
      %c0_38 = arith.constant 0 : index
      %42 = vector.load %arg1[%c0_37, %41, %c0_38] : memref<1x72x12xbf16, #tpu.memory_space<vmem>>, vector<1x8x12xbf16>
      %43 = vector.shape_cast %42 : vector<1x8x12xbf16> to vector<8x12xbf16>
      %44 = arith.extf %43 : vector<8x12xbf16> to vector<8x12xf32>
      %45 = arith.index_cast %40 : i32 to index
      %c0_39 = arith.constant 0 : index
      %46 = vector.load %arg10[%45, %c0_39] : memref<72x12xf32, #tpu.memory_space<vmem>>, vector<8x12xf32>
      %47 = arith.index_cast %40 : i32 to index
      %c0_40 = arith.constant 0 : index
      %48 = vector.load %arg11[%47, %c0_40] : memref<72x16xf32, #tpu.memory_space<vmem>>, vector<8x16xf32>
      %49 = arith.index_cast %40 : i32 to index
      %c0_41 = arith.constant 0 : index
      %50 = vector.load %arg12[%49, %c0_41] : memref<72x16xf32, #tpu.memory_space<vmem>>, vector<8x16xf32>
      %51 = vector.shape_cast %46 : vector<8x12xf32> to vector<8x1x12xf32>
      %52 = vector.shape_cast %33 : vector<16x12xf32> to vector<1x16x12xf32>
      %53 = vector.broadcast %51 : vector<8x1x12xf32> to vector<8x16x12xf32>
      %54 = vector.broadcast %52 : vector<1x16x12xf32> to vector<8x16x12xf32>
      %55 = arith.mulf %53, %54 : vector<8x16x12xf32>
      %56 = math.exp %55 : vector<8x16x12xf32>
      %57 = arith.mulf %46, %44 : vector<8x12xf32>
      %58 = vector.shape_cast %57 : vector<8x12xf32> to vector<8x1x12xf32>
      %59 = vector.shape_cast %48 : vector<8x16xf32> to vector<8x16x1xf32>
      %60 = vector.broadcast %58 : vector<8x1x12xf32> to vector<8x16x12xf32>
      %61 = vector.broadcast %59 : vector<8x16x1xf32> to vector<8x16x12xf32>
      %62 = arith.mulf %60, %61 : vector<8x16x12xf32>
      %63 = vector.shape_cast %50 : vector<8x16xf32> to vector<8x16x1xf32>
      %64 = vector.shape_cast %63 : vector<8x16x1xf32> to vector<8x16x1xf32>
      %65 = vector.broadcast %64 : vector<8x16x1xf32> to vector<8x16x12xf32>
      %66 = vector.extract_strided_slice %56 {offsets = [0, 0, 0], sizes = [1, 16, 12], strides = [1, 1, 1]} : vector<8x16x12xf32> to vector<1x16x12xf32>
      %67 = vector.shape_cast %66 : vector<1x16x12xf32> to vector<16x12xf32>
      %68 = arith.mulf %67, %arg14 : vector<16x12xf32>
      %69 = vector.extract_strided_slice %62 {offsets = [0, 0, 0], sizes = [1, 16, 12], strides = [1, 1, 1]} : vector<8x16x12xf32> to vector<1x16x12xf32>
      %70 = vector.shape_cast %69 : vector<1x16x12xf32> to vector<16x12xf32>
      %71 = arith.addf %68, %70 : vector<16x12xf32>
      %72 = vector.extract_strided_slice %65 {offsets = [0, 0, 0], sizes = [1, 16, 12], strides = [1, 1, 1]} : vector<8x16x12xf32> to vector<1x16x12xf32>
      %73 = vector.shape_cast %72 : vector<1x16x12xf32> to vector<16x12xf32>
      %74 = arith.mulf %71, %73 : vector<16x12xf32>
      %cst_42 = arith.constant dense<0.000000e+00> : vector<12xf32>
      %75 = vector.multi_reduction <add>, %74, %cst_42 [0] : vector<16x12xf32> to vector<12xf32>
      %76 = vector.shape_cast %75 : vector<12xf32> to vector<1x12xf32>
      %77 = vector.extract_strided_slice %56 {offsets = [1, 0, 0], sizes = [1, 16, 12], strides = [1, 1, 1]} : vector<8x16x12xf32> to vector<1x16x12xf32>
      %78 = vector.shape_cast %77 : vector<1x16x12xf32> to vector<16x12xf32>
      %79 = arith.mulf %78, %71 : vector<16x12xf32>
      %80 = vector.extract_strided_slice %62 {offsets = [1, 0, 0], sizes = [1, 16, 12], strides = [1, 1, 1]} : vector<8x16x12xf32> to vector<1x16x12xf32>
      %81 = vector.shape_cast %80 : vector<1x16x12xf32> to vector<16x12xf32>
      %82 = arith.addf %79, %81 : vector<16x12xf32>
      %83 = vector.extract_strided_slice %65 {offsets = [1, 0, 0], sizes = [1, 16, 12], strides = [1, 1, 1]} : vector<8x16x12xf32> to vector<1x16x12xf32>
      %84 = vector.shape_cast %83 : vector<1x16x12xf32> to vector<16x12xf32>
      %85 = arith.mulf %82, %84 : vector<16x12xf32>
      %cst_43 = arith.constant dense<0.000000e+00> : vector<12xf32>
      %86 = vector.multi_reduction <add>, %85, %cst_43 [0] : vector<16x12xf32> to vector<12xf32>
      %87 = vector.shape_cast %86 : vector<12xf32> to vector<1x12xf32>
      %88 = vector.extract_strided_slice %56 {offsets = [2, 0, 0], sizes = [1, 16, 12], strides = [1, 1, 1]} : vector<8x16x12xf32> to vector<1x16x12xf32>
      %89 = vector.shape_cast %88 : vector<1x16x12xf32> to vector<16x12xf32>
      %90 = arith.mulf %89, %82 : vector<16x12xf32>
      %91 = vector.extract_strided_slice %62 {offsets = [2, 0, 0], sizes = [1, 16, 12], strides = [1, 1, 1]} : vector<8x16x12xf32> to vector<1x16x12xf32>
      %92 = vector.shape_cast %91 : vector<1x16x12xf32> to vector<16x12xf32>
      %93 = arith.addf %90, %92 : vector<16x12xf32>
      %94 = vector.extract_strided_slice %65 {offsets = [2, 0, 0], sizes = [1, 16, 12], strides = [1, 1, 1]} : vector<8x16x12xf32> to vector<1x16x12xf32>
      %95 = vector.shape_cast %94 : vector<1x16x12xf32> to vector<16x12xf32>
      %96 = arith.mulf %93, %95 : vector<16x12xf32>
      %cst_44 = arith.constant dense<0.000000e+00> : vector<12xf32>
      %97 = vector.multi_reduction <add>, %96, %cst_44 [0] : vector<16x12xf32> to vector<12xf32>
      %98 = vector.shape_cast %97 : vector<12xf32> to vector<1x12xf32>
      %99 = vector.extract_strided_slice %56 {offsets = [3, 0, 0], sizes = [1, 16, 12], strides = [1, 1, 1]} : vector<8x16x12xf32> to vector<1x16x12xf32>
      %100 = vector.shape_cast %99 : vector<1x16x12xf32> to vector<16x12xf32>
      %101 = arith.mulf %100, %93 : vector<16x12xf32>
      %102 = vector.extract_strided_slice %62 {offsets = [3, 0, 0], sizes = [1, 16, 12], strides = [1, 1, 1]} : vector<8x16x12xf32> to vector<1x16x12xf32>
      %103 = vector.shape_cast %102 : vector<1x16x12xf32> to vector<16x12xf32>
      %104 = arith.addf %101, %103 : vector<16x12xf32>
      %105 = vector.extract_strided_slice %65 {offsets = [3, 0, 0], sizes = [1, 16, 12], strides = [1, 1, 1]} : vector<8x16x12xf32> to vector<1x16x12xf32>
      %106 = vector.shape_cast %105 : vector<1x16x12xf32> to vector<16x12xf32>
      %107 = arith.mulf %104, %106 : vector<16x12xf32>
      %cst_45 = arith.constant dense<0.000000e+00> : vector<12xf32>
      %108 = vector.multi_reduction <add>, %107, %cst_45 [0] : vector<16x12xf32> to vector<12xf32>
      %109 = vector.shape_cast %108 : vector<12xf32> to vector<1x12xf32>
      %110 = vector.extract_strided_slice %56 {offsets = [4, 0, 0], sizes = [1, 16, 12], strides = [1, 1, 1]} : vector<8x16x12xf32> to vector<1x16x12xf32>
      %111 = vector.shape_cast %110 : vector<1x16x12xf32> to vector<16x12xf32>
      %112 = arith.mulf %111, %104 : vector<16x12xf32>
      %113 = vector.extract_strided_slice %62 {offsets = [4, 0, 0], sizes = [1, 16, 12], strides = [1, 1, 1]} : vector<8x16x12xf32> to vector<1x16x12xf32>
      %114 = vector.shape_cast %113 : vector<1x16x12xf32> to vector<16x12xf32>
      %115 = arith.addf %112, %114 : vector<16x12xf32>
      %116 = vector.extract_strided_slice %65 {offsets = [4, 0, 0], sizes = [1, 16, 12], strides = [1, 1, 1]} : vector<8x16x12xf32> to vector<1x16x12xf32>
      %117 = vector.shape_cast %116 : vector<1x16x12xf32> to vector<16x12xf32>
      %118 = arith.mulf %115, %117 : vector<16x12xf32>
      %cst_46 = arith.constant dense<0.000000e+00> : vector<12xf32>
      %119 = vector.multi_reduction <add>, %118, %cst_46 [0] : vector<16x12xf32> to vector<12xf32>
      %120 = vector.shape_cast %119 : vector<12xf32> to vector<1x12xf32>
      %121 = vector.extract_strided_slice %56 {offsets = [5, 0, 0], sizes = [1, 16, 12], strides = [1, 1, 1]} : vector<8x16x12xf32> to vector<1x16x12xf32>
      %122 = vector.shape_cast %121 : vector<1x16x12xf32> to vector<16x12xf32>
      %123 = arith.mulf %122, %115 : vector<16x12xf32>
      %124 = vector.extract_strided_slice %62 {offsets = [5, 0, 0], sizes = [1, 16, 12], strides = [1, 1, 1]} : vector<8x16x12xf32> to vector<1x16x12xf32>
      %125 = vector.shape_cast %124 : vector<1x16x12xf32> to vector<16x12xf32>
      %126 = arith.addf %123, %125 : vector<16x12xf32>
      %127 = vector.extract_strided_slice %65 {offsets = [5, 0, 0], sizes = [1, 16, 12], strides = [1, 1, 1]} : vector<8x16x12xf32> to vector<1x16x12xf32>
      %128 = vector.shape_cast %127 : vector<1x16x12xf32> to vector<16x12xf32>
      %129 = arith.mulf %126, %128 : vector<16x12xf32>
      %cst_47 = arith.constant dense<0.000000e+00> : vector<12xf32>
      %130 = vector.multi_reduction <add>, %129, %cst_47 [0] : vector<16x12xf32> to vector<12xf32>
      %131 = vector.shape_cast %130 : vector<12xf32> to vector<1x12xf32>
      %132 = vector.extract_strided_slice %56 {offsets = [6, 0, 0], sizes = [1, 16, 12], strides = [1, 1, 1]} : vector<8x16x12xf32> to vector<1x16x12xf32>
      %133 = vector.shape_cast %132 : vector<1x16x12xf32> to vector<16x12xf32>
      %134 = arith.mulf %133, %126 : vector<16x12xf32>
      %135 = vector.extract_strided_slice %62 {offsets = [6, 0, 0], sizes = [1, 16, 12], strides = [1, 1, 1]} : vector<8x16x12xf32> to vector<1x16x12xf32>
      %136 = vector.shape_cast %135 : vector<1x16x12xf32> to vector<16x12xf32>
      %137 = arith.addf %134, %136 : vector<16x12xf32>
      %138 = vector.extract_strided_slice %65 {offsets = [6, 0, 0], sizes = [1, 16, 12], strides = [1, 1, 1]} : vector<8x16x12xf32> to vector<1x16x12xf32>
      %139 = vector.shape_cast %138 : vector<1x16x12xf32> to vector<16x12xf32>
      %140 = arith.mulf %137, %139 : vector<16x12xf32>
      %cst_48 = arith.constant dense<0.000000e+00> : vector<12xf32>
      %141 = vector.multi_reduction <add>, %140, %cst_48 [0] : vector<16x12xf32> to vector<12xf32>
      %142 = vector.shape_cast %141 : vector<12xf32> to vector<1x12xf32>
      %143 = vector.extract_strided_slice %56 {offsets = [7, 0, 0], sizes = [1, 16, 12], strides = [1, 1, 1]} : vector<8x16x12xf32> to vector<1x16x12xf32>
      %144 = vector.shape_cast %143 : vector<1x16x12xf32> to vector<16x12xf32>
      %145 = arith.mulf %144, %137 : vector<16x12xf32>
      %146 = vector.extract_strided_slice %62 {offsets = [7, 0, 0], sizes = [1, 16, 12], strides = [1, 1, 1]} : vector<8x16x12xf32> to vector<1x16x12xf32>
      %147 = vector.shape_cast %146 : vector<1x16x12xf32> to vector<16x12xf32>
      %148 = arith.addf %145, %147 : vector<16x12xf32>
      %149 = vector.extract_strided_slice %65 {offsets = [7, 0, 0], sizes = [1, 16, 12], strides = [1, 1, 1]} : vector<8x16x12xf32> to vector<1x16x12xf32>
      %150 = vector.shape_cast %149 : vector<1x16x12xf32> to vector<16x12xf32>
      %151 = arith.mulf %148, %150 : vector<16x12xf32>
      %cst_49 = arith.constant dense<0.000000e+00> : vector<12xf32>
      %152 = vector.multi_reduction <add>, %151, %cst_49 [0] : vector<16x12xf32> to vector<12xf32>
      %153 = vector.shape_cast %152 : vector<12xf32> to vector<1x12xf32>
      %154 = tpu.concatenate %76, %87, %98, %109, %120, %131, %142, %153 in 0 : vector<1x12xf32>, vector<1x12xf32>, vector<1x12xf32>, vector<1x12xf32>, vector<1x12xf32>, vector<1x12xf32>, vector<1x12xf32>, vector<1x12xf32> -> vector<8x12xf32>
      %155 = vector.broadcast %35 : vector<1x12xf32> to vector<8x12xf32>
      %156 = arith.mulf %155, %44 : vector<8x12xf32>
      %157 = arith.addf %154, %156 : vector<8x12xf32>
      %c0_50 = arith.constant 0 : index
      %158 = arith.index_cast %40 : i32 to index
      %c0_51 = arith.constant 0 : index
      %159 = vector.load %arg9[%c0_50, %158, %c0_51] : memref<1x72x12xf32, #tpu.memory_space<vmem>>, vector<1x8x12xf32>
      %160 = vector.shape_cast %159 : vector<1x8x12xf32> to vector<8x12xf32>
      %161 = vector.shape_cast %157 : vector<8x12xf32> to vector<1x8x12xf32>
      tpu.vector_store %arg9[%c0_50, %158, %c0_51], %161 {strides = array<i32>} : memref<1x72x12xf32, #tpu.memory_space<vmem>>, vector<1x8x12xf32>,
      scf.yield %148 : vector<16x12xf32>
    }
    %c9_i32_36 = arith.constant 9 : i32
    return
  }
  func.func @transform_0(%arg0: i32) -> (i32, i32, i32) {
    %c0_i32 = arith.constant 0 : i32
    %c0_i32_0 = arith.constant 0 : i32
    %c0_i32_1 = arith.constant 0 : i32
    return %arg0, %c0_i32, %c0_i32_0 : i32, i32, i32
  }
  func.func @transform_1(%arg0: i32) -> (i32, i32, i32) {
    %c0_i32 = arith.constant 0 : i32
    %c0_i32_0 = arith.constant 0 : i32
    %c0_i32_1 = arith.constant 0 : i32
    return %arg0, %c0_i32, %c0_i32_0 : i32, i32, i32
  }
  func.func @transform_2(%arg0: i32) -> (i32, i32, i32) {
    %c0_i32 = arith.constant 0 : i32
    %c0_i32_0 = arith.constant 0 : i32
    %c0_i32_1 = arith.constant 0 : i32
    return %arg0, %c0_i32, %c0_i32_0 : i32, i32, i32
  }
  func.func @transform_3(%arg0: i32) -> (i32, i32, i32) {
    %c0_i32 = arith.constant 0 : i32
    %c0_i32_0 = arith.constant 0 : i32
    %c0_i32_1 = arith.constant 0 : i32
    return %arg0, %c0_i32, %c0_i32_0 : i32, i32, i32
  }
  func.func @transform_4(%arg0: i32) -> (i32, i32, i32) {
    %c0_i32 = arith.constant 0 : i32
    %c0_i32_0 = arith.constant 0 : i32
    %c0_i32_1 = arith.constant 0 : i32
    return %arg0, %c0_i32, %c0_i32_0 : i32, i32, i32
  }
  func.func @transform_5(%arg0: i32) -> (i32, i32, i32) {
    %c0_i32 = arith.constant 0 : i32
    %c0_i32_0 = arith.constant 0 : i32
    %c0_i32_1 = arith.constant 0 : i32
    return %arg0, %c0_i32, %c0_i32_0 : i32, i32, i32
  }
  func.func @transform_6(%arg0: i32) -> (i32, i32, i32) {
    %c0_i32 = arith.constant 0 : i32
    %c0_i32_0 = arith.constant 0 : i32
    %c0_i32_1 = arith.constant 0 : i32
    return %arg0, %c0_i32, %c0_i32_0 : i32, i32, i32
  }
  func.func @transform_7(%arg0: i32) -> (i32, i32, i32) {
    %c0_i32 = arith.constant 0 : i32
    %c0_i32_0 = arith.constant 0 : i32
    %c0_i32_1 = arith.constant 0 : i32
    return %arg0, %c0_i32, %c0_i32_0 : i32, i32, i32
  }
  func.func @transform_8(%arg0: i32) -> (i32, i32, i32) {
    %c0_i32 = arith.constant 0 : i32
    %c0_i32_0 = arith.constant 0 : i32
    %c0_i32_1 = arith.constant 0 : i32
    return %arg0, %c0_i32, %c0_i32_0 : i32, i32, i32
  }
}

module attributes {stable_mosaic.version = 11 : i64} {
  func.func @_tail_kernel(%arg0: memref<4x72x12xf32, #tpu.memory_space<vmem>>, %arg1: memref<64x8xbf16, #tpu.memory_space<vmem>>, %arg2: memref<64x64xbf16, #tpu.memory_space<vmem>>, %arg3: memref<64x64xbf16, #tpu.memory_space<vmem>>, %arg4: memref<64x64xbf16, #tpu.memory_space<vmem>>, %arg5: memref<12x8xbf16, #tpu.memory_space<vmem>>, %arg6: memref<1x8xf32, #tpu.memory_space<vmem>>, %arg7: memref<1x8xf32, #tpu.memory_space<vmem>>, %arg8: memref<8x4xbf16, #tpu.memory_space<vmem>>, %arg9: memref<64x4xf32, #tpu.memory_space<vmem>>) attributes {dimension_semantics = [], scalar_prefetch = 0 : i64, scratch_operands = 0 : i64, tpu.core_type = #tpu.core_type<tc>} {
    %c0 = arith.constant 0 : index
    %c0_0 = arith.constant 0 : index
    %c0_1 = arith.constant 0 : index
    %0 = vector.load %arg0[%c0, %c0_0, %c0_1] : memref<4x72x12xf32, #tpu.memory_space<vmem>>, vector<1x64x12xf32>
    %1 = vector.shape_cast %0 : vector<1x64x12xf32> to vector<64x12xf32>
    %c1 = arith.constant 1 : index
    %c0_2 = arith.constant 0 : index
    %c0_3 = arith.constant 0 : index
    %2 = vector.load %arg0[%c1, %c0_2, %c0_3] : memref<4x72x12xf32, #tpu.memory_space<vmem>>, vector<1x64x12xf32>
    %3 = vector.shape_cast %2 : vector<1x64x12xf32> to vector<64x12xf32>
    %4 = arith.truncf %3 : vector<64x12xf32> to vector<64x12xbf16>
    %c2 = arith.constant 2 : index
    %c0_4 = arith.constant 0 : index
    %c0_5 = arith.constant 0 : index
    %5 = vector.load %arg0[%c2, %c0_4, %c0_5] : memref<4x72x12xf32, #tpu.memory_space<vmem>>, vector<1x64x12xf32>
    %6 = vector.shape_cast %5 : vector<1x64x12xf32> to vector<64x12xf32>
    %7 = arith.truncf %6 : vector<64x12xf32> to vector<64x12xbf16>
    %c3 = arith.constant 3 : index
    %c0_6 = arith.constant 0 : index
    %c0_7 = arith.constant 0 : index
    %8 = vector.load %arg0[%c3, %c0_6, %c0_7] : memref<4x72x12xf32, #tpu.memory_space<vmem>>, vector<1x64x12xf32>
    %9 = vector.shape_cast %8 : vector<1x64x12xf32> to vector<64x12xf32>
    %10 = arith.truncf %9 : vector<64x12xf32> to vector<64x12xbf16>
    %c0_8 = arith.constant 0 : index
    %c0_9 = arith.constant 0 : index
    %11 = vector.load %arg2[%c0_8, %c0_9] : memref<64x64xbf16, #tpu.memory_space<vmem>>, vector<64x64xbf16>
    %cst = arith.constant dense<0.000000e+00> : vector<64x12xf32>
    %12 = tpu.matmul %11, %7, %cst {dimension_numbers = #tpu.dot_dimension_numbers<[1], [0], [0], [1], [0, 0, 1, 1], [], []>} : vector<64x64xbf16>, vector<64x12xbf16>, vector<64x12xf32> -> vector<64x12xf32>
    %13 = arith.addf %1, %12 : vector<64x12xf32>
    %c0_10 = arith.constant 0 : index
    %c0_11 = arith.constant 0 : index
    %14 = vector.load %arg3[%c0_10, %c0_11] : memref<64x64xbf16, #tpu.memory_space<vmem>>, vector<64x64xbf16>
    %cst_12 = arith.constant dense<0.000000e+00> : vector<64x12xf32>
    %15 = tpu.matmul %14, %4, %cst_12 {dimension_numbers = #tpu.dot_dimension_numbers<[1], [0], [0], [1], [0, 0, 1, 1], [], []>} : vector<64x64xbf16>, vector<64x12xbf16>, vector<64x12xf32> -> vector<64x12xf32>
    %16 = arith.addf %13, %15 : vector<64x12xf32>
    %c0_13 = arith.constant 0 : index
    %c0_14 = arith.constant 0 : index
    %17 = vector.load %arg4[%c0_13, %c0_14] : memref<64x64xbf16, #tpu.memory_space<vmem>>, vector<64x64xbf16>
    %cst_15 = arith.constant dense<0.000000e+00> : vector<64x12xf32>
    %18 = tpu.matmul %17, %10, %cst_15 {dimension_numbers = #tpu.dot_dimension_numbers<[1], [0], [0], [1], [0, 0, 1, 1], [], []>} : vector<64x64xbf16>, vector<64x12xbf16>, vector<64x12xf32> -> vector<64x12xf32>
    %19 = arith.addf %16, %18 : vector<64x12xf32>
    %20 = arith.truncf %19 : vector<64x12xf32> to vector<64x12xbf16>
    %c0_16 = arith.constant 0 : index
    %c0_17 = arith.constant 0 : index
    %21 = vector.load %arg5[%c0_16, %c0_17] : memref<12x8xbf16, #tpu.memory_space<vmem>>, vector<12x8xbf16>
    %cst_18 = arith.constant dense<0.000000e+00> : vector<64x8xf32>
    %22 = tpu.matmul %20, %21, %cst_18 {dimension_numbers = #tpu.dot_dimension_numbers<[1], [0], [0], [1], [0, 0, 1, 1], [], []>} : vector<64x12xbf16>, vector<12x8xbf16>, vector<64x8xf32> -> vector<64x8xf32>
    %cst_19 = arith.constant dense<0.000000e+00> : vector<64xf32>
    %23 = vector.multi_reduction <add>, %22, %cst_19 [1] : vector<64x8xf32> to vector<64xf32>
    %24 = vector.shape_cast %23 : vector<64xf32> to vector<64x1xf32>
    %cst_20 = arith.constant 8.000000e+00 : f32
    %25 = vector.broadcast %cst_20 : f32 to vector<64x1xf32>
    %26 = arith.divf %24, %25 : vector<64x1xf32>
    %27 = vector.broadcast %26 : vector<64x1xf32> to vector<64x8xf32>
    %28 = arith.subf %22, %27 : vector<64x8xf32>
    %29 = vector.broadcast %26 : vector<64x1xf32> to vector<64x8xf32>
    %30 = arith.subf %22, %29 : vector<64x8xf32>
    %31 = arith.mulf %28, %30 : vector<64x8xf32>
    %cst_21 = arith.constant dense<0.000000e+00> : vector<64xf32>
    %32 = vector.multi_reduction <add>, %31, %cst_21 [1] : vector<64x8xf32> to vector<64xf32>
    %33 = vector.shape_cast %32 : vector<64xf32> to vector<64x1xf32>
    %cst_22 = arith.constant 8.000000e+00 : f32
    %34 = vector.broadcast %cst_22 : f32 to vector<64x1xf32>
    %35 = arith.divf %33, %34 : vector<64x1xf32>
    %36 = vector.broadcast %26 : vector<64x1xf32> to vector<64x8xf32>
    %37 = arith.subf %22, %36 : vector<64x8xf32>
    %cst_23 = arith.constant 9.99999974E-6 : f32
    %38 = vector.broadcast %cst_23 : f32 to vector<64x1xf32>
    %39 = arith.addf %35, %38 : vector<64x1xf32>
    %40 = math.rsqrt %39 : vector<64x1xf32>
    %41 = vector.broadcast %40 : vector<64x1xf32> to vector<64x8xf32>
    %42 = arith.mulf %37, %41 : vector<64x8xf32>
    %c0_24 = arith.constant 0 : index
    %c0_25 = arith.constant 0 : index
    %43 = vector.load %arg6[%c0_24, %c0_25] : memref<1x8xf32, #tpu.memory_space<vmem>>, vector<1x8xf32>
    %44 = vector.broadcast %43 : vector<1x8xf32> to vector<64x8xf32>
    %45 = arith.mulf %42, %44 : vector<64x8xf32>
    %c0_26 = arith.constant 0 : index
    %c0_27 = arith.constant 0 : index
    %46 = vector.load %arg7[%c0_26, %c0_27] : memref<1x8xf32, #tpu.memory_space<vmem>>, vector<1x8xf32>
    %47 = vector.broadcast %46 : vector<1x8xf32> to vector<64x8xf32>
    %48 = arith.addf %45, %47 : vector<64x8xf32>
    %c0_28 = arith.constant 0 : index
    %c0_29 = arith.constant 0 : index
    %49 = vector.load %arg1[%c0_28, %c0_29] : memref<64x8xbf16, #tpu.memory_space<vmem>>, vector<64x8xbf16>
    %50 = arith.extf %49 : vector<64x8xbf16> to vector<64x8xf32>
    %cst_30 = arith.constant 0.000000e+00 : f32
    %51 = vector.broadcast %cst_30 : f32 to vector<64x8xf32>
    %52 = arith.subf %51, %50 : vector<64x8xf32>
    %53 = math.exp %52 : vector<64x8xf32>
    %cst_31 = arith.constant 1.000000e+00 : f32
    %54 = vector.broadcast %cst_31 : f32 to vector<64x8xf32>
    %55 = arith.addf %54, %53 : vector<64x8xf32>
    %cst_32 = arith.constant 1.000000e+00 : f32
    %56 = vector.broadcast %cst_32 : f32 to vector<64x8xf32>
    %57 = arith.divf %56, %55 : vector<64x8xf32>
    %58 = arith.mulf %50, %57 : vector<64x8xf32>
    %59 = arith.mulf %48, %58 : vector<64x8xf32>
    %60 = arith.truncf %59 : vector<64x8xf32> to vector<64x8xbf16>
    %c0_33 = arith.constant 0 : index
    %c0_34 = arith.constant 0 : index
    %61 = vector.load %arg8[%c0_33, %c0_34] : memref<8x4xbf16, #tpu.memory_space<vmem>>, vector<8x4xbf16>
    %cst_35 = arith.constant dense<0.000000e+00> : vector<64x4xf32>
    %62 = tpu.matmul %60, %61, %cst_35 {dimension_numbers = #tpu.dot_dimension_numbers<[1], [0], [0], [1], [0, 0, 1, 1], [], []>} : vector<64x8xbf16>, vector<8x4xbf16>, vector<64x4xf32> -> vector<64x4xf32>
    %c0_36 = arith.constant 0 : index
    %c0_37 = arith.constant 0 : index
    %63 = vector.load %arg9[%c0_36, %c0_37] : memref<64x4xf32, #tpu.memory_space<vmem>>, vector<64x4xf32>
    tpu.vector_store %arg9[%c0_36, %c0_37], %62 {strides = array<i32>} : memref<64x4xf32, #tpu.memory_space<vmem>>, vector<64x4xf32>,
    return
  }
}

</mosaic_0001>

<bundles_post_ra>
// kernel: _lambda_.3
= control target key start
LH: loop header
LB: loop body
LE: loop exit
PB: predicated region body
PF: predicated region fallthrough
CT: control target
= control target key end

     0   :  { %vm52_vm0 = vcmask 1041408   ;;  %v1205_v2 = vmov 0.0   ;;  %vm1206_vm1 = vmmov 0   ;;  %vm39_vm2 = vcmask 31744   ;;  %s1631_s2 = inlined_call_operand.vmem [shape: bf16[4,8], index: 2, kind: input, shape index: {}]   ;;  %s1632_s3 = inlined_call_operand.vmem [shape: bf16[4,8], index: 3, kind: input, shape index: {}]   ;;  %s1633_s1 = inlined_call_operand.vmem [shape: f32[64,4], index: 1, kind: input, shape index: {}]   ;;  %s1634_s0 = inlined_call_operand.vmem [shape: f32[10,10,4], index: 0, kind: input, shape index: {}]   ;;  %s1635_s7 = inlined_call_operand.vmem [shape: bf16[64,8], index: 7, kind: output, shape index: {1}]   ;;  %s1636_s4 = inlined_call_operand.vmem [shape: f32[9,8], index: 4, kind: input, shape index: {}]   ;;  %s1637_s5 = inlined_call_operand.vmem [shape: f32[1,8], index: 5, kind: input, shape index: {}]   ;;  %s1638_s6 = inlined_call_operand.vmem [shape: f32[8,8,8], index: 6, kind: output, shape index: {0}]  }
   0x1   :  { %v38_v0 = vld [vmem:[%s1632_s3] sm:$0x3]  ;;  %1110 = vmatprep.subr.bf16.mxu1 %v1205_v2  ;;  %1112 = vmatprep.mubr.msk.bf16.mxu1 %vm1206_vm1, %v1205_v2  ;;  %v27_v6 = vld [vmem:[%s1633_s1 + $0x8] sm:$0xff]  ;;  %v28_v7 = vld [vmem:[%s1633_s1 + $0x10] sm:$0xff]  ;;  %vm213_vm3 = vcmask 64512   ;;  %vm153_vm4 = vcmask 60416  }
   0x2   :  { %v162_v1 = vld [vmem:[%s1631_s2] sm:$0x3]  ;;  %1170 = vmatprep.subr.msk.bf16.mxu0 %vm52_vm0, %v38_v0  ;;  %v54_v5 = vsel %vm52_vm0, %v38_v0, 0  ;;  %v29_v8 = vld [vmem:[%s1633_s1 + $0x18] sm:$0xff]  ;;  %v164_v12 = vld [vmem:[%s1634_s0 + $0x8] sm:$0x3] }
   0x3   :  { %v26_v3 = vld [vmem:[%s1633_s1] sm:$0xff]  ;;  %v1259_v4 = vsel %vm52_vm0, %v162_v1, 0  ;;  %1101 = vmatpush3.bf16.msra.mxu0 %v54_v5  ;;  %v35_v10 = vpack.c.bf16 %v29_v8, %v28_v7  ;;  %v31_v15 = vld [vmem:[%s1633_s1 + $0x28] sm:$0xff]  ;;  %v32_v17 = vld [vmem:[%s1633_s1 + $0x30] sm:$0xff]  ;;  %vm215_vm5 = vcmask 58368  }
   0x4   :  { %1111 = vmatpush3.bf16.msra.mxu1 %v1259_v4  ;;  %v34_v9 = vpack.c.bf16 %v27_v6, %v26_v3  ;;  %v163_v11 = vld [vmem:[%s1634_s0] sm:$0xff]  ;;  %1122 = vmatprep.subr.bf16.mxu0 %v1205_v2  ;;  %v33_v18 = vld [vmem:[%s1633_s1 + $0x38] sm:$0xff]  ;;  %v1030_v19 = vld [vmem:[%s1634_s0 + $0x10] sm:$0xff] }
   0x5   :  { %v30_v13 = vld [vmem:[%s1633_s1 + $0x20] sm:$0xff]  ;;  %v165_v14 = vpack.c.bf16 %v164_v12, %v163_v11  ;;  %1116 = vmatprep.subr.bf16.mxu1 %v1205_v2  ;;  %v1031_v20 = vld [vmem:[%s1634_s0 + $0x18] sm:$0x3]  ;;  %v37_v21 = vpack.c.bf16 %v33_v18, %v32_v17  ;;  %v1034_v24 = vld [vmem:[%s1634_s0 + $0x28] sm:$0x3] }
   0x6   :  { %1102 = vmatprep.mubr.msk.bf16.mxu0 %vm39_vm2, %v34_v9  ;;  %v36_v16 = vpack.c.bf16 %v31_v15, %v30_v13  ;;  %v220_v22 = vpack.c.bf16 %v1031_v20, %v1030_v19  ;;  %v1033_v23 = vld [vmem:[%s1634_s0 + $0x20] sm:$0xff]  ;;  %v1036_v25 = vld [vmem:[%s1634_s0 + $0x30] sm:$0xff]  ;;  %v1037_v26 = vld [vmem:[%s1634_s0 + $0x38] sm:$0x3] }
   0x7   :  { %1103 = vmatmul.mubr.msk.bf16.vlgmr.msra.gmra.mrb[0].mxu0 %vm39_vm2, %v35_v10  ;;  %1113 = vmatmul.mubr.msk.bf16.vlgmr.msra.gmra.mrb[0].mxu1 %vm39_vm2, %v165_v14  ;;  %v271_v27 = vpack.c.bf16 %v1034_v24, %v1033_v23  ;;  %v322_v28 = vpack.c.bf16 %v1037_v26, %v1036_v25  ;;  %v1039_v29 = vld [vmem:[%s1634_s0 + $0x40] sm:$0xff]  ;;  %v1040_v30 = vld [vmem:[%s1634_s0 + $0x48] sm:$0x3]  ;;  %v1042_v31 = vld [vmem:[%s1634_s0 + $0x50] sm:$0xff] }
   0x8   :  { %1123 = vmatpush3.bf16.msra.mxu0 %v1259_v4  ;;  %1117 = vmatpush3.bf16.msra.mxu1 %v1259_v4  ;;  %v1043_v32 = vld [vmem:[%s1634_s0 + $0x58] sm:$0x3]  ;;  %v373_v33 = vpack.c.bf16 %v1040_v30, %v1039_v29  ;;  %v1045_v35 = vld [vmem:[%s1634_s0 + $0x60] sm:$0xff]  ;;  %v1046_v36 = vld [vmem:[%s1634_s0 + $0x68] sm:$0x3] }
   0x9   :  { %1106 = vmatprep.mubr.msk.bf16.mxu0 %vm39_vm2, %v36_v16  ;;  %1118 = vmatprep.mubr.msk.bf16.mxu1 %vm1206_vm1, %v1205_v2  ;;  %v424_v34 = vpack.c.bf16 %v1043_v32, %v1042_v31  ;;  %v1048_v37 = vld [vmem:[%s1634_s0 + $0x70] sm:$0xff]  ;;  %v1049_v38 = vld [vmem:[%s1634_s0 + $0x78] sm:$0x3]  ;;  %v475_v39 = vpack.c.bf16 %v1046_v36, %v1045_v35  ;;  %v1051_v41 = vld [vmem:[%s1634_s0 + $0x80] sm:$0xff] }
   0xa   :  { %1128 = vmatprep.subr.bf16.mxu1 %v1205_v2  ;;  %1134 = vmatprep.subr.bf16.mxu0 %v1205_v2  ;;  %v526_v40 = vpack.c.bf16 %v1049_v38, %v1048_v37  ;;  %v1052_v42 = vld [vmem:[%s1634_s0 + $0x88] sm:$0x3]  ;;  %v1054_v43 = vld [vmem:[%s1634_s0 + $0x90] sm:$0xff]  ;;  %v1055_v44 = vld [vmem:[%s1634_s0 + $0x98] sm:$0x3] }
   0xb   :  { %v577_v45 = vpack.c.bf16 %v1052_v42, %v1051_v41  ;;  %v628_v46 = vpack.c.bf16 %v1055_v44, %v1054_v43  ;;  %v1410_v59 = vld [vmem:[%s1636_s4] ss:$0 sm:$0xff]  ;;  %v1424_v62 = vld [vmem:[%s1636_s4 + $0x1] ss:$0 sm:$0xff]  ;;  %v1438_v15 = vld [vmem:[%s1636_s4 + $0x2] ss:$0 sm:$0xff] }
   0xc   :  { %v1419_v60 = vld [vmem:[%s1637_s5] ss:$0 sm:$0xff]  ;;  %v1451_v18 = vld [vmem:[%s1636_s4 + $0x3] ss:$0 sm:$0xff]  ;;  %v1463_v26 = vld [vmem:[%s1636_s4 + $0x4] ss:$0 sm:$0xff] }
   0xd   :  { %v1472_v36 = vld [vmem:[%s1636_s4 + $0x5] ss:$0 sm:$0xff]  ;;  %v1482_v44 = vld [vmem:[%s1636_s4 + $0x6] ss:$0 sm:$0xff] }
   0xf   :  { %1107 = vmatmul.mubr.msk.bf16.gmra.mrb[4].mxu0 %vm39_vm2, %v37_v21  ;;  %1119 = vmatmul.mubr.msk.bf16.vlgmr.msra.gmra.mrb[4].mxu1 %vm39_vm2, %v220_v22 }
  0x10   :  { %1129 = vmatpush3.bf16.msra.mxu1 %v1259_v4  ;;  %1124 = vmatprep.mubr.msk.bf16.mxu0 %vm1206_vm1, %v1205_v2 }
  0x11   :  { %1130 = vmatprep.mubr.msk.bf16.mxu1 %vm1206_vm1, %v1205_v2  ;;  %1140 = vmatprep.subr.bf16.mxu1 %v1205_v2 }
  0x17   :  { %1125 = vmatmul.mubr.msk.bf16.vlgmr.msra.gmra.mrb[8].mxu0 %vm39_vm2, %v271_v27  ;;  %1131 = vmatmul.mubr.msk.bf16.vlgmr.msra.gmra.mrb[8].mxu1 %vm39_vm2, %v322_v28 }
  0x18   :  { %1135 = vmatpush3.bf16.msra.mxu0 %v1259_v4  ;;  %1141 = vmatpush3.bf16.msra.mxu1 %v1259_v4 }
  0x19   :  { %1136 = vmatprep.mubr.msk.bf16.mxu0 %vm1206_vm1, %v1205_v2  ;;  %1142 = vmatprep.mubr.msk.bf16.mxu1 %vm1206_vm1, %v1205_v2 }
  0x1a   :  { %1146 = vmatprep.subr.bf16.mxu0 %v1205_v2  ;;  %1152 = vmatprep.subr.bf16.mxu1 %v1205_v2 }
  0x1f   :  { %1137 = vmatmul.mubr.msk.bf16.vlgmr.msra.gmra.mrb[12].mxu0 %vm39_vm2, %v373_v33  ;;  %1143 = vmatmul.mubr.msk.bf16.vlgmr.msra.gmra.mrb[12].mxu1 %vm39_vm2, %v424_v34 }
  0x20   :  { %1147 = vmatpush3.bf16.msra.mxu0 %v1259_v4  ;;  %1153 = vmatpush3.bf16.msra.mxu1 %v1259_v4 }
  0x21   :  { %1148 = vmatprep.mubr.msk.bf16.mxu0 %vm1206_vm1, %v1205_v2  ;;  %1154 = vmatprep.mubr.msk.bf16.mxu1 %vm1206_vm1, %v1205_v2 }
  0x22   :  { %1158 = vmatprep.subr.bf16.mxu0 %v1205_v2  ;;  %1164 = vmatprep.subr.bf16.mxu1 %v1205_v2 }
  0x27   :  { %1149 = vmatmul.mubr.msk.bf16.vlgmr.msra.gmra.mrb[16].mxu0 %vm39_vm2, %v475_v39  ;;  %1155 = vmatmul.mubr.msk.bf16.vlgmr.msra.gmra.mrb[16].mxu1 %vm39_vm2, %v526_v40 }
  0x28   :  { %1159 = vmatpush3.bf16.msra.mxu0 %v1259_v4  ;;  %1160 = vmatprep.mubr.msk.bf16.mxu0 %vm1206_vm1, %v1205_v2 }
  0x29   :  { %1165 = vmatpush3.bf16.msra.mxu1 %v1259_v4  ;;  %1166 = vmatprep.mubr.msk.bf16.mxu1 %vm1206_vm1, %v1205_v2 }
  0x2f   :  { %1161 = vmatmul.mubr.msk.bf16.vlgmr.msra.gmra.mrb[20].mxu0 %vm39_vm2, %v577_v45  ;;  %1167 = vmatmul.mubr.msk.bf16.vlgmr.msra.gmra.mrb[20].mxu1 %vm39_vm2, %v628_v46 }
  0xda   :  { %v1104_v47 = vpop.f32.mrb[0].mxu0  ;;  %v206_v48 = vpop.f32.mrb[0].mxu1 }
  0xdb   :  { %v1069_v49 = vpack.c.bf16 %v1104_v47, %v1104_v47  ;;  %214 = vst.msk [vmem:[#allocation2] sm:$0xff] %vm213_vm3, %v206_v48  ;;  %v90_v50 = vpop.f32.mrb[1].mxu0  ;;  %v1114_v51 = vpop.f32.mrb[1].mxu1 }
  0xdc   :  { %v1067_v52 = vpack.c.bf16 %v90_v50, %v90_v50  ;;  %v1105_v53 = vpop.f32.mrb[2].mxu0  ;;  %v209_v54 = vpop.f32.mrb[2].mxu1 }
  0xdd   :  { %156 = vst.msk [vmem:[%s1635_s7 + $0x8] sm:$0xf] %vm153_vm4, %v1069_v49  ;;  %v1070_v55 = vpack.c.bf16 %v1105_v53, %v1105_v53  ;;  %v93_v56 = vpop.f32.mrb[3].mxu0  ;;  %v1115_v57 = vpop.f32.mrb[3].mxu1 }
  0xde   :  { %216 = vst.msk [vmem:[#allocation2 + $0x8] sm:$0x3] %vm215_vm5, %v209_v54  ;;  %v1068_v58 = vpack.c.bf16 %v93_v56, %v93_v56 }
  0xdf   :  { %154 = vst.msk [vmem:[%s1635_s7] sm:$0xf] %vm153_vm4, %v1067_v52  ;;  %157 = vst.msk [vmem:[%s1635_s7 + $0xc] sm:$0xf] %vm153_vm4, %v1070_v55  ;;  %v1491_v55 = vld [vmem:[%s1636_s4 + $0x7] ss:$0 sm:$0xff] }
  0xe0   :  { %155 = vst.msk [vmem:[%s1635_s7 + $0x4] sm:$0xf] %vm153_vm4, %v1068_v58 }
  0xe2   :  { %v684_v61 = vld [vmem:[#allocation2] sm:$0xff]  ;;  %v1108_v63 = vpop.f32.mrb[4].mxu0  ;;  %v258_v0 = vpop.f32.mrb[4].mxu1 }
  0xe3   :  { %v697_v1 = vmul.f32 %v1410_v59, %v684_v61  ;;  %v1073_v2 = vpack.c.bf16 %v1108_v63, %v1108_v63  ;;  %266 = vst.msk [vmem:[#allocation2 + $0x10] sm:$0xff] %vm213_vm3, %v258_v0  ;;  %v106_v3 = vpop.f32.mrb[5].mxu0  ;;  %v1120_v4 = vpop.f32.mrb[5].mxu1 }
  0xe4   :  { %v1071_v6 = vpack.c.bf16 %v106_v3, %v106_v3  ;;  %v1109_v7 = vpop.f32.mrb[6].mxu0  ;;  %v261_v8 = vpop.f32.mrb[6].mxu1 }
  0xe5   :  { %v713_v5 = vld [vmem:[#allocation2 + $0x1] sm:$0xff]  ;;  %v705_v9 = vadd.f32 %v1419_v60, %v697_v1  ;;  %160 = vst.msk [vmem:[%s1635_s7 + $0x18] sm:$0xf] %vm153_vm4, %v1073_v2  ;;  %v1074_v11 = vpack.c.bf16 %v1109_v7, %v1109_v7  ;;  %v109_v12 = vpop.f32.mrb[7].mxu0  ;;  %v1121_v13 = vpop.f32.mrb[7].mxu1 }
  0xe6   :  { %v726_v10 = vmul.f32 %v1424_v62, %v713_v5  ;;  %267 = vst.msk [vmem:[#allocation2 + $0x18] sm:$0x3] %vm215_vm5, %v261_v8  ;;  %v742_v14 = vld [vmem:[#allocation2 + $0x2] sm:$0xff]  ;;  %v1072_v16 = vpack.c.bf16 %v109_v12, %v109_v12 }
  0xe7   :  { %158 = vst.msk [vmem:[%s1635_s7 + $0x10] sm:$0xf] %vm153_vm4, %v1071_v6  ;;  %161 = vst.msk [vmem:[%s1635_s7 + $0x1c] sm:$0xf] %vm153_vm4, %v1074_v11  ;;  %v755_v19 = vmul.f32 %v1438_v15, %v742_v14  ;;  %v1500_v6 = vld [vmem:[%s1636_s4 + $0x8] ss:$0 sm:$0xff] }
  0xe8   :  { %v734_v17 = vadd.f32 %v726_v10, %v705_v9  ;;  %159 = vst.msk [vmem:[%s1635_s7 + $0x14] sm:$0xf] %vm153_vm4, %v1072_v16 }
  0xea   :  { %v685_v20 = vld [vmem:[#allocation2 + $0x10] sm:$0xff]  ;;  %v309_v21 = vpop.f32.mrb[8].mxu0  ;;  %v360_v22 = vpop.f32.mrb[8].mxu1  ;;  %v763_v23 = vadd.f32 %v755_v19, %v734_v17 }
  0xeb   :  { %v698_v24 = vmul.f32 %v1410_v59, %v685_v20  ;;  %v784_v25 = vmul.f32 %v1451_v18, %v685_v20  ;;  %317 = vst.msk [vmem:[#allocation2 + $0x20] sm:$0xff] %vm213_vm3, %v309_v21  ;;  %368 = vst.msk [vmem:[#allocation2 + $0x30] sm:$0xff] %vm213_vm3, %v360_v22  ;;  %v1126_v27 = vpop.f32.mrb[9].mxu0  ;;  %v1132_v28 = vpop.f32.mrb[9].mxu1 }
  0xec   :  { %v312_v30 = vpop.f32.mrb[10].mxu0  ;;  %v363_v31 = vpop.f32.mrb[10].mxu1 }
  0xed   :  { %v714_v29 = vld [vmem:[#allocation2 + $0x11] sm:$0xff]  ;;  %v706_v32 = vadd.f32 %v1419_v60, %v698_v24  ;;  %v792_v33 = vadd.f32 %v784_v25, %v763_v23  ;;  %318 = vst.msk [vmem:[#allocation2 + $0x28] sm:$0x3] %vm215_vm5, %v312_v30  ;;  %369 = vst.msk [vmem:[#allocation2 + $0x38] sm:$0x3] %vm215_vm5, %v363_v31  ;;  %v1127_v37 = vpop.f32.mrb[11].mxu0 }
  0xee   :  { %v727_v34 = vmul.f32 %v1424_v62, %v714_v29  ;;  %v743_v35 = vld [vmem:[#allocation2 + $0x12] sm:$0xff]  ;;  %v1133_v38 = vpop.f32.mrb[11].mxu1  ;;  %v813_v39 = vmul.f32 %v1463_v26, %v714_v29 }
  0xef   :  { %v756_v41 = vmul.f32 %v1438_v15, %v743_v35  ;;  %v842_v43 = vmul.f32 %v1472_v36, %v743_v35 }
  0xf0   :  { %v735_v40 = vadd.f32 %v727_v34, %v706_v32  ;;  %v821_v42 = vadd.f32 %v813_v39, %v792_v33 }
  0xf2   :  { %v764_v45 = vadd.f32 %v756_v41, %v735_v40  ;;  %v850_v46 = vadd.f32 %v842_v43, %v821_v42  ;;  %v686_v47 = vld [vmem:[#allocation2 + $0x20] sm:$0xff]  ;;  %v687_v48 = vld [vmem:[#allocation2 + $0x30] sm:$0xff]  ;;  %v411_v49 = vpop.f32.mrb[12].mxu0  ;;  %v462_v50 = vpop.f32.mrb[12].mxu1 }
  0xf3   :  { %v699_v51 = vmul.f32 %v1410_v59, %v686_v47  ;;  %v785_v52 = vmul.f32 %v1451_v18, %v686_v47  ;;  %v871_v53 = vmul.f32 %v1482_v44, %v686_v47  ;;  %v700_v54 = vmul.f32 %v1410_v59, %v687_v48  ;;  %419 = vst.msk [vmem:[#allocation2 + $0x40] sm:$0xff] %vm213_vm3, %v411_v49  ;;  %v1138_v56 = vpop.f32.mrb[13].mxu0  ;;  %v1144_v57 = vpop.f32.mrb[13].mxu1 }
  0xf4   :  { %470 = vst.msk [vmem:[#allocation2 + $0x50] sm:$0xff] %vm213_vm3, %v462_v50  ;;  %v715_v58 = vld [vmem:[#allocation2 + $0x21] sm:$0xff]  ;;  %v716_v63 = vld [vmem:[#allocation2 + $0x31] sm:$0xff]  ;;  %v414_v0 = vpop.f32.mrb[14].mxu0  ;;  %v465_v1 = vpop.f32.mrb[14].mxu1  ;;  %v786_v10 = vmul.f32 %v1451_v18, %v687_v48  ;;  %v872_v11 = vmul.f32 %v1482_v44, %v687_v48 }
  0xf5   :  { %v744_v61 = vld [vmem:[#allocation2 + $0x22] sm:$0xff]  ;;  %v707_v2 = vadd.f32 %v1419_v60, %v699_v51  ;;  %v793_v3 = vadd.f32 %v785_v52, %v764_v45  ;;  %v879_v4 = vadd.f32 %v871_v53, %v850_v46  ;;  %v708_v5 = vadd.f32 %v1419_v60, %v700_v54  ;;  %v745_v7 = vld [vmem:[#allocation2 + $0x32] sm:$0xff]  ;;  %420 = vst.msk [vmem:[#allocation2 + $0x48] sm:$0x3] %vm215_vm5, %v414_v0  ;;  %v1139_v8 = vpop.f32.mrb[15].mxu0  ;;  %v1145_v9 = vpop.f32.mrb[15].mxu1 }
  0xf6   :  { %471 = vst.msk [vmem:[#allocation2 + $0x58] sm:$0x3] %vm215_vm5, %v465_v1  ;;  %v728_v12 = vmul.f32 %v1424_v62, %v715_v58  ;;  %v814_v13 = vmul.f32 %v1463_v26, %v715_v58  ;;  %v757_v14 = vmul.f32 %v1438_v15, %v744_v61  ;;  %v843_v16 = vmul.f32 %v1472_v36, %v744_v61 }
  0xf7   :  { %v900_v17 = vmul.f32 %v1491_v55, %v715_v58  ;;  %v729_v19 = vmul.f32 %v1424_v62, %v716_v63  ;;  %v929_v22 = vmul.f32 %v1500_v6, %v744_v61  ;;  %v758_v23 = vmul.f32 %v1438_v15, %v745_v7 }
  0xf8   :  { %v736_v20 = vadd.f32 %v728_v12, %v707_v2  ;;  %v822_v21 = vadd.f32 %v814_v13, %v793_v3  ;;  %v815_v27 = vmul.f32 %v1463_v26, %v716_v63  ;;  %v844_v28 = vmul.f32 %v1472_v36, %v745_v7 }
  0xf9   :  { %v908_v24 = vadd.f32 %v900_v17, %v879_v4  ;;  %v737_v25 = vadd.f32 %v729_v19, %v708_v5  ;;  %v901_v31 = vmul.f32 %v1491_v55, %v716_v63  ;;  %v930_v32 = vmul.f32 %v1500_v6, %v745_v7 }
  0xfa   :  { %v765_v29 = vadd.f32 %v757_v14, %v736_v20  ;;  %v851_v30 = vadd.f32 %v843_v16, %v822_v21  ;;  %v688_v33 = vld [vmem:[#allocation2 + $0x40] sm:$0xff]  ;;  %v513_v35 = vpop.f32.mrb[16].mxu0  ;;  %v564_v37 = vpop.f32.mrb[16].mxu1 }
  0xfb   :  { %v689_v34 = vld [vmem:[#allocation2 + $0x50] sm:$0xff]  ;;  %v1518_v38 = vadd.f32 %v929_v22, %v908_v24  ;;  %v766_v39 = vadd.f32 %v758_v23, %v737_v25  ;;  %v701_v40 = vmul.f32 %v1410_v59, %v688_v33  ;;  %v787_v41 = vmul.f32 %v1451_v18, %v688_v33  ;;  %521 = vst.msk [vmem:[#allocation2 + $0x60] sm:$0xff] %vm213_vm3, %v513_v35  ;;  %v1150_v42 = vpop.f32.mrb[17].mxu0  ;;  %v1156_v43 = vpop.f32.mrb[17].mxu1 }
  0xfc   :  { %572 = vst.msk [vmem:[#allocation2 + $0x70] sm:$0xff] %vm213_vm3, %v564_v37  ;;  %v794_v45 = vadd.f32 %v786_v10, %v765_v29  ;;  %v880_v46 = vadd.f32 %v872_v11, %v851_v30  ;;  %v873_v47 = vmul.f32 %v1482_v44, %v688_v33  ;;  %v702_v48 = vmul.f32 %v1410_v59, %v689_v34  ;;  %v717_v49 = vld [vmem:[#allocation2 + $0x41] sm:$0xff]  ;;  %v516_v51 = vpop.f32.mrb[18].mxu0  ;;  %v567_v52 = vpop.f32.mrb[18].mxu1 }
  0xfd   :  { %v746_v50 = vld [vmem:[#allocation2 + $0x42] sm:$0xff]  ;;  %v945_v53 = vsub.f32 0.0, %v1518_v38  ;;  %v709_v54 = vadd.f32 %v1419_v60, %v701_v40  ;;  %v795_v56 = vadd.f32 %v787_v41, %v766_v39  ;;  %v788_v57 = vmul.f32 %v1451_v18, %v689_v34  ;;  %522 = vst.msk [vmem:[#allocation2 + $0x68] sm:$0x3] %vm215_vm5, %v516_v51  ;;  %573 = vst.msk [vmem:[#allocation2 + $0x78] sm:$0x3] %vm215_vm5, %v567_v52 }
  0xfe   :  { %v1151_v58 = vpop.f32.mrb[19].mxu0  ;;  %v1157_v61 = vpop.f32.mrb[19].mxu1  ;;  %v823_v63 = vadd.f32 %v815_v27, %v794_v45  ;;  %v909_v0 = vadd.f32 %v901_v31, %v880_v46  ;;  %v710_v1 = vadd.f32 %v1419_v60, %v702_v48  ;;  %v874_v2 = vmul.f32 %v1482_v44, %v689_v34  ;;  %v718_v8 = vld [vmem:[#allocation2 + $0x51] sm:$0xff] }
  0xff   :  { %v953_v3 = vmul.f32 1.442695, %v945_v53  ;;  %v730_v4 = vmul.f32 %v1424_v62, %v717_v49  ;;  %v759_v5 = vmul.f32 %v1438_v15, %v746_v50  ;;  %v816_v7 = vmul.f32 %v1463_v26, %v717_v49  ;;  %v747_v9 = vld [vmem:[#allocation2 + $0x52] sm:$0xff] }
 0x100   :  { %v852_v10 = vadd.f32 %v844_v28, %v823_v63  ;;  %v1536_v11 = vadd.f32 %v930_v32, %v909_v0  ;;  %v845_v12 = vmul.f32 %v1472_v36, %v746_v50  ;;  %v902_v13 = vmul.f32 %v1491_v55, %v717_v49 }
 0x101   :  { %1173 = vpow2.f32 %v953_v3  ;;  %v738_v14 = vadd.f32 %v730_v4, %v709_v54  ;;  %v824_v16 = vadd.f32 %v816_v7, %v795_v56  ;;  %v931_v17 = vmul.f32 %v1500_v6, %v746_v50 }
 0x102   :  { %v946_v19 = vsub.f32 0.0, %v1536_v11  ;;  %v881_v20 = vadd.f32 %v873_v47, %v852_v10  ;;  %v731_v21 = vmul.f32 %v1424_v62, %v718_v8  ;;  %v760_v22 = vmul.f32 %v1438_v15, %v747_v9  ;;  %v690_v23 = vld [vmem:[#allocation2 + $0x60] sm:$0xff]  ;;  %v615_v24 = vpop.f32.mrb[20].mxu0  ;;  %v666_v25 = vpop.f32.mrb[20].mxu1 }
 0x103   :  { %v767_v27 = vadd.f32 %v759_v5, %v738_v14  ;;  %v853_v28 = vadd.f32 %v845_v12, %v824_v16  ;;  %v817_v29 = vmul.f32 %v1463_v26, %v718_v8  ;;  %v846_v30 = vmul.f32 %v1472_v36, %v747_v9  ;;  %623 = vst.msk [vmem:[#allocation2 + $0x80] sm:$0xff] %vm213_vm3, %v615_v24  ;;  %v1162_v31 = vpop.f32.mrb[21].mxu0  ;;  %v1168_v32 = vpop.f32.mrb[21].mxu1  ;;  %v691_v45 = vld [vmem:[#allocation2 + $0x70] sm:$0xff] }
 0x104   :  { %674 = vst.msk [vmem:[#allocation2 + $0x90] sm:$0xff] %vm213_vm3, %v666_v25  ;;  %v955_v33 = vmul.f32 1.442695, %v946_v19  ;;  %v910_v34 = vadd.f32 %v902_v13, %v881_v20  ;;  %v739_v35 = vadd.f32 %v731_v21, %v710_v1  ;;  %v903_v37 = vmul.f32 %v1491_v55, %v718_v8  ;;  %v618_v39 = vpop.f32.mrb[22].mxu0  ;;  %v669_v47 = vpop.f32.mrb[22].mxu1  ;;  %v719_v51 = vld [vmem:[#allocation2 + $0x61] sm:$0xff] }
 0x105   :  { %v796_v40 = vadd.f32 %v788_v57, %v767_v27  ;;  %v882_v41 = vadd.f32 %v874_v2, %v853_v28  ;;  %v932_v42 = vmul.f32 %v1500_v6, %v747_v9  ;;  %v703_v43 = vmul.f32 %v1410_v59, %v690_v23  ;;  %624 = vst.msk [vmem:[#allocation2 + $0x88] sm:$0x3] %vm215_vm5, %v618_v39  ;;  %v1163_v46 = vpop.f32.mrb[23].mxu0  ;;  %v1169_v52 = vpop.f32.mrb[23].mxu1  ;;  %v748_v58 = vld [vmem:[#allocation2 + $0x62] sm:$0xff]  ;;  %v720_v12 = vld [vmem:[#allocation2 + $0x71] sm:$0xff] }
 0x106   :  { %1175 = vpow2.f32 %v955_v33  ;;  %v1552_v48 = vadd.f32 %v931_v17, %v910_v34  ;;  %v768_v49 = vadd.f32 %v760_v22, %v739_v35  ;;  %v789_v50 = vmul.f32 %v1451_v18, %v690_v23  ;;  %675 = vst.msk [vmem:[#allocation2 + $0x98] sm:$0x3] %vm215_vm5, %v669_v47  ;;  %v749_v19 = vld [vmem:[#allocation2 + $0x72] sm:$0xff] }
 0x107   :  { %v825_v53 = vadd.f32 %v817_v29, %v796_v40  ;;  %v911_v54 = vadd.f32 %v903_v37, %v882_v41  ;;  %v711_v56 = vadd.f32 %v1419_v60, %v703_v43  ;;  %v875_v57 = vmul.f32 %v1482_v44, %v690_v23 }
 0x108   :  { %v947_v61 = vsub.f32 0.0, %v1552_v48  ;;  %v797_v63 = vadd.f32 %v789_v50, %v768_v49  ;;  %v704_v0 = vmul.f32 %v1410_v59, %v691_v45  ;;  %v790_v1 = vmul.f32 %v1451_v18, %v691_v45 }
 0x109   :  { %v854_v2 = vadd.f32 %v846_v30, %v825_v53  ;;  %v1561_v3 = vadd.f32 %v932_v42, %v911_v54  ;;  %v876_v4 = vmul.f32 %v1482_v44, %v691_v45  ;;  %v732_v5 = vmul.f32 %v1424_v62, %v719_v51 }
 0x10a   :  { %v957_v7 = vmul.f32 1.442695, %v947_v61  ;;  %v712_v8 = vadd.f32 %v1419_v60, %v704_v0  ;;  %v761_v9 = vmul.f32 %v1438_v15, %v748_v58  ;;  %v818_v10 = vmul.f32 %v1463_v26, %v719_v51  ;;  %v778_v33 = vld [vmem:[#allocation2 + $0x80] sm:$0xff] }
 0x10b   :  { %v1174_v13 = vpop.eup %1173  ;;  %v948_v59 = vsub.f32 0.0, %v1561_v3  ;;  %v883_v14 = vadd.f32 %v875_v57, %v854_v2  ;;  %v740_v16 = vadd.f32 %v732_v5, %v711_v56  ;;  %v847_v17 = vmul.f32 %v1472_v36, %v748_v58  ;;  %v865_v53 = vld [vmem:[#allocation2 + $0x90] sm:$0xff] }
 0x10c   :  { %v969_v20 = vadd.f32 1.0, %v1174_v13  ;;  %1177 = vpow2.f32 %v957_v7  ;;  %v826_v21 = vadd.f32 %v818_v10, %v797_v63  ;;  %v904_v22 = vmul.f32 %v1491_v55, %v719_v51  ;;  %v807_v40 = vld [vmem:[#allocation2 + $0x81] sm:$0xff] }
 0x10d   :  { %v959_v23 = vmul.f32 1.442695, %v948_v59  ;;  %v769_v60 = vadd.f32 %v761_v9, %v740_v16  ;;  %v933_v24 = vmul.f32 %v1500_v6, %v748_v58  ;;  %v733_v25 = vmul.f32 %v1424_v62, %v720_v12  ;;  %v836_v49 = vld [vmem:[#allocation2 + $0x82] sm:$0xff]  ;;  %v894_v7 = vld [vmem:[#allocation2 + $0x91] sm:$0xff] }
 0x10e   :  { %1179 = vrcp.f32 %v969_v20  ;;  %v855_v27 = vadd.f32 %v847_v17, %v826_v21  ;;  %v912_v28 = vadd.f32 %v904_v22, %v883_v14  ;;  %v762_v29 = vmul.f32 %v1438_v15, %v749_v19  ;;  %v923_v59 = vld [vmem:[#allocation2 + $0x92] sm:$0xff] }
 0x10f   :  { %1181 = vpow2.f32 %v959_v23  ;;  %v741_v30 = vadd.f32 %v733_v25, %v712_v8  ;;  %v798_v31 = vadd.f32 %v790_v1, %v769_v60  ;;  %v819_v32 = vmul.f32 %v1463_v26, %v720_v12 }
 0x110   :  { %v1176_v34 = vpop.eup %1175  ;;  %v1575_v35 = vadd.f32 %v933_v24, %v912_v28  ;;  %v884_v37 = vadd.f32 %v876_v4, %v855_v27  ;;  %v905_v39 = vmul.f32 %v1491_v55, %v720_v12  ;;  %v848_v43 = vmul.f32 %v1472_v36, %v749_v19 }
 0x111   :  { %v970_v41 = vadd.f32 1.0, %v1176_v34  ;;  %v770_v62 = vadd.f32 %v762_v29, %v741_v30  ;;  %v827_v42 = vadd.f32 %v819_v32, %v798_v31  ;;  %v934_v46 = vmul.f32 %v1500_v6, %v749_v19 }
 0x112   :  { %v949_v15 = vsub.f32 0.0, %v1575_v35  ;;  %v913_v45 = vadd.f32 %v905_v39, %v884_v37  ;;  %v791_v47 = vmul.f32 %v1451_v18, %v778_v33  ;;  %v877_v51 = vmul.f32 %v1482_v44, %v778_v33 }
 0x113   :  { %1183 = vrcp.f32 %v970_v41  ;;  %v856_v50 = vadd.f32 %v848_v43, %v827_v42  ;;  %v820_v52 = vmul.f32 %v1463_v26, %v807_v40  ;;  %v849_v61 = vmul.f32 %v1472_v36, %v836_v49 }
 0x114   :  { %v961_v54 = vmul.f32 1.442695, %v949_v15  ;;  %v1584_v56 = vadd.f32 %v934_v46, %v913_v45  ;;  %v799_v57 = vadd.f32 %v791_v47, %v770_v62  ;;  %v906_v63 = vmul.f32 %v1491_v55, %v807_v40 }
 0x115   :  { %v885_v58 = vadd.f32 %v877_v51, %v856_v50  ;;  %v878_v2 = vmul.f32 %v1482_v44, %v865_v53  ;;  %v935_v26 = vmul.f32 %v1500_v6, %v836_v49  ;;  %v907_v17 = vmul.f32 %v1491_v55, %v894_v7 }
 0x116   :  { %v1178_v0 = vpop.eup %1177  ;;  %1185 = vpow2.f32 %v961_v54  ;;  %v950_v18 = vsub.f32 0.0, %v1584_v56  ;;  %v828_v1 = vadd.f32 %v820_v52, %v799_v57  ;;  %v936_v20 = vmul.f32 %v1500_v6, %v923_v59 }
 0x117   :  { %v971_v4 = vadd.f32 1.0, %v1178_v0  ;;  %v914_v5 = vadd.f32 %v906_v63, %v885_v58 }
 0x118   :  { %v1180_v8 = vpop.eup %1179  ;;  %v963_v9 = vmul.f32 1.442695, %v950_v18  ;;  %v857_v10 = vadd.f32 %v849_v61, %v828_v1 }
 0x119   :  { %v1182_v12 = vpop.eup %1181  ;;  %v993_v36 = vmul.f32 %v1180_v8, %v1518_v38  ;;  %1187 = vrcp.f32 %v971_v4  ;;  %v943_v13 = vadd.f32 %v935_v26, %v914_v5 }
 0x11a   :  { %v972_v14 = vadd.f32 1.0, %v1182_v12  ;;  %1189 = vpow2.f32 %v963_v9  ;;  %v886_v16 = vadd.f32 %v878_v2, %v857_v10 }
 0x11b   :  { %1001 = vst.msk [vmem:[%s1638_s6] sm:$0xff] %vm213_vm3, %v993_v36  ;;  %v951_v44 = vsub.f32 0.0, %v943_v13 }
 0x11c   :  { %1191 = vrcp.f32 %v972_v14  ;;  %v915_v19 = vadd.f32 %v907_v17, %v886_v16 }
 0x11d   :  { %v1184_v21 = vpop.eup %1183  ;;  %v965_v38 = vmul.f32 1.442695, %v951_v44 }
 0x11e   :  { %v994_v22 = vmul.f32 %v1184_v21, %v1536_v11  ;;  %v944_v23 = vadd.f32 %v936_v20, %v915_v19 }
 0x11f   :  { %1193 = vpow2.f32 %v965_v38 }
 0x120   :  { %v1186_v60 = vpop.eup %1185  ;;  %1002 = vst.msk [vmem:[%s1638_s6 + $0x8] sm:$0xff] %vm213_vm3, %v994_v22  ;;  %v952_v55 = vsub.f32 0.0, %v944_v23 }
 0x121   :  { %v973_v24 = vadd.f32 1.0, %v1186_v60 }
 0x122   :  { %v967_v25 = vmul.f32 1.442695, %v952_v55 }
 0x123   :  { %v1188_v27 = vpop.eup %1187  ;;  %1195 = vrcp.f32 %v973_v24 }
 0x124   :  { %v1190_v28 = vpop.eup %1189  ;;  %v995_v6 = vmul.f32 %v1188_v27, %v1552_v48  ;;  %1197 = vpow2.f32 %v967_v25 }
 0x125   :  { %v974_v29 = vadd.f32 1.0, %v1190_v28 }
 0x126   :  { %v1192_v30 = vpop.eup %1191  ;;  %1003 = vst.msk [vmem:[%s1638_s6 + $0x10] sm:$0xff] %vm213_vm3, %v995_v6 }
 0x127   :  { %v996_v11 = vmul.f32 %v1192_v30, %v1561_v3  ;;  %1199 = vrcp.f32 %v974_v29 }
 0x129   :  { %v1194_v31 = vpop.eup %1193  ;;  %1004 = vst.msk [vmem:[%s1638_s6 + $0x18] sm:$0xff] %vm213_vm3, %v996_v11 }
 0x12a   :  { %v975_v32 = vadd.f32 1.0, %v1194_v31 }
 0x12c   :  { %1201 = vrcp.f32 %v975_v32 }
 0x12d   :  { %v1196_v48 = vpop.eup %1195 }
 0x12e   :  { %v1198_v33 = vpop.eup %1197  ;;  %v997_v34 = vmul.f32 %v1196_v48, %v1575_v35 }
 0x12f   :  { %v976_v37 = vadd.f32 1.0, %v1198_v33 }
 0x130   :  { %1005 = vst.msk [vmem:[%s1638_s6 + $0x20] sm:$0xff] %vm213_vm3, %v997_v34 }
 0x131   :  { %v1200_v3 = vpop.eup %1199  ;;  %1203 = vrcp.f32 %v976_v37 }
 0x132   :  { %v998_v39 = vmul.f32 %v1200_v3, %v1584_v56 }
 0x134   :  { %1006 = vst.msk [vmem:[%s1638_s6 + $0x28] sm:$0xff] %vm213_vm3, %v998_v39 }
 0x136   :  { %v1202_v40 = vpop.eup %1201 }
 0x137   :  { %v999_v41 = vmul.f32 %v1202_v40, %v943_v13 }
 0x139   :  { %1007 = vst.msk [vmem:[%s1638_s6 + $0x30] sm:$0xff] %vm213_vm3, %v999_v41 }
 0x13b   :  { %v1204_v35 = vpop.eup %1203 }
 0x13c   :  { %v1000_v62 = vmul.f32 %v1204_v35, %v944_v23 }
 0x13e   :  { %1008 = vst.msk [vmem:[%s1638_s6 + $0x38] sm:$0xff] %vm213_vm3, %v1000_v62 }

// kernel: _lambda_.5
= control target key start
LH: loop header
LB: loop body
LE: loop exit
PB: predicated region body
PF: predicated region fallthrough
CT: control target
= control target key end

     0   :  { %vm108_vm0 = vcmask 523264   ;;  %vm444_vm1 = vcmask 1045504   ;;  %vm431_vm2 = vcmask 97280   ;;  %vm513_vm3 = vcmask 64512   ;;  %s1471_s0 = inlined_call_operand.vmem [shape: f32[4,72,12], index: 0, kind: input, shape index: {}]   ;;  %s1472_s2 = inlined_call_operand.vmem [shape: bf16[64,64], index: 2, kind: input, shape index: {}]   ;;  %s1473_s3 = inlined_call_operand.vmem [shape: bf16[64,64], index: 3, kind: input, shape index: {}]   ;;  %s1474_s4 = inlined_call_operand.vmem [shape: bf16[64,64], index: 4, kind: input, shape index: {}]   ;;  %s1475_s5 = inlined_call_operand.vmem [shape: bf16[12,8], index: 5, kind: input, shape index: {}]   ;;  %s1476_s8 = inlined_call_operand.vmem [shape: bf16[8,4], index: 8, kind: input, shape index: {}]   ;;  %s1477_s1 = inlined_call_operand.vmem [shape: bf16[64,8], index: 1, kind: input, shape index: {}]   ;;  %s1478_s6 = inlined_call_operand.vmem [shape: f32[1,8], index: 6, kind: input, shape index: {}]   ;;  %s1479_s7 = inlined_call_operand.vmem [shape: f32[1,8], index: 7, kind: input, shape index: {}]   ;;  %s1480_s9 = inlined_call_operand.vmem [shape: f32[64,4], index: 9, kind: output, shape index: {}]  }
   0x1   :  { %v836_v0 = vld [vmem:[%s1471_s0 + $0x90] sm:$0xff]  ;;  %v837_v1 = vld [vmem:[%s1471_s0 + $0x98] sm:$0xff]  ;;  %v838_v2 = vld [vmem:[%s1471_s0 + $0xa0] sm:$0xff]  ;;  %vm746_vm4 = vcmask 1043456   ;;  %vm815_vm5 = vcmask 31744  }
   0x2   :  { %v63_v3 = vpack.c.bf16 %v837_v1, %v836_v0  ;;  %v839_v4 = vld [vmem:[%s1471_s0 + $0xa8] sm:$0xff]  ;;  %v840_v6 = vld [vmem:[%s1471_s0 + $0xb0] sm:$0xff]  ;;  %v841_v7 = vld [vmem:[%s1471_s0 + $0xb8] sm:$0xff] }
   0x3   :  { %v64_v5 = vpack.c.bf16 %v839_v4, %v838_v2  ;;  %v1042_v8 = vld [vmem:[%s1472_s2] sm:$0xff]   ;;  %v65_v9 = vpack.c.bf16 %v841_v7, %v840_v6  ;;  %v843_v11 = vld [vmem:[%s1471_s0 + $0xc8] sm:$0xff]  ;;  %v844_v12 = vld [vmem:[%s1471_s0 + $0xd8] sm:$0xff] }
   0x4   :  { %940 = vmatprep.subr.bf16.mxu0 %v63_v3  ;;  %v842_v10 = vld [vmem:[%s1471_s0 + $0xc0] sm:$0xff]  ;;  %948 = vmatprep.mubr.msk.bf16.mxu0 %vm108_vm0, %v1042_v8  ;;  %v828_v14 = vld [vmem:[%s1471_s0 + $0x48] sm:$0xff]  ;;  %v829_v15 = vld [vmem:[%s1471_s0 + $0x50] sm:$0xff] }
   0x5   :  { %941 = vmatpush3.bf16.msra.mxu0 %v63_v3  ;;  %v66_v13 = vpack.c.bf16 %v843_v11, %v842_v10  ;;  %v845_v16 = vld [vmem:[%s1471_s0 + $0xe0] sm:$0xff]  ;;  %v846_v18 = vld [vmem:[%s1471_s0 + $0xe8] sm:$0xff]  ;;  %v847_v19 = vld [vmem:[%s1471_s0 + $0xf0] sm:$0xff]  ;;  %v50_v23 = vpack.c.bf16 %v829_v15, %v828_v14 }
   0x6   :  { %942 = vmatprep.subr.bf16.mxu0 %v64_v5  ;;  %v76_v17 = vpack.c.bf16 %v845_v16, %v844_v12  ;;  %v77_v20 = vpack.c.bf16 %v847_v19, %v846_v18  ;;  %v848_v21 = vld [vmem:[%s1471_s0 + $0xf8] sm:$0xff]  ;;  %v1043_v22 = vld [vmem:[%s1472_s2 + $0x8] sm:$0xff]   ;;  %v831_v25 = vld [vmem:[%s1471_s0 + $0x60] sm:$0xff] }
   0x7   :  { %v830_v24 = vld [vmem:[%s1471_s0 + $0x58] sm:$0xff]  ;;  %v849_v26 = vld [vmem:[%s1471_s0 + $0x100] sm:$0xff]  ;;  %v1044_v27 = vld [vmem:[%s1472_s2 + $0x10] sm:$0xff]  }
   0x8   :  { %1008 = vmatprep.subr.bf16.mxu1 %v76_v17  ;;  %v78_v28 = vpack.c.bf16 %v849_v26, %v848_v21  ;;  %v850_v29 = vld [vmem:[%s1471_s0 + $0x108] sm:$0xff]  ;;  %v851_v30 = vld [vmem:[%s1471_s0 + $0x110] sm:$0xff]  ;;  %v51_v32 = vpack.c.bf16 %v831_v25, %v830_v24  ;;  %v834_v37 = vld [vmem:[%s1471_s0 + $0x78] sm:$0xff] }
   0x9   :  { %943 = vmatpush3.bf16.msra.mxu0 %v64_v5  ;;  %1012 = vmatpush3.bf16.msra.mxu1 %v76_v17  ;;  %v1050_v31 = vld [vmem:[%s1474_s4 + $0x10] sm:$0xff]   ;;  %v832_v33 = vld [vmem:[%s1471_s0 + $0x68] sm:$0xff]  ;;  %v79_v35 = vpack.c.bf16 %v851_v30, %v850_v29  ;;  %v835_v38 = vld [vmem:[%s1471_s0 + $0x80] sm:$0xff] }
   0xa   :  { %944 = vmatprep.subr.bf16.mxu0 %v65_v9  ;;  %1009 = vmatprep.subr.bf16.mxu1 %v77_v20  ;;  %v833_v34 = vld [vmem:[%s1471_s0 + $0x70] sm:$0xff]  ;;  %v1045_v39 = vld [vmem:[%s1472_s2 + $0x18] sm:$0xff]   ;;  %v1046_v40 = vld [vmem:[%s1473_s3] sm:$0xff]   ;;  %v53_v41 = vpack.c.bf16 %v835_v38, %v834_v37 }
   0xb   :  { %984 = vmatprep.mubr.msk.bf16.mxu1 %vm108_vm0, %v1050_v31  ;;  %v52_v36 = vpack.c.bf16 %v833_v34, %v832_v33  ;;  %v1051_v42 = vld [vmem:[%s1474_s4 + $0x18] sm:$0xff]   ;;  %v1047_v43 = vld [vmem:[%s1473_s3 + $0x8] sm:$0xff]   ;;  %v1048_v44 = vld [vmem:[%s1473_s3 + $0x10] sm:$0xff]  }
   0xc   :  { %v1049_v45 = vld [vmem:[%s1473_s3 + $0x18] sm:$0xff]   ;;  %v1052_v46 = vld [vmem:[%s1474_s4] sm:$0xff]   ;;  %v1053_v47 = vld [vmem:[%s1474_s4 + $0x8] sm:$0xff]  }
   0xd   :  { %945 = vmatpush3.bf16.msra.mxu0 %v65_v9  ;;  %1013 = vmatpush3.bf16.msra.mxu1 %v77_v20  ;;  %v1054_v48 = vld [vmem:[%s1475_s5] sm:$0x3f]   ;;  %v39_v54 = vld [vmem:[%s1471_s0 + $0x30] sm:$0xff]  ;;  %v40_v57 = vld [vmem:[%s1471_s0 + $0x38] sm:$0xff] }
   0xe   :  { %946 = vmatprep.subr.bf16.mxu0 %v66_v13  ;;  %1010 = vmatprep.subr.bf16.mxu1 %v78_v28  ;;  %v446_v49 = vsel %vm444_vm1, %v1054_v48, 0  ;;  %v37_v55 = vld [vmem:[%s1471_s0 + $0x20] sm:$0xff]  ;;  %v38_v60 = vld [vmem:[%s1471_s0 + $0x28] sm:$0xff]  ;;  %v35_v8 = vld [vmem:[%s1471_s0 + $0x10] sm:$0xff] }
   0xf   :  { %v36_v10 = vld [vmem:[%s1471_s0 + $0x18] sm:$0xff]  ;;  %v33_v11 = vld [vmem:[%s1471_s0] sm:$0xff] }
  0x11   :  { %947 = vmatpush3.bf16.msra.mxu0 %v66_v13  ;;  %1014 = vmatpush3.bf16.msra.mxu1 %v78_v28  ;;  %v34_v13 = vld [vmem:[%s1471_s0 + $0x8] sm:$0xff] }
  0x12   :  { %956 = vmatprep.subr.bf16.mxu0 %v50_v23  ;;  %1011 = vmatprep.subr.bf16.mxu1 %v79_v35 }
  0x14   :  { %949 = vmatmul.mubr.msk.bf16.vlgmr.msra.gmra.mrb[0].mxu0 %vm108_vm0, %v1043_v22 }
  0x15   :  { %957 = vmatpush3.bf16.msra.mxu0 %v50_v23  ;;  %952 = vmatprep.mubr.msk.bf16.mxu0 %vm108_vm0, %v1044_v27 }
  0x16   :  { %958 = vmatprep.subr.bf16.mxu0 %v51_v32  ;;  %1015 = vmatpush3.bf16.msra.mxu1 %v79_v35 }
  0x17   :  { %1040 = vmatprep.subr.msk.bf16.mxu1 %vm444_vm1, %v1054_v48 }
  0x19   :  { %959 = vmatpush3.bf16.msra.mxu0 %v51_v32  ;;  %985 = vmatmul.mubr.msk.bf16.vlgmr.msra.gmra.mrb[0].mxu1 %vm108_vm0, %v1051_v42 }
  0x1a   :  { %960 = vmatprep.subr.bf16.mxu0 %v52_v36  ;;  %989 = vmatpush3.bf16.msra.mxu1 %v446_v49 }
  0x1c   :  { %953 = vmatmul.mubr.msk.bf16.gmra.mrb[4].mxu0 %vm108_vm0, %v1045_v39 }
  0x1d   :  { %961 = vmatpush3.bf16.msra.mxu0 %v52_v36  ;;  %964 = vmatprep.mubr.msk.bf16.mxu0 %vm108_vm0, %v1046_v40 }
  0x1e   :  { %962 = vmatprep.subr.bf16.mxu0 %v53_v41 }
  0x21   :  { %963 = vmatpush3.bf16.msra.mxu0 %v53_v41 }
  0x22   :  { %972 = vmatprep.subr.bf16.mxu0 %v76_v17 }
  0x24   :  { %965 = vmatmul.mubr.msk.bf16.vlgmr.msra.gmra.mrb[0].mxu0 %vm108_vm0, %v1047_v43 }
  0x25   :  { %973 = vmatpush3.bf16.msra.mxu0 %v76_v17  ;;  %968 = vmatprep.mubr.msk.bf16.mxu0 %vm108_vm0, %v1048_v44 }
  0x26   :  { %974 = vmatprep.subr.bf16.mxu0 %v77_v20 }
  0x29   :  { %975 = vmatpush3.bf16.msra.mxu0 %v77_v20 }
  0x2a   :  { %976 = vmatprep.subr.bf16.mxu0 %v78_v28 }
  0x2c   :  { %969 = vmatmul.mubr.msk.bf16.gmra.mrb[4].mxu0 %vm108_vm0, %v1049_v45 }
  0x2d   :  { %977 = vmatpush3.bf16.msra.mxu0 %v78_v28  ;;  %980 = vmatprep.mubr.msk.bf16.mxu0 %vm108_vm0, %v1052_v46 }
  0x2e   :  { %978 = vmatprep.subr.bf16.mxu0 %v79_v35 }
  0x31   :  { %979 = vmatpush3.bf16.msra.mxu0 %v79_v35 }
  0x34   :  { %981 = vmatmul.mubr.msk.bf16.vlgmr.msra.gmra.mrb[0].mxu0 %vm108_vm0, %v1053_v47 }
  0xec   :  { %v986_v50 = vpop.f32.mrb[0].mxu1 }
  0xed   :  { %v397_v51 = vpop.f32.mrb[1].mxu1 }
  0xee   :  { %v987_v52 = vpop.f32.mrb[2].mxu1 }
  0xef   :  { %v400_v53 = vpop.f32.mrb[3].mxu1 }
  0xff   :  { %v970_v56 = vpop.f32.mrb[4].mxu0 }
 0x100   :  { %v1020_v58 = vadd.f32 %v970_v56, %v39_v54  ;;  %v284_v59 = vpop.f32.mrb[5].mxu0 }
 0x101   :  { %v1022_v61 = vadd.f32 %v284_v59, %v37_v55  ;;  %v971_v62 = vpop.f32.mrb[6].mxu0 }
 0x102   :  { %v1024_v63 = vadd.f32 %v971_v62, %v40_v57  ;;  %v1021_v0 = vadd.f32 %v1020_v58, %v986_v50  ;;  %v287_v1 = vpop.f32.mrb[7].mxu0 }
 0x103   :  { %v1026_v2 = vadd.f32 %v287_v1, %v38_v60  ;;  %v1023_v3 = vadd.f32 %v1022_v61, %v397_v51 }
 0x104   :  { %v1025_v4 = vadd.f32 %v1024_v63, %v987_v52 }
 0x105   :  { %v1027_v5 = vadd.f32 %v1026_v2, %v400_v53 }
 0x106   :  { %v423_v6 = vpack.c.bf16 %v1025_v4, %v1021_v0 }
 0x107   :  { %v422_v7 = vpack.c.bf16 %v1027_v5, %v1023_v3  ;;  %v982_v9 = vpop.f32.mrb[0].mxu0 }
 0x108   :  { %v381_v12 = vpop.f32.mrb[1].mxu0  ;;  %v1016_v15 = vadd.f32 %v982_v9, %v35_v8 }
 0x109   :  { %v983_v14 = vpop.f32.mrb[2].mxu0  ;;  %v1017_v18 = vadd.f32 %v381_v12, %v33_v11 }
 0x10a   :  { %v1018_v16 = vadd.f32 %v983_v14, %v36_v10  ;;  %v384_v17 = vpop.f32.mrb[3].mxu0  ;;  %v733_v14 = vld [vmem:[%s1476_s8] sm:$0xf] }
 0x10b   :  { %v1019_v19 = vadd.f32 %v384_v17, %v34_v13  ;;  %1041 = vmatprep.subr.msk.bf16.mxu1 %vm746_vm4, %v733_v14 }
 0x10c   :  { %v421_v20 = vpack.c.bf16 %v1018_v16, %v1016_v15  ;;  %v748_v15 = vsel %vm746_vm4, %v733_v14, 0  ;;  %v1354_v16 = vld [vmem:[%s1477_s1] sm:$0xff]  }
 0x10d   :  { %v420_v21 = vpack.c.bf16 %v1019_v19, %v1017_v18  ;;  %v889_v17 = vunpack.c.l.bf16 %v1354_v16  ;;  %v1360_v18 = vld [vmem:[%s1477_s1 + $0x8] sm:$0xff]   ;;  %v890_v19 = vunpack.c.h.bf16 %v1354_v16 }
 0x10f   :  { %990 = vmatprep.mubr.msk.bf16.mxu1 %vm431_vm2, %v420_v21  ;;  %v665_v21 = vsub.f32 0.0, %v889_v17 }
 0x110   :  { %991 = vmatmul.mubr.msk.bf16.vlgmr.msra.gmra.mrb[4].mxu1 %vm431_vm2, %v421_v20  ;;  %v893_v20 = vunpack.c.l.bf16 %v1360_v18 }
 0x111   :  { %994 = vmatprep.mubr.msk.bf16.mxu1 %vm431_vm2, %v422_v7  ;;  %999 = vmatpush3.bf16.msra.mxu1 %v748_v15 }
 0x118   :  { %995 = vmatmul.mubr.msk.bf16.gmra.mrb[8].mxu1 %vm431_vm2, %v423_v6 }
 0x1e3   :  { %v992_v22 = vpop.f32.mrb[4].mxu1 }
 0x1e4   :  { %v482_v23 = vpop.f32.mrb[5].mxu1  ;;  %v520_v24 = vsel %vm513_vm3, %v992_v22, 0.0 }
 0x1e5   :  { %521 = vadd.xlane.f32.xlu1 %v520_v24  ;;  %v993_v25 = vpop.f32.mrb[6].mxu1  ;;  %v514_v26 = vsel %vm513_vm3, %v482_v23, 0.0  ;;  %v1372_v24 = vld [vmem:[%s1477_s1 + $0x10] sm:$0xff]  }
 0x1e6   :  { %515 = vadd.xlane.f32.xlu0 %v514_v26  ;;  %v485_v27 = vpop.f32.mrb[7].mxu1  ;;  %v523_v28 = vsel %vm513_vm3, %v993_v25, 0.0  ;;  %v673_v26 = vmul.f32 1.442695, %v665_v21 }
 0x1e7   :  { %v517_v29 = vsel %vm513_vm3, %v485_v27, 0.0 }
 0x1e8   :  { %1055 = vpow2.f32 %v673_v26 }
 0x1e9   :  { %524 = vadd.xlane.f32.xlu1 %v523_v28 }
 0x1ea   :  { %518 = vadd.xlane.f32.xlu0 %v517_v29 }
 0x1eb   :  { %v996_v30 = vpop.f32.mrb[8].mxu1 }
 0x1ec   :  { %v498_v31 = vpop.f32.mrb[9].mxu1  ;;  %v532_v36 = vsel %vm513_vm3, %v996_v30, 0.0 }
 0x1ed   :  { %v997_v32 = vpop.f32.mrb[10].mxu1  ;;  %v526_v33 = vsel %vm513_vm3, %v498_v31, 0.0 }
 0x1ee   :  { %527 = vadd.xlane.f32.xlu0 %v526_v33  ;;  %v501_v34 = vpop.f32.mrb[11].mxu1  ;;  %v535_v37 = vsel %vm513_vm3, %v997_v32, 0.0 }
 0x1ef   :  { %v529_v35 = vsel %vm513_vm3, %v501_v34, 0.0 }
 0x1f0   :  { %530 = vadd.xlane.f32.xlu1 %v529_v35 }
 0x1f2   :  { %533 = vadd.xlane.f32.xlu0 %v532_v36 }
 0x1f4   :  { %536 = vadd.xlane.f32.xlu1 %v535_v37 }
 0x272   :  { %v522_v38 = vpop.xlane.xlu1 %521 }
 0x273   :  { %v541_v39 = vmul.f32 0.125, %v522_v38  ;;  %v516_v40 = vpop.xlane.xlu0 %515 }
 0x274   :  { %v539_v41 = vmul.f32 0.125, %v516_v40 }
 0x275   :  { %v1308_v42 = vsub.f32 %v992_v22, %v541_v39  ;;  %v894_v22 = vunpack.c.h.bf16 %v1360_v18 }
 0x276   :  { %v1310_v43 = vsub.f32 %v482_v23, %v539_v41  ;;  %v525_v44 = vpop.xlane.xlu1 %524  ;;  %v666_v23 = vsub.f32 0.0, %v890_v19 }
 0x277   :  { %v542_v45 = vmul.f32 0.125, %v525_v44  ;;  %v519_v46 = vpop.xlane.xlu0 %518  ;;  %v557_v52 = vmul.f32 %v1308_v42, %v1308_v42  ;;  %v668_v28 = vsub.f32 0.0, %v894_v22 }
 0x278   :  { %v540_v47 = vmul.f32 0.125, %v519_v46  ;;  %v555_v48 = vmul.f32 %v1310_v43, %v1310_v43  ;;  %v675_v29 = vmul.f32 1.442695, %v666_v23  ;;  %v1056_v46 = vpop.eup %1055 }
 0x279   :  { %v1314_v49 = vsub.f32 %v993_v25, %v542_v45  ;;  %v569_v60 = vsel %vm513_vm3, %v557_v52, 0.0  ;;  %v667_v25 = vsub.f32 0.0, %v893_v20  ;;  %v679_v35 = vmul.f32 1.442695, %v668_v28 }
 0x27a   :  { %v1316_v50 = vsub.f32 %v485_v27, %v540_v47  ;;  %v563_v51 = vsel %vm513_vm3, %v555_v48, 0.0  ;;  %v897_v27 = vunpack.c.l.bf16 %v1372_v24  ;;  %1057 = vpow2.f32 %v675_v29  ;;  %v1398_v29 = vld [vmem:[%s1478_s6] ss:$0 sm:$0xff] }
 0x27b   :  { %564 = vadd.xlane.f32.xlu0 %v563_v51  ;;  %v528_v53 = vpop.xlane.xlu0 %527  ;;  %v558_v57 = vmul.f32 %v1314_v49, %v1314_v49 }
 0x27c   :  { %v543_v54 = vmul.f32 0.125, %v528_v53  ;;  %v556_v55 = vmul.f32 %v1316_v50, %v1316_v50  ;;  %v669_v33 = vsub.f32 0.0, %v897_v27  ;;  %v689_v53 = vadd.f32 1.0, %v1056_v46 }
 0x27d   :  { %v531_v56 = vpop.xlane.xlu1 %530  ;;  %v572_v3 = vsel %vm513_vm3, %v558_v57, 0.0 }
 0x27e   :  { %v1325_v58 = vsub.f32 %v498_v31, %v543_v54  ;;  %v544_v59 = vmul.f32 0.125, %v531_v56  ;;  %v566_v61 = vsel %vm513_vm3, %v556_v55, 0.0  ;;  %v1383_v31 = vld [vmem:[%s1477_s1 + $0x18] sm:$0xff]   ;;  %v681_v38 = vmul.f32 1.442695, %v669_v33 }
 0x27f   :  { %570 = vadd.xlane.f32.xlu0 %v569_v60  ;;  %v534_v62 = vpop.xlane.xlu0 %533  ;;  %567 = vadd.xlane.f32.xlu1 %v566_v61  ;;  %v902_v37 = vunpack.c.h.bf16 %v1383_v31 }
 0x280   :  { %v1329_v63 = vsub.f32 %v501_v34, %v544_v59  ;;  %v545_v0 = vmul.f32 0.125, %v534_v62  ;;  %v559_v1 = vmul.f32 %v1325_v58, %v1325_v58  ;;  %v901_v34 = vunpack.c.l.bf16 %v1383_v31 }
 0x281   :  { %v537_v2 = vpop.xlane.xlu1 %536  ;;  %v672_v41 = vsub.f32 0.0, %v902_v37 }
 0x282   :  { %v1334_v4 = vsub.f32 %v996_v30, %v545_v0  ;;  %v546_v5 = vmul.f32 0.125, %v537_v2  ;;  %v575_v6 = vsel %vm513_vm3, %v559_v1, 0.0  ;;  %v560_v7 = vmul.f32 %v1329_v63, %v1329_v63 }
 0x283   :  { %576 = vadd.xlane.f32.xlu0 %v575_v6  ;;  %573 = vadd.xlane.f32.xlu1 %v572_v3  ;;  %v898_v30 = vunpack.c.h.bf16 %v1372_v24  ;;  %v671_v39 = vsub.f32 0.0, %v901_v34  ;;  %v687_v45 = vmul.f32 1.442695, %v672_v41 }
 0x284   :  { %v1339_v8 = vsub.f32 %v997_v32, %v546_v5  ;;  %v561_v9 = vmul.f32 %v1334_v4, %v1334_v4  ;;  %v578_v11 = vsel %vm513_vm3, %v560_v7, 0.0  ;;  %v677_v32 = vmul.f32 1.442695, %v667_v25  ;;  %v1058_v48 = vpop.eup %1057 }
 0x285   :  { %v670_v36 = vsub.f32 0.0, %v898_v30  ;;  %v685_v44 = vmul.f32 1.442695, %v671_v39  ;;  %v690_v57 = vadd.f32 1.0, %v1058_v48  ;;  %v882_v48 = vld [vmem:[%s1479_s7] ss:$0 sm:$0xff] }
 0x286   :  { %v581_v10 = vsel %vm513_vm3, %v561_v9, 0.0  ;;  %v562_v12 = vmul.f32 %v1339_v8, %v1339_v8  ;;  %1059 = vpow2.f32 %v677_v32 }
 0x287   :  { %582 = vadd.xlane.f32.xlu0 %v581_v10  ;;  %579 = vadd.xlane.f32.xlu1 %v578_v11  ;;  %1061 = vpow2.f32 %v679_v35  ;;  %v683_v40 = vmul.f32 1.442695, %v670_v36 }
 0x288   :  { %v584_v13 = vsel %vm513_vm3, %v562_v12, 0.0  ;;  %1063 = vpow2.f32 %v681_v38 }
 0x289   :  { %1065 = vpow2.f32 %v683_v40 }
 0x28a   :  { %1067 = vpow2.f32 %v685_v44 }
 0x28b   :  { %585 = vadd.xlane.f32.xlu1 %v584_v13  ;;  %1069 = vpow2.f32 %v687_v45 }
 0x290   :  { %v1060_v54 = vpop.eup %1059 }
 0x291   :  { %v1062_v59 = vpop.eup %1061  ;;  %v691_v62 = vadd.f32 1.0, %v1060_v54 }
 0x292   :  { %v1064_v2 = vpop.eup %1063  ;;  %v692_v5 = vadd.f32 1.0, %v1062_v59 }
 0x293   :  { %v1066_v7 = vpop.eup %1065  ;;  %v693_v13 = vadd.f32 1.0, %v1064_v2 }
 0x294   :  { %v1068_v14 = vpop.eup %1067  ;;  %v694_v23 = vadd.f32 1.0, %v1066_v7 }
 0x295   :  { %v1070_v25 = vpop.eup %1069  ;;  %v695_v36 = vadd.f32 1.0, %v1068_v14 }
 0x296   :  { %v696_v40 = vadd.f32 1.0, %v1070_v25 }
 0x308   :  { %v565_v47 = vpop.xlane.xlu0 %564 }
 0x309   :  { %v587_v51 = vmul.f32 0.125, %v565_v47 }
 0x30b   :  { %v595_v52 = vadd.f32 1e-05, %v587_v51 }
 0x30c   :  { %v571_v55 = vpop.xlane.xlu0 %570  ;;  %v568_v56 = vpop.xlane.xlu1 %567 }
 0x30d   :  { %1071 = vrsqrt.f32 %v595_v52  ;;  %v589_v60 = vmul.f32 0.125, %v571_v55  ;;  %v588_v61 = vmul.f32 0.125, %v568_v56 }
 0x30e   :  { %1073 = vrcp.f32 %v689_v53 }
 0x30f   :  { %v597_v0 = vadd.f32 1e-05, %v589_v60  ;;  %v596_v1 = vadd.f32 1e-05, %v588_v61  ;;  %1075 = vrcp.f32 %v690_v57 }
 0x310   :  { %v577_v3 = vpop.xlane.xlu0 %576  ;;  %v574_v6 = vpop.xlane.xlu1 %573 }
 0x311   :  { %1077 = vrsqrt.f32 %v597_v0  ;;  %v591_v9 = vmul.f32 0.125, %v577_v3  ;;  %v590_v10 = vmul.f32 0.125, %v574_v6 }
 0x312   :  { %1079 = vrsqrt.f32 %v596_v1 }
 0x313   :  { %1081 = vrcp.f32 %v691_v62  ;;  %v599_v11 = vadd.f32 1e-05, %v591_v9  ;;  %v598_v12 = vadd.f32 1e-05, %v590_v10 }
 0x314   :  { %1083 = vrcp.f32 %v692_v5  ;;  %v583_v15 = vpop.xlane.xlu0 %582  ;;  %v580_v21 = vpop.xlane.xlu1 %579 }
 0x315   :  { %1085 = vrsqrt.f32 %v599_v11  ;;  %v593_v26 = vmul.f32 0.125, %v583_v15  ;;  %v592_v28 = vmul.f32 0.125, %v580_v21 }
 0x316   :  { %1087 = vrsqrt.f32 %v598_v12 }
 0x317   :  { %v1072_v32 = vpop.eup %1071  ;;  %v601_v33 = vadd.f32 1e-05, %v593_v26  ;;  %v600_v35 = vadd.f32 1e-05, %v592_v28  ;;  %1089 = vrcp.f32 %v693_v13 }
 0x318   :  { %v611_v38 = vmul.f32 %v1072_v32, %v1310_v43  ;;  %v586_v39 = vpop.xlane.xlu1 %585  ;;  %1091 = vrcp.f32 %v694_v23  ;;  %v1074_v41 = vpop.eup %1073 }
 0x319   :  { %1093 = vrsqrt.f32 %v601_v33  ;;  %v594_v44 = vmul.f32 0.125, %v586_v39  ;;  %v1076_v45 = vpop.eup %1075  ;;  %v713_v57 = vmul.f32 %v1074_v41, %v889_v17 }
 0x31a   :  { %1095 = vrsqrt.f32 %v600_v35  ;;  %v626_v46 = vmul.f32 %v1398_v29, %v611_v38  ;;  %v714_v62 = vmul.f32 %v1076_v45, %v890_v19 }
 0x31b   :  { %v1078_v47 = vpop.eup %1077  ;;  %v602_v51 = vadd.f32 1e-05, %v594_v44  ;;  %1097 = vrcp.f32 %v695_v36 }
 0x31c   :  { %v1080_v52 = vpop.eup %1079  ;;  %v613_v43 = vmul.f32 %v1078_v47, %v1308_v42  ;;  %1099 = vrcp.f32 %v696_v40  ;;  %v641_v56 = vadd.f32 %v882_v48, %v626_v46 }
 0x31d   :  { %v1082_v53 = vpop.eup %1081  ;;  %v612_v54 = vmul.f32 %v1080_v52, %v1316_v50  ;;  %1101 = vrsqrt.f32 %v602_v51 }
 0x31e   :  { %v1084_v55 = vpop.eup %1083  ;;  %v628_v60 = vmul.f32 %v1398_v29, %v613_v43  ;;  %v715_v5 = vmul.f32 %v1082_v53, %v893_v20  ;;  %v721_v6 = vmul.f32 %v713_v57, %v641_v56 }
 0x31f   :  { %v1086_v59 = vpop.eup %1085  ;;  %v627_v61 = vmul.f32 %v1398_v29, %v612_v54  ;;  %v716_v17 = vmul.f32 %v1084_v55, %v894_v22 }
 0x320   :  { %v1088_v0 = vpop.eup %1087  ;;  %v615_v42 = vmul.f32 %v1086_v59, %v1325_v58  ;;  %v643_v9 = vadd.f32 %v882_v48, %v628_v60 }
 0x321   :  { %v1090_v1 = vpop.eup %1089  ;;  %v614_v50 = vmul.f32 %v1088_v0, %v1314_v49  ;;  %v642_v2 = vadd.f32 %v882_v48, %v627_v61 }
 0x322   :  { %v1092_v3 = vpop.eup %1091  ;;  %v630_v10 = vmul.f32 %v1398_v29, %v615_v42  ;;  %v717_v18 = vmul.f32 %v1090_v1, %v897_v27  ;;  %v723_v23 = vmul.f32 %v715_v5, %v643_v9 }
 0x323   :  { %v1094_v7 = vpop.eup %1093  ;;  %v629_v16 = vmul.f32 %v1398_v29, %v614_v50  ;;  %v722_v19 = vmul.f32 %v714_v62, %v642_v2  ;;  %v718_v22 = vmul.f32 %v1092_v3, %v898_v30 }
 0x324   :  { %v1096_v58 = vpop.eup %1095  ;;  %v617_v11 = vmul.f32 %v1094_v7, %v1334_v4  ;;  %v645_v26 = vadd.f32 %v882_v48, %v630_v10 }
 0x325   :  { %v1098_v49 = vpop.eup %1097  ;;  %v644_v12 = vadd.f32 %v882_v48, %v629_v16  ;;  %v616_v13 = vmul.f32 %v1096_v58, %v1329_v63  ;;  %v729_v14 = vpack.c.bf16 %v722_v19, %v721_v6 }
 0x326   :  { %v1100_v20 = vpop.eup %1099  ;;  %v632_v15 = vmul.f32 %v1398_v29, %v617_v11  ;;  %v719_v24 = vmul.f32 %v1098_v49, %v901_v34  ;;  %v725_v35 = vmul.f32 %v717_v18, %v645_v26 }
 0x327   :  { %v1102_v21 = vpop.eup %1101  ;;  %v724_v25 = vmul.f32 %v716_v17, %v644_v12  ;;  %1000 = vmatprep.mubr.msk.bf16.mxu1 %vm513_vm3, %v729_v14  ;;  %v631_v4 = vmul.f32 %v1398_v29, %v616_v13  ;;  %v720_v30 = vmul.f32 %v1100_v20, %v902_v37 }
 0x328   :  { %v618_v63 = vmul.f32 %v1102_v21, %v1339_v8  ;;  %v647_v27 = vadd.f32 %v882_v48, %v632_v15 }
 0x329   :  { %v730_v28 = vpack.c.bf16 %v724_v25, %v723_v23  ;;  %v646_v32 = vadd.f32 %v882_v48, %v631_v4 }
 0x32a   :  { %v633_v33 = vmul.f32 %v1398_v29, %v618_v63  ;;  %v727_v40 = vmul.f32 %v719_v24, %v647_v27 }
 0x32b   :  { %1001 = vmatmul.mubr.msk.bf16.vlgmr.msra.gmra.mrb[12].mxu1 %vm513_vm3, %v730_v28  ;;  %v726_v36 = vmul.f32 %v718_v22, %v646_v32 }
 0x32c   :  { %v648_v38 = vadd.f32 %v882_v48, %v633_v33 }
 0x32d   :  { %v731_v39 = vpack.c.bf16 %v726_v36, %v725_v35 }
 0x32e   :  { %v728_v41 = vmul.f32 %v720_v30, %v648_v38 }
 0x32f   :  { %1004 = vmatprep.mubr.msk.bf16.mxu1 %vm513_vm3, %v731_v39 }
 0x330   :  { %v732_v8 = vpack.c.bf16 %v728_v41, %v727_v40 }
 0x333   :  { %1005 = vmatmul.mubr.msk.bf16.gmra.mrb[16].mxu1 %vm513_vm3, %v732_v8 }
 0x3fe   :  { %v1002_v29 = vpop.f32.mrb[12].mxu1 }
 0x3ff   :  { %818 = vst.msk [vmem:[%s1480_s9 + $0x10] sm:$0xff] %vm815_vm5, %v1002_v29  ;;  %v784_v31 = vpop.f32.mrb[13].mxu1 }
 0x400   :  { %816 = vst.msk [vmem:[%s1480_s9] sm:$0xff] %vm815_vm5, %v784_v31  ;;  %v1003_v34 = vpop.f32.mrb[14].mxu1 }
 0x401   :  { %819 = vst.msk [vmem:[%s1480_s9 + $0x18] sm:$0xff] %vm815_vm5, %v1003_v34  ;;  %v787_v37 = vpop.f32.mrb[15].mxu1 }
 0x402   :  { %817 = vst.msk [vmem:[%s1480_s9 + $0x8] sm:$0xff] %vm815_vm5, %v787_v37 }
 0x406   :  { %v1006_v44 = vpop.f32.mrb[16].mxu1 }
 0x407   :  { %822 = vst.msk [vmem:[%s1480_s9 + $0x30] sm:$0xff] %vm815_vm5, %v1006_v44  ;;  %v800_v45 = vpop.f32.mrb[17].mxu1 }
 0x408   :  { %820 = vst.msk [vmem:[%s1480_s9 + $0x20] sm:$0xff] %vm815_vm5, %v800_v45  ;;  %v1007_v46 = vpop.f32.mrb[18].mxu1 }
 0x409   :  { %823 = vst.msk [vmem:[%s1480_s9 + $0x38] sm:$0xff] %vm815_vm5, %v1007_v46  ;;  %v803_v47 = vpop.f32.mrb[19].mxu1 }
 0x40a   :  { %821 = vst.msk [vmem:[%s1480_s9 + $0x28] sm:$0xff] %vm815_vm5, %v803_v47 }

// kernel: _lambda_.4
= control target key start
LH: loop header
LB: loop body
LE: loop exit
PB: predicated region body
PF: predicated region fallthrough
CT: control target
= control target key end

     0   :  { %s2042_s27 = smov 0   ;;  %s2505_s0 = inlined_call_operand.vmem [shape: bf16[4,72,12], index: 0, kind: input, shape index: {}]   ;;  %s2506_s1 = inlined_call_operand.vmem [shape: bf16[4,12,4], index: 1, kind: input, shape index: {}]   ;;  %s2507_s2 = inlined_call_operand.vmem [shape: bf16[4,12,16], index: 2, kind: input, shape index: {}]   ;;  %s2508_s3 = inlined_call_operand.vmem [shape: bf16[4,12,16], index: 3, kind: input, shape index: {}]   ;;  %s2509_s4 = inlined_call_operand.vmem [shape: bf16[4,4,12], index: 4, kind: input, shape index: {}]   ;;  %s2510_s5 = inlined_call_operand.vmem [shape: f32[4,16,12], index: 5, kind: input, shape index: {}]   ;;  %s2511_s6 = inlined_call_operand.vmem [shape: f32[4,1,12], index: 6, kind: input, shape index: {}]   ;;  %s2512_s7 = inlined_call_operand.vmem [shape: f32[4,1,12], index: 7, kind: input, shape index: {}]   ;;  %s2513_s8 = inlined_call_operand.vmem [shape: f32[4,72,12], index: 8, kind: output, shape index: {}]  }
   0x1 LB: > { %s1682_s28 = sadd.s32 4294967295, %s1980_s27   ;;  %p1686_p0 = scmp.ge.s32.totalorder %s1980_s27, 1  ;;  %s1980_s27 = sphi %s2042_s27, %s18_s27  }
   0x2   : > { %p327_p1 = scmp.lt.s32.totalorder %s1980_s27, 5 }
   0x4   : > { %p328_p2 = pnand %p1686_p0, %p327_p1 }
   0x5   : > { %p391_p3 = scmp.lt.s32.totalorder (!%p328_p2), %s1682_s28, 3  ;;  %v1994_v0 = vmov (!%p328_p2), 0.0   ;;  %vm1995_vm0 = vmmov (!%p328_p2), 0   ;;  %vm487_vm1 = vcmask (!%p328_p2), 1045504   ;;  %vm471_vm2 = vcmask (!%p328_p2), 97280  }
   0x6   : > { %331 = sbr.rel (%p328_p2) target bundleno = 723 (0x2d3), region = 52  ;;  %1760 = vmatprep.subr.bf16.mxu0 (!%p328_p2), %v1994_v0  ;;  %1762 = vmatprep.mubr.msk.bf16.mxu0 (!%p328_p2), %vm1995_vm0, %v1994_v0  ;;  %vm775_vm3 = vcmask (!%p328_p2), 1041408   ;;  %vm645_vm4 = vcmask (!%p328_p2), 130048   ;;  %vm759_vm5 = vcmask (!%p328_p2), 31744  }
   0x7   : > { %1782 = vmatprep.subr.bf16.mxu1 (!%p328_p2), %v1994_v0  ;;  %1784 = vmatprep.mubr.msk.bf16.mxu1 (!%p328_p2), %vm1995_vm0, %v1994_v0 }
   0xd   : > { %s2515_s28 = smov (!%p391_p3, %s1682_s28), 3 }
   0xe   : > { %s2059_s29 = sshll.u32 %s2515_s28, 3  ;;  %s1735_s30 = sshll.u32 %s2515_s28, 4 }
   0xf   : > { %s400_s11 = scalar_lea.vmem %s2506_s1, %s2059_s29  ;;  %s419_s14 = scalar_lea.vmem %s2510_s5, %s1735_s30 }
  0x10   : > { %s422_s17 = scalar_lea.vmem %s2511_s6, %s2515_s28  ;;  %s1849_s18 = smul.u32 72, %s2515_s28  ;;  %v2074_v1 = vld [vmem:[%s419_s14] sm:$0xff]  ;;  %v2076_v3 = vld [vmem:[%s419_s14 + $0x8] sm:$0xff] }
  0x11   : > { %v1885_v2 = vld [vmem:[%s400_s11] sm:$0x3f]   ;;  %s1848_s19 = smul.u32 36, %s2515_s28  ;;  %s405_s22 = scalar_lea.vmem %s2507_s2, %s2059_s29 }
  0x12   : > { %v2078_v4 = vld [vmem:[%s422_s17] ss:$0 sm:$0xff]  ;;  %s2088_s25 = scalar_lea.vmem %s2513_s8, %s1849_s18  ;;  %s410_s9 = scalar_lea.vmem %s2508_s3, %s2059_s29  ;;  %v489_v6 = vsel %vm487_vm1, %v1885_v2, 0 }
  0x13   : > { %v1891_v5 = vld [vmem:[%s405_s22] sm:$0x3f]   ;;  %s2098_s12 = scalar_lea.vmem %s2505_s0, %s1848_s19  ;;  %s1694_s13 = sshll.u32 %s2515_s28, 1  ;;  %1761 = vmatpush3.bf16.msra.mxu0 %v489_v6 }
  0x14   : > { %v1886_v7 = vld [vmem:[%s2098_s12] sm:$0xff]   ;;  %v571_v8 = vsel %vm487_vm1, %v1891_v5, 0  ;;  %s414_s16 = scalar_lea.vmem %s2509_s4, %s1694_s13  ;;  %1804 = vmatprep.subr.bf16.mxu0 %v1994_v0  ;;  %v1887_v12 = vld [vmem:[%s2098_s12 + $0x8] sm:$0xff]   ;;  %v1888_v14 = vld [vmem:[%s2098_s12 + $0x10] sm:$0xff]   ;;  %s425_s18 = scalar_lea.vmem %s2512_s7, %s2515_s28 }
  0x15   : > { %1783 = vmatpush3.bf16.msra.mxu1 %v571_v8  ;;  %v751_v9 = vld [vmem:[%s414_s16] sm:$0x3]  ;;  %v1889_v15 = vld [vmem:[%s2098_s12 + $0x18] sm:$0xff]   ;;  %s2252_s28 = smov 0  }
  0x16   : > { %1826 = vmatprep.subr.bf16.mxu1 %v1994_v0  ;;  %1763 = vmatmul.mubr.msk.bf16.vlgmr.msra.gmra.mrb[0].mxu0 %vm471_vm2, %v1886_v7  ;;  %v777_v10 = vsel %vm775_vm3, %v751_v9, 0  ;;  %v1892_v11 = vld [vmem:[%s410_s9] sm:$0x3f]  }
  0x17   : > { %1766 = vmatprep.mubr.msk.bf16.mxu0 %vm1995_vm0, %v1994_v0  ;;  %v663_v13 = vsel %vm487_vm1, %v1892_v11, 0  ;;  %v1890_v16 = vld [vmem:[%s2098_s12 + $0x20] ss:$0 sps:$4 sm:$0xff]  }
  0x18   : > { %1785 = vmatmul.mubr.msk.bf16.vlgmr.msra.gmra.mrb[0].mxu1 %vm471_vm2, %v1886_v7  ;;  %1805 = vmatpush3.bf16.msra.mxu0 %v663_v13 }
  0x19   : > { %1788 = vmatprep.mubr.msk.bf16.mxu1 %vm1995_vm0, %v1994_v0  ;;  %1827 = vmatpush3.bf16.msra.mxu1 %v777_v10 }
  0x1e   : > { %1767 = vmatmul.mubr.msk.bf16.gmra.mrb[4].mxu0 %vm471_vm2, %v1887_v12 }
  0x1f   : > { %1770 = vmatprep.mubr.msk.bf16.mxu0 %vm1995_vm0, %v1994_v0 }
  0x20   : > { %1789 = vmatmul.mubr.msk.bf16.gmra.mrb[4].mxu1 %vm471_vm2, %v1887_v12 }
  0x21   : > { %1792 = vmatprep.mubr.msk.bf16.mxu1 %vm1995_vm0, %v1994_v0 }
  0x26   : > { %1771 = vmatmul.mubr.msk.bf16.gmra.mrb[8].mxu0 %vm471_vm2, %v1888_v14 }
  0x27   : > { %1774 = vmatprep.mubr.msk.bf16.mxu0 %vm1995_vm0, %v1994_v0 }
  0x28   : > { %1793 = vmatmul.mubr.msk.bf16.gmra.mrb[8].mxu1 %vm471_vm2, %v1888_v14 }
  0x29   : > { %1796 = vmatprep.mubr.msk.bf16.mxu1 %vm1995_vm0, %v1994_v0 }
  0x2e   : > { %1775 = vmatmul.mubr.msk.bf16.gmra.mrb[12].mxu0 %vm471_vm2, %v1889_v15 }
  0x2f   : > { %1778 = vmatprep.mubr.msk.bf16.mxu0 %vm1995_vm0, %v1994_v0 }
  0x30   : > { %1797 = vmatmul.mubr.msk.bf16.gmra.mrb[12].mxu1 %vm471_vm2, %v1889_v15 }
  0x31   : > { %1800 = vmatprep.mubr.msk.bf16.mxu1 %vm1995_vm0, %v1994_v0 }
  0x36   : > { %1779 = vmatmul.mubr.msk.bf16.gmra.mrb[16].mxu0 %vm471_vm2, %v1890_v16 }
  0x37   : > { %1806 = vmatprep.mubr.msk.bf16.mxu0 %vm1995_vm0, %v1994_v0 }
  0x38   : > { %1801 = vmatmul.mubr.msk.bf16.gmra.mrb[16].mxu1 %vm471_vm2, %v1890_v16 }
  0x39   : > { %1828 = vmatprep.mubr.msk.bf16.mxu1 %vm1995_vm0, %v1994_v0 }
  0x3e   : > { %1807 = vmatmul.mubr.msk.bf16.vlgmr.msra.gmra.mrb[20].mxu0 %vm471_vm2, %v1886_v7 }
  0x3f   : > { %1810 = vmatprep.mubr.msk.bf16.mxu0 %vm1995_vm0, %v1994_v0 }
  0x46   : > { %1811 = vmatmul.mubr.msk.bf16.gmra.mrb[24].mxu0 %vm471_vm2, %v1887_v12 }
  0x47   : > { %1814 = vmatprep.mubr.msk.bf16.mxu0 %vm1995_vm0, %v1994_v0 }
  0x4e   : > { %1815 = vmatmul.mubr.msk.bf16.gmra.mrb[28].mxu0 %vm471_vm2, %v1888_v14 }
  0x4f   : > { %1818 = vmatprep.mubr.msk.bf16.mxu0 %vm1995_vm0, %v1994_v0 }
  0x56   : > { %1819 = vmatmul.mubr.msk.bf16.gmra.mrb[32].mxu0 %vm471_vm2, %v1889_v15 }
  0x57   : > { %1822 = vmatprep.mubr.msk.bf16.mxu0 %vm1995_vm0, %v1994_v0 }
  0x5e   : > { %1823 = vmatmul.mubr.msk.bf16.gmra.mrb[36].mxu0 %vm471_vm2, %v1890_v16 }
  0xe9   : > { %v525_v17 = vpop.f32.mrb[0].mxu0 }
  0xea   : > { %v1764_v18 = vpop.f32.mrb[1].mxu0 }
  0xeb   : > { %v607_v19 = vpop.f32.mrb[0].mxu1  ;;  %v528_v20 = vpop.f32.mrb[2].mxu0 }
  0xec   : > { %646 = vst.msk [vmem:[#allocation3] sm:$0xff] %vm645_vm4, %v607_v19  ;;  %v1786_v21 = vpop.f32.mrb[1].mxu1  ;;  %v746_v22 = vpack.c.bf16 %v528_v20, %v525_v17  ;;  %v1765_v23 = vpop.f32.mrb[3].mxu0 }
  0xed   : > { %v610_v24 = vpop.f32.mrb[2].mxu1  ;;  %v2192_v21 = vld [vmem:[%s425_s18] ss:$0 sm:$0xff] }
  0xee   : > { %647 = vst.msk [vmem:[#allocation3 + $0x8] sm:$0xff] %vm645_vm4, %v610_v24  ;;  %v1787_v25 = vpop.f32.mrb[3].mxu1  ;;  %1829 = vmatmul.mubr.msk.bf16.vlgmr.msra.gmra.mrb[20].mxu1 %vm759_vm5, %v746_v22 }
  0xef   : > { %1832 = vmatprep.mubr.msk.bf16.mxu1 %vm1995_vm0, %v1994_v0 }
  0xf1   : > { %v533_v26 = vpop.f32.mrb[4].mxu0 }
  0xf2   : > { %v1768_v27 = vpop.f32.mrb[5].mxu0 }
  0xf3   : > { %v615_v28 = vpop.f32.mrb[4].mxu1  ;;  %v536_v29 = vpop.f32.mrb[6].mxu0 }
  0xf4   : > { %648 = vst.msk [vmem:[#allocation3 + $0x10] sm:$0xff] %vm645_vm4, %v615_v28  ;;  %v1790_v30 = vpop.f32.mrb[5].mxu1  ;;  %v747_v31 = vpack.c.bf16 %v536_v29, %v533_v26  ;;  %v1769_v32 = vpop.f32.mrb[7].mxu0 }
  0xf5   : > { %v618_v33 = vpop.f32.mrb[6].mxu1 }
  0xf6   : > { %649 = vst.msk [vmem:[#allocation3 + $0x18] sm:$0xff] %vm645_vm4, %v618_v33  ;;  %v1791_v34 = vpop.f32.mrb[7].mxu1  ;;  %1833 = vmatmul.mubr.msk.bf16.gmra.mrb[24].mxu1 %vm759_vm5, %v747_v31 }
  0xf7   : > { %1836 = vmatprep.mubr.msk.bf16.mxu1 %vm1995_vm0, %v1994_v0 }
  0xf9   : > { %v541_v35 = vpop.f32.mrb[8].mxu0 }
  0xfa   : > { %v1772_v36 = vpop.f32.mrb[9].mxu0 }
  0xfb   : > { %v623_v37 = vpop.f32.mrb[8].mxu1  ;;  %v544_v38 = vpop.f32.mrb[10].mxu0 }
  0xfc   : > { %650 = vst.msk [vmem:[#allocation3 + $0x20] sm:$0xff] %vm645_vm4, %v623_v37  ;;  %v1794_v39 = vpop.f32.mrb[9].mxu1  ;;  %v748_v40 = vpack.c.bf16 %v544_v38, %v541_v35  ;;  %v1773_v41 = vpop.f32.mrb[11].mxu0 }
  0xfd   : > { %v626_v42 = vpop.f32.mrb[10].mxu1 }
  0xfe   : > { %651 = vst.msk [vmem:[#allocation3 + $0x28] sm:$0xff] %vm645_vm4, %v626_v42  ;;  %v1795_v43 = vpop.f32.mrb[11].mxu1  ;;  %1837 = vmatmul.mubr.msk.bf16.gmra.mrb[28].mxu1 %vm759_vm5, %v748_v40 }
  0xff   : > { %1840 = vmatprep.mubr.msk.bf16.mxu1 %vm1995_vm0, %v1994_v0 }
 0x101   : > { %v549_v44 = vpop.f32.mrb[12].mxu0 }
 0x102   : > { %v1776_v45 = vpop.f32.mrb[13].mxu0 }
 0x103   : > { %v631_v46 = vpop.f32.mrb[12].mxu1  ;;  %v552_v47 = vpop.f32.mrb[14].mxu0 }
 0x104   : > { %652 = vst.msk [vmem:[#allocation3 + $0x30] sm:$0xff] %vm645_vm4, %v631_v46  ;;  %v1798_v48 = vpop.f32.mrb[13].mxu1  ;;  %v749_v49 = vpack.c.bf16 %v552_v47, %v549_v44  ;;  %v1777_v50 = vpop.f32.mrb[15].mxu0 }
 0x105   : > { %v634_v51 = vpop.f32.mrb[14].mxu1 }
 0x106   : > { %653 = vst.msk [vmem:[#allocation3 + $0x38] sm:$0xff] %vm645_vm4, %v634_v51  ;;  %v1799_v52 = vpop.f32.mrb[15].mxu1  ;;  %1841 = vmatmul.mubr.msk.bf16.gmra.mrb[32].mxu1 %vm759_vm5, %v749_v49 }
 0x107   : > { %1844 = vmatprep.mubr.msk.bf16.mxu1 %vm1995_vm0, %v1994_v0 }
 0x109   : > { %v557_v53 = vpop.f32.mrb[16].mxu0 }
 0x10a   : > { %v750_v54 = vpack.c.bf16 %v557_v53, %v557_v53  ;;  %v1780_v55 = vpop.f32.mrb[17].mxu0 }
 0x10b   : > { %v639_v56 = vpop.f32.mrb[16].mxu1  ;;  %v560_v57 = vpop.f32.mrb[18].mxu0 }
 0x10c   : > { %654 = vst.msk [vmem:[#allocation3 + $0x40] sm:$0xff] %vm645_vm4, %v639_v56  ;;  %v1802_v58 = vpop.f32.mrb[17].mxu1  ;;  %v1781_v59 = vpop.f32.mrb[19].mxu0 }
 0x10d   : > { %v642_v60 = vpop.f32.mrb[18].mxu1 }
 0x10e   : > { %v1803_v61 = vpop.f32.mrb[19].mxu1  ;;  %1845 = vmatmul.mubr.msk.bf16.gmra.mrb[36].mxu1 %vm759_vm5, %v750_v54 }
 0x111   : > { %v699_v62 = vpop.f32.mrb[20].mxu0 }
 0x112   : > { %737 = vst.msk [vmem:[#allocation4] sm:$0xff] %vm645_vm4, %v699_v62  ;;  %v1808_v63 = vpop.f32.mrb[21].mxu0 }
 0x113   : > { %v702_v2 = vpop.f32.mrb[22].mxu0 }
 0x114   : > { %738 = vst.msk [vmem:[#allocation4 + $0x8] sm:$0xff] %vm645_vm4, %v702_v2  ;;  %v1809_v0 = vpop.f32.mrb[23].mxu0 }
 0x119   : > { %v707_v5 = vpop.f32.mrb[24].mxu0 }
 0x11a   : > { %739 = vst.msk [vmem:[#allocation4 + $0x10] sm:$0xff] %vm645_vm4, %v707_v5  ;;  %v1812_v6 = vpop.f32.mrb[25].mxu0 }
 0x11b   : > { %v710_v7 = vpop.f32.mrb[26].mxu0 }
 0x11c   : > { %740 = vst.msk [vmem:[#allocation4 + $0x18] sm:$0xff] %vm645_vm4, %v710_v7  ;;  %v1813_v8 = vpop.f32.mrb[27].mxu0 }
 0x121   : > { %v715_v9 = vpop.f32.mrb[28].mxu0 }
 0x122   : > { %741 = vst.msk [vmem:[#allocation4 + $0x20] sm:$0xff] %vm645_vm4, %v715_v9  ;;  %v1816_v10 = vpop.f32.mrb[29].mxu0 }
 0x123   : > { %v718_v11 = vpop.f32.mrb[30].mxu0 }
 0x124   : > { %742 = vst.msk [vmem:[#allocation4 + $0x28] sm:$0xff] %vm645_vm4, %v718_v11  ;;  %v1817_v12 = vpop.f32.mrb[31].mxu0 }
 0x129   : > { %v723_v13 = vpop.f32.mrb[32].mxu0 }
 0x12a   : > { %743 = vst.msk [vmem:[#allocation4 + $0x30] sm:$0xff] %vm645_vm4, %v723_v13  ;;  %v1820_v14 = vpop.f32.mrb[33].mxu0 }
 0x12b   : > { %v726_v15 = vpop.f32.mrb[34].mxu0 }
 0x12c   : > { %744 = vst.msk [vmem:[#allocation4 + $0x38] sm:$0xff] %vm645_vm4, %v726_v15  ;;  %v1821_v16 = vpop.f32.mrb[35].mxu0 }
 0x131   : > { %v731_v17 = vpop.f32.mrb[36].mxu0 }
 0x132   : > { %745 = vst.msk [vmem:[#allocation4 + $0x40] sm:$0xff] %vm645_vm4, %v731_v17  ;;  %v1824_v18 = vpop.f32.mrb[37].mxu0 }
 0x133   : > { %v734_v19 = vpop.f32.mrb[38].mxu0 }
 0x134   : > { %v1825_v20 = vpop.f32.mrb[39].mxu0 }
 0x1c1   : > { %v813_v22 = vpop.f32.mrb[20].mxu1 }
 0x1c2   : > { %v2195_v23 = vadd.f32 %v2192_v21, %v813_v22  ;;  %v1830_v24 = vpop.f32.mrb[21].mxu1 }
 0x1c3   : > { %v816_v25 = vpop.f32.mrb[22].mxu1 }
 0x1c4   : > { %v860_v26 = vand.u32 2147483647, %v2195_v23  ;;  %v2199_v27 = vadd.f32 %v2192_v21, %v816_v25  ;;  %v1831_v28 = vpop.f32.mrb[23].mxu1  ;;  %v851_v17 = vmax.f32 %v2195_v23, 0.0 }
 0x1c6   : > { %v869_v29 = vsub.f32 0.0, %v860_v26  ;;  %v861_v30 = vand.u32 2147483647, %v2199_v27 }
 0x1c8   : > { %v878_v31 = vmul.f32 1.442695, %v869_v29  ;;  %v870_v32 = vsub.f32 0.0, %v861_v30  ;;  %v852_v30 = vmax.f32 %v2199_v27, 0.0 }
 0x1c9   : > { %v821_v33 = vpop.f32.mrb[24].mxu1 }
 0x1ca   : > { %1893 = vpow2.f32 %v878_v31  ;;  %v880_v34 = vmul.f32 1.442695, %v870_v32  ;;  %v2203_v35 = vadd.f32 %v2192_v21, %v821_v33  ;;  %v1834_v36 = vpop.f32.mrb[25].mxu1 }
 0x1cb   : > { %v824_v37 = vpop.f32.mrb[26].mxu1 }
 0x1cc   : > { %1895 = vpow2.f32 %v880_v34  ;;  %v862_v38 = vand.u32 2147483647, %v2203_v35  ;;  %v2207_v39 = vadd.f32 %v2192_v21, %v824_v37  ;;  %v1835_v40 = vpop.f32.mrb[27].mxu1  ;;  %v853_v27 = vmax.f32 %v2203_v35, 0.0 }
 0x1ce   : > { %v871_v41 = vsub.f32 0.0, %v862_v38  ;;  %v863_v42 = vand.u32 2147483647, %v2207_v39 }
 0x1d0   : > { %v882_v43 = vmul.f32 1.442695, %v871_v41  ;;  %v872_v44 = vsub.f32 0.0, %v863_v42 }
 0x1d1   : > { %v829_v45 = vpop.f32.mrb[28].mxu1 }
 0x1d2   : > { %1897 = vpow2.f32 %v882_v43  ;;  %v884_v46 = vmul.f32 1.442695, %v872_v44  ;;  %v2211_v47 = vadd.f32 %v2192_v21, %v829_v45  ;;  %v1838_v48 = vpop.f32.mrb[29].mxu1  ;;  %v854_v45 = vmax.f32 %v2207_v39, 0.0 }
 0x1d3   : > { %v832_v49 = vpop.f32.mrb[30].mxu1 }
 0x1d4   : > { %v1894_v50 = vpop.eup %1893  ;;  %1899 = vpow2.f32 %v884_v46  ;;  %v864_v51 = vand.u32 2147483647, %v2211_v47  ;;  %v2215_v52 = vadd.f32 %v2192_v21, %v832_v49  ;;  %v1839_v53 = vpop.f32.mrb[31].mxu1  ;;  %v855_v35 = vmax.f32 %v2211_v47, 0.0 }
 0x1d5   : > { %v896_v54 = vadd.f32 1.0, %v1894_v50 }
 0x1d6   : > { %v1896_v55 = vpop.eup %1895  ;;  %v873_v56 = vsub.f32 0.0, %v864_v51  ;;  %v865_v57 = vand.u32 2147483647, %v2215_v52 }
 0x1d7   : > { %1901 = vlog2.f32 %v896_v54  ;;  %v897_v58 = vadd.f32 1.0, %v1896_v55 }
 0x1d8   : > { %v886_v59 = vmul.f32 1.442695, %v873_v56  ;;  %v874_v60 = vsub.f32 0.0, %v865_v57  ;;  %v856_v57 = vmax.f32 %v2215_v52, 0.0 }
 0x1d9   : > { %1903 = vlog2.f32 %v897_v58  ;;  %v837_v61 = vpop.f32.mrb[32].mxu1 }
 0x1da   : > { %1905 = vpow2.f32 %v886_v59  ;;  %v888_v62 = vmul.f32 1.442695, %v874_v60  ;;  %v2219_v63 = vadd.f32 %v2192_v21, %v837_v61  ;;  %v1842_v2 = vpop.f32.mrb[33].mxu1 }
 0x1db   : > { %v840_v0 = vpop.f32.mrb[34].mxu1 }
 0x1dc   : > { %v1898_v5 = vpop.eup %1897  ;;  %1907 = vpow2.f32 %v888_v62  ;;  %v866_v6 = vand.u32 2147483647, %v2219_v63  ;;  %v2223_v7 = vadd.f32 %v2192_v21, %v840_v0  ;;  %v1843_v8 = vpop.f32.mrb[35].mxu1  ;;  %v857_v62 = vmax.f32 %v2219_v63, 0.0 }
 0x1dd   : > { %v898_v9 = vadd.f32 1.0, %v1898_v5  ;;  %v2250_v63 = vmov 0.0  }
 0x1de   : > { %v1900_v10 = vpop.eup %1899  ;;  %v875_v11 = vsub.f32 0.0, %v866_v6  ;;  %v867_v12 = vand.u32 2147483647, %v2223_v7  ;;  %v858_v5 = vmax.f32 %v2223_v7, 0.0 }
 0x1df   : > { %1909 = vlog2.f32 %v898_v9  ;;  %v899_v13 = vadd.f32 1.0, %v1900_v10 }
 0x1e0   : > { %v890_v14 = vmul.f32 1.442695, %v875_v11  ;;  %v876_v15 = vsub.f32 0.0, %v867_v12  ;;  %v2248_v12 = vmov 0.0  }
 0x1e1   : > { %v1902_v16 = vpop.eup %1901  ;;  %1911 = vlog2.f32 %v899_v13  ;;  %v845_v18 = vpop.f32.mrb[36].mxu1 }
 0x1e2   : > { %v906_v19 = vmul.f32 0.6931472, %v1902_v16  ;;  %1913 = vpow2.f32 %v890_v14  ;;  %v892_v20 = vmul.f32 1.442695, %v876_v15  ;;  %v2228_v22 = vadd.f32 %v2192_v21, %v845_v18  ;;  %v1846_v24 = vpop.f32.mrb[37].mxu1 }
 0x1e3   : > { %v1904_v25 = vpop.eup %1903  ;;  %v848_v26 = vpop.f32.mrb[38].mxu1 }
 0x1e4   : > { %v1906_v28 = vpop.eup %1905  ;;  %v923_v29 = vadd.f32 %v906_v19, %v851_v17  ;;  %v908_v31 = vmul.f32 0.6931472, %v1904_v25  ;;  %1915 = vpow2.f32 %v892_v20  ;;  %v1847_v32 = vpop.f32.mrb[39].mxu1  ;;  %v868_v23 = vand.u32 2147483647, %v2228_v22 }
 0x1e5   : > { %v900_v33 = vadd.f32 1.0, %v1906_v28  ;;  %v859_v9 = vmax.f32 %v2228_v22, 0.0 }
 0x1e6   : > { %v1908_v34 = vpop.eup %1907  ;;  %932 = vst.msk [vmem:[#allocation2] sm:$0xff] %vm471_vm2, %v923_v29  ;;  %v924_v36 = vadd.f32 %v908_v31, %v852_v30  ;;  %v877_v37 = vsub.f32 0.0, %v868_v23 }
 0x1e7   : > { %1917 = vlog2.f32 %v900_v33  ;;  %v901_v21 = vadd.f32 1.0, %v1908_v34 }
 0x1e8   : > { %933 = vst.msk [vmem:[#allocation2 + $0x8] sm:$0xff] %vm471_vm2, %v924_v36  ;;  %v894_v40 = vmul.f32 1.442695, %v877_v37 }
 0x1e9   : > { %v1910_v38 = vpop.eup %1909  ;;  %1919 = vlog2.f32 %v901_v21 }
 0x1ea   : > { %v910_v41 = vmul.f32 0.6931472, %v1910_v38  ;;  %1921 = vpow2.f32 %v894_v40 }
 0x1eb   : > { %v1912_v42 = vpop.eup %1911 }
 0x1ec   : > { %v1914_v43 = vpop.eup %1913  ;;  %v925_v44 = vadd.f32 %v910_v41, %v853_v27  ;;  %v912_v46 = vmul.f32 0.6931472, %v1912_v42 }
 0x1ed   : > { %v902_v48 = vadd.f32 1.0, %v1914_v43 }
 0x1ee   : > { %v1916_v49 = vpop.eup %1915  ;;  %934 = vst.msk [vmem:[#allocation2 + $0x10] sm:$0xff] %vm471_vm2, %v925_v44  ;;  %v926_v50 = vadd.f32 %v912_v46, %v854_v45 }
 0x1ef   : > { %1923 = vlog2.f32 %v902_v48  ;;  %v903_v51 = vadd.f32 1.0, %v1916_v49 }
 0x1f0   : > { %935 = vst.msk [vmem:[#allocation2 + $0x18] sm:$0xff] %vm471_vm2, %v926_v50 }
 0x1f1   : > { %v1918_v53 = vpop.eup %1917  ;;  %1925 = vlog2.f32 %v903_v51 }
 0x1f2   : > { %v914_v54 = vmul.f32 0.6931472, %v1918_v53 }
 0x1f3   : > { %v1920_v55 = vpop.eup %1919 }
 0x1f4   : > { %v927_v56 = vadd.f32 %v914_v54, %v855_v35  ;;  %v916_v39 = vmul.f32 0.6931472, %v1920_v55  ;;  %v1922_v58 = vpop.eup %1921 }
 0x1f5   : > { %v904_v60 = vadd.f32 1.0, %v1922_v58 }
 0x1f6   : > { %936 = vst.msk [vmem:[#allocation2 + $0x20] sm:$0xff] %vm471_vm2, %v927_v56  ;;  %v928_v59 = vadd.f32 %v916_v39, %v856_v57 }
 0x1f7   : > { %1927 = vlog2.f32 %v904_v60 }
 0x1f8   : > { %937 = vst.msk [vmem:[#allocation2 + $0x28] sm:$0xff] %vm471_vm2, %v928_v59 }
 0x1f9   : > { %v1924_v61 = vpop.eup %1923 }
 0x1fa   : > { %v918_v2 = vmul.f32 0.6931472, %v1924_v61 }
 0x1fb   : > { %v1926_v0 = vpop.eup %1925 }
 0x1fc   : > { %v929_v47 = vadd.f32 %v918_v2, %v857_v62  ;;  %v920_v6 = vmul.f32 0.6931472, %v1926_v0 }
 0x1fe   : > { %938 = vst.msk [vmem:[#allocation2 + $0x30] sm:$0xff] %vm471_vm2, %v929_v47  ;;  %v930_v52 = vadd.f32 %v920_v6, %v858_v5 }
 0x200   : > { %939 = vst.msk [vmem:[#allocation2 + $0x38] sm:$0xff] %vm471_vm2, %v930_v52 }
 0x201   : > { %v1928_v8 = vpop.eup %1927 }
 0x202   : > { %v922_v10 = vmul.f32 0.6931472, %v1928_v8 }
 0x204   : > { %v931_v11 = vadd.f32 %v922_v10, %v859_v9 }
 0x206   : > { %940 = vst.msk [vmem:[#allocation2 + $0x40] sm:$0xff] %vm471_vm2, %v931_v11 }
 0x207 LB: >> { %v970_v7 = vlaneseq  ;;  %s2264_s19 = sshll.u32 %s1992_s28, 3  ;;  %v1996_v14 = vmov 1966171168   ;;  %vm1506_vm6 = vcmask 1040384   ;;  %vm1509_vm7 = vcmask 1042432   ;;  %s949_s28 = sadd.s32 1, %s1992_s28   ;;  %s1992_s28 = sphi %s2252_s28, %s949_s28   ;;  %v1988_v63 = vphi %v2250_v63, %v2463_v63   ;;  %v1984_v12 = vphi %v2248_v12, %v2461_v12  }
 0x208   : >> { %v968_v15 = vunpack.c.l.s4 %v1996_v14  ;;  %s961_s20 = scalar_lea.vmem [#allocation3], %s2264_s19  ;;  %s953_s21 = sshra.s32 %s2264_s19, 3  ;;  %vm1511_vm8 = vcmask 1043456   ;;  %vm1513_vm9 = vcmask 1044480   ;;  %vm1516_vm10 = vcmask 1046528  }
 0x209   : >> { %v2266_v13 = vshrl.u32 %v970_v7, 7  ;;  %v2269_v16 = vld [vmem:[%s961_s20] sm:$0xff]  ;;  %s1728_s22 = sshll.u32 %s953_s21, 2  ;;  %s959_s24 = scalar_lea.vmem [#allocation2], %s2264_s19 }
 0x20a   : >> { %v969_v22 = vunpack.c.0.s8 %v968_v15  ;;  %s956_s23 = scalar_lea.vmem %s2098_s12, %s1728_s22  ;;  %s963_s26 = scalar_lea.vmem [#allocation4], %s2264_s19 }
 0x20b   : >> { %v2272_v17 = vsub.s32 0, %v2266_v13  ;;  %v1167_v18 = vsub.s32 1, %v2266_v13  ;;  %v1178_v24 = vsub.s32 2, %v2266_v13  ;;  %v2283_v25 = vld [vmem:[%s956_s23] sm:$0xf]  ;;  %v1189_v32 = vsub.s32 3, %v2266_v13  ;;  %s1526_s30 = scalar_lea.vmem %s2088_s25, %s2264_s19 }
 0x20c   : >> { %v972_v28 = vsub.s32 %v969_v22, %v2266_v13  ;;  %v958_v29 = vunpack.c.l.bf16 %v2283_v25  ;;  %v1200_v41 = vsub.s32 4, %v2266_v13  ;;  %v1211_v57 = vsub.s32 5, %v2266_v13  ;;  %p946_p4 = scmp.ge.s32.totalorder %s949_s28, 9  }
 0x20d   : >> { %v1168_v19 = vrot.slane %v2269_v16, %v1167_v18  ;;  %v1157_v20 = vrot.slane %v2269_v16, %v2272_v17  ;;  %v960_v26 = vld [vmem:[%s959_s24] sm:$0xff]  ;;  %v1179_v31 = vrot.slane %v2269_v16, %v1178_v24  ;;  %v1190_v38 = vrot.slane %v2269_v16, %v1189_v32 }
 0x20e   : >> { %v966_v30 = vcombine.high %v960_v26, %v960_v26  ;;  %v973_v33 = vrot.slane %v960_v26, %v972_v28  ;;  %v1103_v34 = vmul.f32 %v960_v26, %v958_v29  ;;  %v1201_v56 = vrot.slane %v2269_v16, %v1200_v41 }
 0x20f   : >> { %1170 = vbcast.lane.b32.xlu1 %v1168_v19, 256  ;;  %1159 = vbcast.lane.b32.xlu0 %v1157_v20, 256  ;;  %v1212_v5 = vrot.slane %v2269_v16, %v1211_v57  ;;  %v1222_v6 = vsub.s32 6, %v2266_v13 }
 0x210   : >> { %v980_v23 = vrot.slane %v966_v30, %v972_v28  ;;  %v981_v36 = vcombine.high %v973_v33, %v973_v33  ;;  %v989_v21 = vrot.slane %v973_v33, %v972_v28  ;;  %v1112_v40 = vrot.slane %v1103_v34, %v972_v28 }
 0x211   : >> { %v1105_v27 = vcombine.high %v1103_v34, %v1103_v34  ;;  %v1223_v14 = vrot.slane %v2269_v16, %v1222_v6  ;;  %v1233_v34 = vsub.s32 7, %v2266_v13 }
 0x212   : >> { %v996_v37 = vrot.slane %v980_v23, %v972_v28  ;;  %v1003_v42 = vrot.slane %v981_v36, %v972_v28  ;;  %v1011_v43 = vcombine.high %v989_v21, %v989_v21  ;;  %v2299_v44 = vrot.slane %v989_v21, %v2272_v17 }
 0x213   : >> { %1174 = vbcast.lane.b32.xlu1 %v1168_v19, 264  ;;  %1163 = vbcast.lane.b32.xlu0 %v1157_v20, 264  ;;  %v1120_v45 = vcombine.high %v1112_v40, %v1112_v40  ;;  %v1128_v46 = vrot.slane %v1112_v40, %v972_v28  ;;  %v1119_v48 = vrot.slane %v1105_v27, %v972_v28  ;;  %v964_v20 = vld [vmem:[%s963_s26] sm:$0xff] }
 0x214   : >> { %v2302_v49 = vrot.slane %v996_v37, %v2272_v17  ;;  %v2305_v50 = vrot.slane %v1003_v42, %v2272_v17  ;;  %v2308_v51 = vrot.slane %v1011_v43, %v2272_v17  ;;  %v982_v62 = vcombine.high %v980_v23, %v980_v23 }
 0x215   : >> { %v1142_v53 = vrot.slane %v1120_v45, %v972_v28  ;;  %v2311_v35 = vrot.slane %v1128_v46, %v2272_v17  ;;  %v1150_v54 = vcombine.high %v1128_v46, %v1128_v46  ;;  %v1135_v55 = vrot.slane %v1119_v48, %v972_v28 }
 0x216   : >> { %v1121_v39 = vcombine.high %v1119_v48, %v1119_v48  ;;  %v1013_v9 = vcombine.high %v1003_v42, %v1003_v42  ;;  %v1010_v10 = vrot.slane %v982_v62, %v972_v28  ;;  %v1012_v11 = vcombine.high %v996_v37, %v996_v37 }
 0x217   : >> { %1185 = vbcast.lane.b32.xlu1 %v1179_v31, 264  ;;  %1181 = vbcast.lane.b32.xlu0 %v1179_v31, 256  ;;  %v2318_v58 = vrot.slane %v1142_v53, %v2272_v17  ;;  %v2321_v59 = vrot.slane %v1150_v54, %v2272_v17  ;;  %v1152_v60 = vcombine.high %v1142_v53, %v1142_v53 }
 0x218   : >> { %v2324_v61 = vrot.slane %v1135_v55, %v2272_v17  ;;  %v1149_v2 = vrot.slane %v1121_v39, %v972_v28  ;;  %v1151_v0 = vcombine.high %v1135_v55, %v1135_v55  ;;  %v1030_v7 = vrot.slane %v1013_v9, %v2272_v17 }
 0x219   : >> { %v2327_v47 = vrot.slane %v1152_v60, %v2272_v17  ;;  %v2340_v15 = vrot.slane %v1010_v10, %v2272_v17  ;;  %v2343_v19 = vrot.slane %v1012_v11, %v2272_v17  ;;  %v1014_v22 = vcombine.high %v1010_v10, %v1010_v10 }
 0x21a   : >> { %v2332_v52 = vrot.slane %v1149_v2, %v2272_v17  ;;  %v2335_v8 = vrot.slane %v1151_v0, %v2272_v17  ;;  %v1153_v26 = vcombine.high %v1149_v2, %v1149_v2  ;;  %v1301_v28 = vrot.slane %v964_v20, %v2272_v17 }
 0x21b   : >> { %1196 = vbcast.lane.b32.xlu1 %v1190_v38, 264  ;;  %1192 = vbcast.lane.b32.xlu0 %v1190_v38, 256  ;;  %v2348_v30 = vrot.slane %v1014_v22, %v2272_v17  ;;  %v1312_v33 = vrot.slane %v964_v20, %v1167_v18  ;;  %v1323_v23 = vrot.slane %v964_v20, %v1178_v24 }
 0x21c   : >> { %v2351_v31 = vrot.slane %v1153_v26, %v2272_v17  ;;  %v1234_v36 = vrot.slane %v2269_v16, %v1233_v34  ;;  %v1334_v17 = vrot.slane %v964_v20, %v1189_v32  ;;  %v1345_v18 = vrot.slane %v964_v20, %v1200_v41 }
 0x21d   : >> { %v1356_v21 = vrot.slane %v964_v20, %v1211_v57  ;;  %v1367_v24 = vrot.slane %v964_v20, %v1222_v6  ;;  %v1378_v37 = vrot.slane %v964_v20, %v1233_v34  ;;  %v1055_v16 = vmul.f32 %v2299_v44, %v2074_v1 }
 0x21e   : >> { %v1056_v32 = vmul.f32 %v2299_v44, %v2076_v3  ;;  %v1057_v13 = vmul.f32 %v2305_v50, %v2074_v1  ;;  %v1058_v27 = vmul.f32 %v2305_v50, %v2076_v3  ;;  %v1059_v42 = vmul.f32 %v2308_v51, %v2074_v1 }
 0x21f   : >> { %1207 = vbcast.lane.b32.xlu1 %v1201_v56, 264  ;;  %1203 = vbcast.lane.b32.xlu0 %v1201_v56, 256  ;;  %v1071_v38 = vmul.f32 1.442695, %v1055_v16  ;;  %v1060_v45 = vmul.f32 %v2308_v51, %v2076_v3  ;;  %v1061_v46 = vmul.f32 %v1030_v7, %v2074_v1  ;;  %v1063_v53 = vmul.f32 %v2302_v49, %v2074_v1 }
 0x220   : >> { %v1073_v40 = vmul.f32 1.442695, %v1056_v32  ;;  %v1075_v41 = vmul.f32 1.442695, %v1057_v13  ;;  %v1077_v43 = vmul.f32 1.442695, %v1058_v27  ;;  %v1062_v50 = vmul.f32 %v1030_v7, %v2076_v3 }
 0x221   : >> { %1930 = vpow2.f32 %v1071_v38  ;;  %v1079_v44 = vmul.f32 1.442695, %v1059_v42  ;;  %v1081_v48 = vmul.f32 1.442695, %v1060_v45  ;;  %v1083_v55 = vmul.f32 1.442695, %v1061_v46 }
 0x222   : >> { %1932 = vpow2.f32 %v1073_v40  ;;  %v1064_v56 = vmul.f32 %v2302_v49, %v2076_v3  ;;  %v1087_v51 = vmul.f32 1.442695, %v1063_v53  ;;  %v1085_v2 = vmul.f32 1.442695, %v1062_v50 }
 0x223   : >> { %1218 = vbcast.lane.b32.xlu1 %v1212_v5, 264  ;;  %1214 = vbcast.lane.b32.xlu0 %v1212_v5, 256  ;;  %1934 = vpow2.f32 %v1075_v41  ;;  %v1065_v0 = vmul.f32 %v2340_v15, %v2074_v1  ;;  %v1067_v20 = vmul.f32 %v2343_v19, %v2074_v1 }
 0x224   : >> { %1936 = vpow2.f32 %v1077_v43  ;;  %v1089_v9 = vmul.f32 1.442695, %v1064_v56  ;;  %v1070_v43 = vmul.f32 %v2348_v30, %v2076_v3 }
 0x225   : >> { %1938 = vpow2.f32 %v1079_v44 }
 0x226   : >> { %1940 = vpow2.f32 %v1081_v48 }
 0x227   : >> { %1229 = vbcast.lane.b32.xlu1 %v1223_v14, 264  ;;  %1225 = vbcast.lane.b32.xlu0 %v1223_v14, 256  ;;  %1942 = vpow2.f32 %v1083_v55  ;;  %v1091_v14 = vmul.f32 1.442695, %v1065_v0 }
 0x228   : >> { %1944 = vpow2.f32 %v1087_v51 }
 0x229   : >> { %1946 = vpow2.f32 %v1085_v2 }
 0x22a   : >> { %1948 = vpow2.f32 %v1089_v9 }
 0x22b   : >> { %1307 = vbcast.lane.b32.xlu1 %v1301_v28, 264  ;;  %1303 = vbcast.lane.b32.xlu0 %v1301_v28, 256  ;;  %v1931_v54 = vpop.eup %1930  ;;  %1950 = vpow2.f32 %v1091_v14 }
 0x22c   : >> { %v1386_v57 = vmul.f32 %v1988_v63, %v1931_v54  ;;  %v1933_v39 = vpop.eup %1932  ;;  %v1066_v63 = vmul.f32 %v2340_v15, %v2076_v3 }
 0x22d   : >> { %v1935_v6 = vpop.eup %1934  ;;  %v1387_v10 = vmul.f32 %v1984_v12, %v1933_v39  ;;  %v1101_v39 = vmul.f32 1.442695, %v1070_v43 }
 0x22e   : >> { %v1937_v22 = vpop.eup %1936  ;;  %v1093_v15 = vmul.f32 1.442695, %v1066_v63 }
 0x22f   : >> { %1318 = vbcast.lane.b32.xlu1 %v1312_v33, 264  ;;  %1314 = vbcast.lane.b32.xlu0 %v1312_v33, 256  ;;  %v1939_v33 = vpop.eup %1938 }
 0x230   : >> { %1952 = vpow2.f32 %v1093_v15 }
 0x233   : >> { %1329 = vbcast.lane.b32.xlu1 %v1323_v23, 264  ;;  %1325 = vbcast.lane.b32.xlu0 %v1323_v23, 256 }
 0x237   : >> { %1240 = vbcast.lane.b32.xlu1 %v1234_v36, 264  ;;  %1236 = vbcast.lane.b32.xlu0 %v1234_v36, 256  ;;  %v1068_v36 = vmul.f32 %v2343_v19, %v2076_v3 }
 0x239   : >> { %v1097_v27 = vmul.f32 1.442695, %v1068_v36 }
 0x23b   : >> { %1340 = vbcast.lane.b32.xlu1 %v1334_v17, 264  ;;  %1336 = vbcast.lane.b32.xlu0 %v1334_v17, 256 }
 0x23f   : >> { %1351 = vbcast.lane.b32.xlu1 %v1345_v18, 264  ;;  %1347 = vbcast.lane.b32.xlu0 %v1345_v18, 256 }
 0x243   : >> { %1362 = vbcast.lane.b32.xlu1 %v1356_v21, 264  ;;  %1358 = vbcast.lane.b32.xlu0 %v1356_v21, 256  ;;  %v1095_v21 = vmul.f32 1.442695, %v1067_v20 }
 0x245   : >> { %1954 = vpow2.f32 %v1095_v21 }
 0x246   : >> { %1956 = vpow2.f32 %v1097_v27 }
 0x247   : >> { %1373 = vbcast.lane.b32.xlu1 %v1367_v24, 264  ;;  %1369 = vbcast.lane.b32.xlu0 %v1367_v24, 256  ;;  %v1069_v24 = vmul.f32 %v2348_v30, %v2074_v1 }
 0x24b   : >> { %1384 = vbcast.lane.b32.xlu1 %v1378_v37, 264  ;;  %1380 = vbcast.lane.b32.xlu0 %v1378_v37, 256 }
 0x281   : >> { %v1171_v60 = vpop.permute.xlu1 %1170  ;;  %v1160_v62 = vpop.permute.xlu0 %1159 }
 0x282   : >> { %v1282_v5 = vmul.f32 %v2311_v35, %v1160_v62  ;;  %v1284_v26 = vmul.f32 %v2318_v58, %v1171_v60 }
 0x284   : >> { %v2386_v11 = vadd.f32 %v1386_v57, %v1282_v5 }
 0x285   : >> { %v1175_v49 = vpop.permute.xlu1 %1174  ;;  %v1164_v7 = vpop.permute.xlu0 %1163 }
 0x286   : >> { %v1283_v28 = vmul.f32 %v2311_v35, %v1164_v7  ;;  %v1401_v12 = vmul.f32 %v1935_v6, %v2386_v11  ;;  %v1941_v35 = vpop.eup %1940  ;;  %v1285_v37 = vmul.f32 %v2318_v58, %v1175_v49  ;;  %v1099_v58 = vmul.f32 1.442695, %v1069_v24 }
 0x287   : >> { %v1943_v13 = vpop.eup %1942 }
 0x288   : >> { %v2395_v23 = vadd.f32 %v1387_v10, %v1283_v28  ;;  %v2397_v34 = vadd.f32 %v1401_v12, %v1284_v26  ;;  %v1945_v45 = vpop.eup %1944  ;;  %1958 = vpow2.f32 %v1099_v58 }
 0x289   : >> { %v1186_v17 = vpop.permute.xlu1 %1185  ;;  %v1182_v18 = vpop.permute.xlu0 %1181  ;;  %1960 = vpow2.f32 %v1101_v39 }
 0x28a   : >> { %v1286_v16 = vmul.f32 %v2321_v59, %v1182_v18  ;;  %v1402_v32 = vmul.f32 %v1937_v22, %v2395_v23  ;;  %v1416_v38 = vmul.f32 %v1939_v33, %v2397_v34  ;;  %v1287_v44 = vmul.f32 %v2321_v59, %v1186_v17  ;;  %v1947_v54 = vpop.eup %1946 }
 0x28b   : >> { %v1949_v56 = vpop.eup %1948 }
 0x28c   : >> { %v2407_v40 = vadd.f32 %v1402_v32, %v1285_v37  ;;  %v2409_v19 = vadd.f32 %v1416_v38, %v1286_v16  ;;  %v1951_v2 = vpop.eup %1950 }
 0x28d   : >> { %v1197_v41 = vpop.permute.xlu1 %1196  ;;  %v1193_v42 = vpop.permute.xlu0 %1192 }
 0x28e   : >> { %v1288_v46 = vmul.f32 %v2327_v47, %v1193_v42  ;;  %v1417_v48 = vmul.f32 %v1941_v35, %v2407_v40  ;;  %v1431_v53 = vmul.f32 %v1943_v13, %v2409_v19  ;;  %v1289_v30 = vmul.f32 %v2327_v47, %v1197_v41  ;;  %v1953_v10 = vpop.eup %1952 }
 0x28f   : >> { %v1955_v14 = vpop.eup %1954 }
 0x290   : >> { %v1419_v50 = vadd.f32 %v1417_v48, %v1287_v44  ;;  %v2417_v55 = vadd.f32 %v1431_v53, %v1288_v46  ;;  %v1957_v12 = vpop.eup %1956 }
 0x291   : >> { %v1208_v57 = vpop.permute.xlu1 %1207  ;;  %v1204_v51 = vpop.permute.xlu0 %1203 }
 0x292   : >> { %v1290_v59 = vmul.f32 %v2324_v61, %v1204_v51  ;;  %v1432_v60 = vmul.f32 %v1947_v54, %v1419_v50  ;;  %v1446_v62 = vmul.f32 %v1945_v45, %v2417_v55  ;;  %v1291_v63 = vmul.f32 %v2324_v61, %v1208_v57  ;;  %v1959_v17 = vpop.eup %1958 }
 0x293   : >> { %v1961_v13 = vpop.eup %1960 }
 0x294   : >> { %v2422_v0 = vadd.f32 %v1432_v60, %v1289_v30  ;;  %v2424_v5 = vadd.f32 %v1446_v62, %v1290_v59 }
 0x295   : >> { %v1219_v6 = vpop.permute.xlu1 %1218  ;;  %v1215_v9 = vpop.permute.xlu0 %1214 }
 0x296   : >> { %v1292_v49 = vmul.f32 %v2332_v52, %v1215_v9  ;;  %v1447_v47 = vmul.f32 %v1949_v56, %v2422_v0  ;;  %v1461_v7 = vmul.f32 %v1951_v2, %v2424_v5  ;;  %v1293_v33 = vmul.f32 %v2332_v52, %v1219_v6 }
 0x298   : >> { %v2430_v20 = vadd.f32 %v1447_v47, %v1291_v63  ;;  %v2432_v22 = vadd.f32 %v1461_v7, %v1292_v49 }
 0x299   : >> { %v1230_v26 = vpop.permute.xlu1 %1229  ;;  %v1226_v28 = vpop.permute.xlu0 %1225 }
 0x29a   : >> { %v1294_v15 = vmul.f32 %v2335_v8, %v1226_v28  ;;  %v1462_v61 = vmul.f32 %v1953_v10, %v2430_v20  ;;  %v1476_v36 = vmul.f32 %v1955_v14, %v2432_v22  ;;  %v1295_v24 = vmul.f32 %v2335_v8, %v1230_v26 }
 0x29c   : >> { %v2438_v18 = vadd.f32 %v1462_v61, %v1293_v33  ;;  %v2440_v21 = vadd.f32 %v1476_v36, %v1294_v15 }
 0x29d   : >> { %v1308_v35 = vpop.permute.xlu1 %1307  ;;  %v1304_v37 = vpop.permute.xlu0 %1303 }
 0x29e   : >> { %v1391_v16 = vmul.f32 %v2395_v23, %v1308_v35  ;;  %v1390_v32 = vmul.f32 %v2386_v11, %v1304_v37  ;;  %v1477_v52 = vmul.f32 %v1957_v12, %v2438_v18  ;;  %v1491_v38 = vmul.f32 %v1959_v17, %v2440_v21 }
 0x2a0   : >> { %v1393_v27 = vsel %vm471_vm2, %v1391_v16, 0.0  ;;  %v1392_v41 = vsel %vm471_vm2, %v1390_v32, 0.0  ;;  %v2449_v42 = vadd.f32 %v1477_v52, %v1295_v24 }
 0x2a1   : >> { %v1394_v43 = vadd.f32 %v1393_v27, %v1392_v41  ;;  %v1319_v58 = vpop.permute.xlu1 %1318  ;;  %v1315_v8 = vpop.permute.xlu0 %1314 }
 0x2a2   : >> { %v1406_v45 = vmul.f32 %v2407_v40, %v1319_v58  ;;  %v1405_v23 = vmul.f32 %v2397_v34, %v1315_v8  ;;  %v1492_v11 = vmul.f32 %v1961_v13, %v2449_v42 }
 0x2a3   : >> { %v1395_v44 = vrot.slane %v1394_v43, 4 }
 0x2a4   : >> { %v1408_v46 = vsel %vm471_vm2, %v1406_v45, 0.0  ;;  %v1407_v48 = vsel %vm471_vm2, %v1405_v23, 0.0 }
 0x2a5   : >> { %v1396_v53 = vadd.f32 %v1395_v44, %v1394_v43  ;;  %v1409_v54 = vadd.f32 %v1408_v46, %v1407_v48  ;;  %v1330_v56 = vpop.permute.xlu1 %1329  ;;  %v1326_v57 = vpop.permute.xlu0 %1325 }
 0x2a6   : >> { %v1421_v51 = vmul.f32 %v1419_v50, %v1330_v56  ;;  %v1420_v39 = vmul.f32 %v2409_v19, %v1326_v57 }
 0x2a7   : >> { %v1397_v30 = vrot.slane %v1396_v53, 2  ;;  %v1410_v59 = vrot.slane %v1409_v54, 4 }
 0x2a8   : >> { %v1423_v40 = vsel %vm471_vm2, %v1421_v51, 0.0  ;;  %v1422_v34 = vsel %vm471_vm2, %v1420_v39, 0.0 }
 0x2a9   : >> { %v1398_v60 = vadd.f32 %v1397_v30, %v1396_v53  ;;  %v1411_v62 = vadd.f32 %v1410_v59, %v1409_v54  ;;  %v1424_v2 = vadd.f32 %v1423_v40, %v1422_v34  ;;  %v1241_v6 = vpop.permute.xlu1 %1240  ;;  %v1237_v9 = vpop.permute.xlu0 %1236 }
 0x2aa   : >> { %v1297_v10 = vmul.f32 %v2351_v31, %v1241_v6  ;;  %v1296_v63 = vmul.f32 %v2351_v31, %v1237_v9 }
 0x2ab   : >> { %v1412_v49 = vrot.slane %v1411_v62, 2  ;;  %v1425_v47 = vrot.slane %v1424_v2, 4  ;;  %v1399_v19 = vrot.slane %v1398_v60, 1 }
 0x2ac   : >> { %v2461_v12 = vadd.f32 %v1492_v11, %v1297_v10   ;;  %v2463_v63 = vadd.f32 %v1491_v38, %v1296_v63  }
 0x2ad   : >> { %v1413_v50 = vadd.f32 %v1412_v49, %v1411_v62  ;;  %v1426_v7 = vadd.f32 %v1425_v47, %v1424_v2  ;;  %v1341_v14 = vpop.permute.xlu1 %1340  ;;  %v1337_v26 = vpop.permute.xlu0 %1336  ;;  %v1400_v17 = vadd.f32 %v1399_v19, %v1398_v60 }
 0x2ae   : >> { %v1436_v28 = vmul.f32 %v2422_v0, %v1341_v14  ;;  %v1435_v33 = vmul.f32 %v2417_v55, %v1337_v26 }
 0x2af   : >> { %v1414_v15 = vrot.slane %v1413_v50, 1  ;;  %v1427_v61 = vrot.slane %v1426_v7, 2 }
 0x2b0   : >> { %v1438_v31 = vsel %vm471_vm2, %v1436_v28, 0.0  ;;  %v1437_v36 = vsel %vm471_vm2, %v1435_v33, 0.0 }
 0x2b1   : >> { %v1415_v24 = vadd.f32 %v1414_v15, %v1413_v50  ;;  %v1428_v35 = vadd.f32 %v1427_v61, %v1426_v7  ;;  %v1439_v37 = vadd.f32 %v1438_v31, %v1437_v36  ;;  %v1352_v16 = vpop.permute.xlu1 %1351  ;;  %v1348_v32 = vpop.permute.xlu0 %1347 }
 0x2b2   : >> { %v1451_v52 = vmul.f32 %v2430_v20, %v1352_v16  ;;  %v1450_v38 = vmul.f32 %v2424_v5, %v1348_v32 }
 0x2b3   : >> { %v1429_v0 = vrot.slane %v1428_v35, 1  ;;  %v1507_v13 = vsel %vm1506_vm6, %v1400_v17, %v1415_v24  ;;  %v1440_v55 = vrot.slane %v1439_v37, 4 }
 0x2b4   : >> { %v1453_v27 = vsel %vm471_vm2, %v1451_v52, 0.0  ;;  %v1452_v41 = vsel %vm471_vm2, %v1450_v38, 0.0 }
 0x2b5   : >> { %v1430_v43 = vadd.f32 %v1429_v0, %v1428_v35  ;;  %v1441_v58 = vadd.f32 %v1440_v55, %v1439_v37  ;;  %v1454_v8 = vadd.f32 %v1453_v27, %v1452_v41  ;;  %v1363_v45 = vpop.permute.xlu1 %1362  ;;  %v1359_v23 = vpop.permute.xlu0 %1358  ;;  %v1524_v41 = vmul.f32 %v2078_v4, %v958_v29 }
 0x2b6   : >> { %v1466_v11 = vmul.f32 %v2438_v18, %v1363_v45  ;;  %v1465_v44 = vmul.f32 %v2432_v22, %v1359_v23 }
 0x2b7   : >> { %v1508_v20 = vsel %vm775_vm3, %v1507_v13, %v1430_v43  ;;  %v1442_v46 = vrot.slane %v1441_v58, 2  ;;  %v1455_v5 = vrot.slane %v1454_v8, 4 }
 0x2b8   : >> { %v1468_v48 = vsel %vm471_vm2, %v1466_v11, 0.0  ;;  %v1467_v53 = vsel %vm471_vm2, %v1465_v44, 0.0 }
 0x2b9   : >> { %v1443_v54 = vadd.f32 %v1442_v46, %v1441_v58  ;;  %v1456_v56 = vadd.f32 %v1455_v5, %v1454_v8  ;;  %v1469_v57 = vadd.f32 %v1468_v48, %v1467_v53  ;;  %v1374_v51 = vpop.permute.xlu1 %1373  ;;  %v1370_v39 = vpop.permute.xlu0 %1369 }
 0x2ba   : >> { %v1481_v30 = vmul.f32 %v2449_v42, %v1374_v51  ;;  %v1480_v59 = vmul.f32 %v2440_v21, %v1370_v39 }
 0x2bb   : >> { %v1444_v18 = vrot.slane %v1443_v54, 1  ;;  %v1457_v40 = vrot.slane %v1456_v56, 2  ;;  %v1470_v22 = vrot.slane %v1469_v57, 4 }
 0x2bc   : >> { %v1483_v34 = vsel %vm471_vm2, %v1481_v30, 0.0  ;;  %v1482_v60 = vsel %vm471_vm2, %v1480_v59, 0.0 }
 0x2bd   : >> { %v1445_v62 = vadd.f32 %v1444_v18, %v1443_v54  ;;  %v1458_v2 = vadd.f32 %v1457_v40, %v1456_v56  ;;  %v1471_v6 = vadd.f32 %v1470_v22, %v1469_v57  ;;  %v1484_v9 = vadd.f32 %v1483_v34, %v1482_v60  ;;  %v1385_v10 = vpop.permute.xlu1 %1384  ;;  %v1381_v49 = vpop.permute.xlu0 %1380 }
 0x2be   : >> { %v1496_v47 = vmul.f32 %v2461_v12, %v1385_v10  ;;  %v1495_v42 = vmul.f32 %v2463_v63, %v1381_v49 }
 0x2bf   : >> { %v1510_v19 = vsel %vm1509_vm7, %v1508_v20, %v1445_v62  ;;  %v1459_v21 = vrot.slane %v1458_v2, 1  ;;  %v1472_v50 = vrot.slane %v1471_v6, 2  ;;  %v1485_v7 = vrot.slane %v1484_v9, 4 }
 0x2c0   : >> { %v1498_v14 = vsel %vm471_vm2, %v1496_v47, 0.0  ;;  %v1497_v26 = vsel %vm471_vm2, %v1495_v42, 0.0 }
 0x2c1   : >> { %v1460_v28 = vadd.f32 %v1459_v21, %v1458_v2  ;;  %v1473_v33 = vadd.f32 %v1472_v50, %v1471_v6  ;;  %v1486_v15 = vadd.f32 %v1485_v7, %v1484_v9  ;;  %v1499_v61 = vadd.f32 %v1498_v14, %v1497_v26 }
 0x2c3   : >> { %v1512_v31 = vsel %vm1511_vm8, %v1510_v19, %v1460_v28  ;;  %v1474_v36 = vrot.slane %v1473_v33, 1  ;;  %v1487_v17 = vrot.slane %v1486_v15, 2  ;;  %v1500_v24 = vrot.slane %v1499_v61, 4 }
 0x2c5   : >> { %v1475_v35 = vadd.f32 %v1474_v36, %v1473_v33  ;;  %v1488_v37 = vadd.f32 %v1487_v17, %v1486_v15  ;;  %v1501_v16 = vadd.f32 %v1500_v24, %v1499_v61 }
 0x2c7   : >> { %v1489_v32 = vrot.slane %v1488_v37, 1  ;;  %v1514_v52 = vsel %vm1513_vm9, %v1512_v31, %v1475_v35  ;;  %v1502_v38 = vrot.slane %v1501_v16, 2 }
 0x2c9   : >> { %v1490_v0 = vadd.f32 %v1489_v32, %v1488_v37  ;;  %v1503_v13 = vadd.f32 %v1502_v38, %v1501_v16 }
 0x2cb   : >> { %v1515_v55 = vsel %vm487_vm1, %v1514_v52, %v1490_v0  ;;  %v1504_v27 = vrot.slane %v1503_v13, 1 }
 0x2cc   : > { %948 = sbr.rel (!%p946_p4) target bundleno = 519 (0x207), region = 115 }
 0x2cd   : >> { %v1505_v43 = vadd.f32 %v1504_v27, %v1503_v13 }
 0x2cf   : >> { %v1517_v58 = vsel %vm1516_vm10, %v1515_v55, %v1505_v43 }
 0x2d0   : >> { %v1525_v8 = vadd.f32 %v1524_v41, %v1517_v58 }
 0x2d2   : >> { %1527 = vst.msk [vmem:[%s1526_s30] sm:$0xff] %vm471_vm2, %v1525_v8 }
 0x2d3 PF: > { %s18_s27 = sadd.s32 1, %s1980_s27  }
 0x2d4   : > { %p15_p5 = scmp.ge.s32.totalorder %s18_s27, 6  }
 0x2d6   :  { %17 = sbr.rel (!%p15_p5) target bundleno = 1 (0x1), region = 126 }

</bundles_post_ra>
